<compile_context>
chip_gen: v7x
topology: tpu7x:2x2x1
jax: 0.10.0
libtpu: 0.0.40
codegen_flags: <defaults>
</compile_context>

<pallas_src>
import functools

import jax
import jax.numpy as jnp
from jax.experimental import pallas as pl
from jax.experimental.pallas import tpu as pltpu

EMB_SIZE = 32
IN_DIM = EMB_SIZE + 4      # 36
HID = 128                  # hp.hidden_size
N_LAYERS = 2               # hp.n_layers
OUT_DIM = 4


def _gate_math(gates, c):
    """PyTorch LSTM gate math from (B, 4H) f32 pre-activations. Order i,f,g,o."""
    i_f = jax.nn.sigmoid(gates[:, :2 * HID])        # i and f in one EUP call
    i = i_f[:, :HID]
    f = i_f[:, HID:]
    g = jnp.tanh(gates[:, 2 * HID:3 * HID])
    o = jax.nn.sigmoid(gates[:, 3 * HID:])
    c_new = f * c + i * g
    h_new = o * jnp.tanh(c_new)
    return h_new, c_new


def _box_lstm_kernel(T, B,
                     x_ref, wih0_ref, whh0_ref, b0_ref,
                     w1_ref, b1_ref, wout_ref, bout_ref,
                     o_ref,
                     gx0_s, h1all_s):
    """T: timesteps, B: (padded) batch.

    x_ref   : (T*B, IN_DIM) bf16, time-major rows [t*B : (t+1)*B]
    o_ref   : (T*B, OUT_DIM) f32
    gx0_s   : (T*B, 4*HID) f32 scratch  (layer-0 input projection)
    h1all_s : (T*B, HID)  f32 scratch  (layer-1 hidden states for the head)
    """
    # --- layer-0 input projection for every timestep: ONE matmul, bias folded.
    gx0_s[...] = (jnp.dot(x_ref[...], wih0_ref[...],
                          preferred_element_type=jnp.float32)
                  + b0_ref[...])

    # Hoist the layer-1 bias broadcast out of the loop (JAX doesn't CSE it).
    b1 = jnp.broadcast_to(b1_ref[...], (B, 4 * HID))

    # Zero-initialized state, as in the PyTorch forward(); register-resident.
    h0 = jnp.zeros((B, HID), jnp.float32)
    c0 = jnp.zeros((B, HID), jnp.float32)
    h1 = jnp.zeros((B, HID), jnp.float32)
    c1 = jnp.zeros((B, HID), jnp.float32)

    # T is small and static -> fully unrolled, LLO-visible schedule.
    # TODO(synk): switch to lax.fori_loop(unroll=4) if T grows to many dozens.
    for t in range(T):
        # ---- layer 0: only the recurrent matmul sits on the critical chain.
        gates0 = (gx0_s[pl.ds(t * B, B), :]
                  + jnp.dot(h0.astype(jnp.bfloat16), whh0_ref[...],
                            preferred_element_type=jnp.float32))
        h0, c0 = _gate_math(gates0, c0)

        # ---- layer 1: fused input+recurrent matmul (K = 2*HID = 256).
        #      (nn.LSTM inter-layer dropout is inactive in eval -> no-op.)
        xh = jnp.concatenate([h0, h1], axis=-1).astype(jnp.bfloat16)
        gates1 = (jnp.dot(xh, w1_ref[...],
                          preferred_element_type=jnp.float32)
                  + b1)
        h1, c1 = _gate_math(gates1, c1)

        # Lane-dense (B, 128) store, off the recurrent dependency chain.
        h1all_s[pl.ds(t * B, B), :] = h1

    # --- Linear head once for all timesteps: one matmul + one store.
    o_ref[...] = (jnp.dot(h1all_s[...].astype(jnp.bfloat16), wout_ref[...],
                          preferred_element_type=jnp.float32)
                  + bout_ref[...]).astype(o_ref.dtype)


def box_lstm_forward(x, params):
    """x: (B, T, IN_DIM) batch-first float32. Returns (B, T, OUT_DIM) float32."""
    B, T, D = x.shape
    assert D == IN_DIM

    # Pad the batch to a multiple of 8 (f32 sublane count): aligned row
    # accesses in-kernel and full sublane utilisation. Padding rows discarded.
    Bp = max(8, ((B + 7) // 8) * 8)

    x_tm = jnp.transpose(x, (1, 0, 2))                        # (T, B, D)
    x_tm = jnp.pad(x_tm, ((0, 0), (0, Bp - B), (0, 0)))       # (T, Bp, D)
    x_flat = x_tm.reshape(T * Bp, D).astype(jnp.bfloat16)     # time-major rows

    bf = lambda a: a.astype(jnp.bfloat16)
    # Fuse layer-1 input + recurrent weights -> single K=256 matmul per step.
    w1 = jnp.concatenate([params["wih1"], params["whh1"]], axis=0)   # (2H, 4H)

    kernel = functools.partial(_box_lstm_kernel, T, Bp)

    out_flat = pl.pallas_call(
        kernel,
        out_shape=jax.ShapeDtypeStruct((T * Bp, OUT_DIM), jnp.float32),
        in_specs=[pl.BlockSpec(memory_space=pltpu.MemorySpace.VMEM)] * 8,
        out_specs=pl.BlockSpec(memory_space=pltpu.MemorySpace.VMEM),
        scratch_shapes=[
            pltpu.VMEM((T * Bp, 4 * HID), jnp.float32),   # layer-0 x-projection
            pltpu.VMEM((T * Bp, HID), jnp.float32),       # h1 states for head
        ],
    )(x_flat,
      bf(params["wih0"]), bf(params["whh0"]), params["b0"],
      bf(w1), params["b1"],
      bf(params["wout"]), params["bout"])

    out = out_flat.reshape(T, Bp, OUT_DIM)[:, :B, :]          # drop padding
    return jnp.transpose(out, (1, 0, 2))                      # (B, T, OUT_DIM)


def init_params(key):
    """Deterministic synthetic weights, PyTorch-style U(-1/sqrt(H), 1/sqrt(H)).

    Stored pre-transposed for (x @ W) matmuls:
      wih0: (IN_DIM, 4H), whh0/wih1/whh1: (H, 4H), wout: (H, 4)
      biases folded: b = b_ih + b_hh, shape (1, 4H)
    """
    k = 1.0 / jnp.sqrt(HID)
    keys = jax.random.split(key, 10)

    def u(kk, shape):
        return jax.random.uniform(kk, shape, jnp.float32, -k, k)

    return {
        "wih0": u(keys[0], (IN_DIM, 4 * HID)),
        "whh0": u(keys[1], (HID, 4 * HID)),
        "b0":   u(keys[2], (1, 4 * HID)) + u(keys[3], (1, 4 * HID)),
        "wih1": u(keys[4], (HID, 4 * HID)),
        "whh1": u(keys[5], (HID, 4 * HID)),
        "b1":   u(keys[6], (1, 4 * HID)) + u(keys[7], (1, 4 * HID)),
        "wout": u(keys[8], (HID, OUT_DIM)),
        "bout": u(keys[9], (1, OUT_DIM)),
    }


def box_lstm_reference(x, p):
    """Pure-JAX mirror of the PyTorch forward pass.

    MXU operands are cast to bf16 with f32 accumulation, matching the kernel's
    matmul precision, so the comparison isolates implementation correctness.
    All gate / cell elementwise math stays f32 exactly as in the kernel.
    """
    bf = lambda a: a.astype(jnp.bfloat16)

    def cell(xt, h, c, wih, whh, b):
        gates = (jnp.dot(bf(xt), bf(wih), preferred_element_type=jnp.float32)
                 + jnp.dot(bf(h), bf(whh), preferred_element_type=jnp.float32)
                 + b)
        i = jax.nn.sigmoid(gates[:, :HID])
        f = jax.nn.sigmoid(gates[:, HID:2 * HID])
        g = jnp.tanh(gates[:, 2 * HID:3 * HID])
        o = jax.nn.sigmoid(gates[:, 3 * HID:])
        c_new = f * c + i * g
        h_new = o * jnp.tanh(c_new)
        return h_new, c_new

    B, T, _ = x.shape
    h0 = jnp.zeros((B, HID)); c0 = jnp.zeros((B, HID))
    h1 = jnp.zeros((B, HID)); c1 = jnp.zeros((B, HID))
    outs = []
    for t in range(T):
        xt = x[:, t, :]
        h0, c0 = cell(xt, h0, c0, p["wih0"], p["whh0"], p["b0"])
        h1, c1 = cell(h0, h1, c1, p["wih1"], p["whh1"], p["b1"])
        outs.append(jnp.dot(bf(h1), bf(p["wout"]),
                            preferred_element_type=jnp.float32) + p["bout"])
    return jnp.stack(outs, axis=1)


if __name__ == "__main__":
    key = jax.random.PRNGKey(0)
    k_x, k_p = jax.random.split(key)

    B, T = 2, 8
    x = jax.random.normal(k_x, (B, T, IN_DIM), jnp.float32)
    params = init_params(k_p)

    out = jax.block_until_ready(box_lstm_forward(x, params))
    ref = jax.block_until_ready(box_lstm_reference(x, params))

    assert out.shape == (B, T, OUT_DIM)
    assert jnp.allclose(out, ref, atol=2e-3, rtol=2e-3)
    print("KERNEL_OK")
</pallas_src>

<mosaic_0001>
module attributes {stable_mosaic.version = 11 : i64} {
  func.func @_box_lstm_kernel(%arg0: memref<64x36xbf16, #tpu.memory_space<vmem>>, %arg1: memref<36x512xbf16, #tpu.memory_space<vmem>>, %arg2: memref<128x512xbf16, #tpu.memory_space<vmem>>, %arg3: memref<1x512xf32, #tpu.memory_space<vmem>>, %arg4: memref<256x512xbf16, #tpu.memory_space<vmem>>, %arg5: memref<1x512xf32, #tpu.memory_space<vmem>>, %arg6: memref<128x4xbf16, #tpu.memory_space<vmem>>, %arg7: memref<1x4xf32, #tpu.memory_space<vmem>>, %arg8: memref<64x4xf32, #tpu.memory_space<vmem>>, %arg9: memref<64x512xf32, #tpu.memory_space<vmem>>, %arg10: memref<64x128xf32, #tpu.memory_space<vmem>>) attributes {dimension_semantics = [], scalar_prefetch = 0 : i64, scratch_operands = 2 : i64, tpu.core_type = #tpu.core_type<tc>} {
    %c0 = arith.constant 0 : index
    %c0_0 = arith.constant 0 : index
    %0 = vector.load %arg0[%c0, %c0_0] : memref<64x36xbf16, #tpu.memory_space<vmem>>, vector<64x36xbf16>
    %c0_1 = arith.constant 0 : index
    %c0_2 = arith.constant 0 : index
    %1 = vector.load %arg1[%c0_1, %c0_2] : memref<36x512xbf16, #tpu.memory_space<vmem>>, vector<36x512xbf16>
    %cst = arith.constant dense<0.000000e+00> : vector<64x512xf32>
    %2 = tpu.matmul %0, %1, %cst {dimension_numbers = #tpu.dot_dimension_numbers<[1], [0], [0], [1], [0, 0, 1, 1], [], []>} : vector<64x36xbf16>, vector<36x512xbf16>, vector<64x512xf32> -> vector<64x512xf32>
    %c0_3 = arith.constant 0 : index
    %c0_4 = arith.constant 0 : index
    %3 = vector.load %arg3[%c0_3, %c0_4] : memref<1x512xf32, #tpu.memory_space<vmem>>, vector<1x512xf32>
    %4 = vector.broadcast %3 : vector<1x512xf32> to vector<64x512xf32>
    %5 = arith.addf %2, %4 : vector<64x512xf32>
    %c0_5 = arith.constant 0 : index
    %c0_6 = arith.constant 0 : index
    %6 = vector.load %arg9[%c0_5, %c0_6] : memref<64x512xf32, #tpu.memory_space<vmem>>, vector<64x512xf32>
    tpu.vector_store %arg9[%c0_5, %c0_6], %5 {strides = array<i32>} : memref<64x512xf32, #tpu.memory_space<vmem>>, vector<64x512xf32>,
    %c0_7 = arith.constant 0 : index
    %c0_8 = arith.constant 0 : index
    %7 = vector.load %arg5[%c0_7, %c0_8] : memref<1x512xf32, #tpu.memory_space<vmem>>, vector<1x512xf32>
    %8 = vector.shape_cast %7 : vector<1x512xf32> to vector<1x512xf32>
    %9 = vector.broadcast %8 : vector<1x512xf32> to vector<8x512xf32>
    %cst_9 = arith.constant 0.000000e+00 : f32
    %10 = vector.broadcast %cst_9 : f32 to vector<8x128xf32>
    %cst_10 = arith.constant 0.000000e+00 : f32
    %11 = vector.broadcast %cst_10 : f32 to vector<8x128xf32>
    %cst_11 = arith.constant 0.000000e+00 : f32
    %12 = vector.broadcast %cst_11 : f32 to vector<8x128xf32>
    %cst_12 = arith.constant 0.000000e+00 : f32
    %13 = vector.broadcast %cst_12 : f32 to vector<8x128xf32>
    %c0_13 = arith.constant 0 : index
    %c0_14 = arith.constant 0 : index
    %14 = vector.load %arg9[%c0_13, %c0_14] : memref<64x512xf32, #tpu.memory_space<vmem>>, vector<8x512xf32>
    %15 = arith.truncf %10 : vector<8x128xf32> to vector<8x128xbf16>
    %c0_15 = arith.constant 0 : index
    %c0_16 = arith.constant 0 : index
    %16 = vector.load %arg2[%c0_15, %c0_16] : memref<128x512xbf16, #tpu.memory_space<vmem>>, vector<128x512xbf16>
    %cst_17 = arith.constant dense<0.000000e+00> : vector<8x512xf32>
    %17 = tpu.matmul %15, %16, %cst_17 {dimension_numbers = #tpu.dot_dimension_numbers<[1], [0], [0], [1], [0, 0, 1, 1], [], []>} : vector<8x128xbf16>, vector<128x512xbf16>, vector<8x512xf32> -> vector<8x512xf32>
    %18 = arith.addf %14, %17 : vector<8x512xf32>
    %19 = vector.extract_strided_slice %18 {offsets = [0, 0], sizes = [8, 256], strides = [1, 1]} : vector<8x512xf32> to vector<8x256xf32>
    %20 = arith.negf %19 : vector<8x256xf32>
    %21 = math.exp %20 : vector<8x256xf32>
    %cst_18 = arith.constant 1.000000e+00 : f32
    %22 = vector.broadcast %cst_18 : f32 to vector<8x256xf32>
    %23 = arith.addf %22, %21 : vector<8x256xf32>
    %24 = arith.divf %22, %23 : vector<8x256xf32>
    %25 = vector.extract_strided_slice %24 {offsets = [0, 0], sizes = [8, 128], strides = [1, 1]} : vector<8x256xf32> to vector<8x128xf32>
    %26 = vector.extract_strided_slice %24 {offsets = [0, 128], sizes = [8, 128], strides = [1, 1]} : vector<8x256xf32> to vector<8x128xf32>
    %27 = vector.extract_strided_slice %18 {offsets = [0, 256], sizes = [8, 128], strides = [1, 1]} : vector<8x512xf32> to vector<8x128xf32>
    %28 = math.tanh %27 : vector<8x128xf32>
    %29 = vector.extract_strided_slice %18 {offsets = [0, 384], sizes = [8, 128], strides = [1, 1]} : vector<8x512xf32> to vector<8x128xf32>
    %30 = arith.negf %29 : vector<8x128xf32>
    %31 = math.exp %30 : vector<8x128xf32>
    %cst_19 = arith.constant 1.000000e+00 : f32
    %32 = vector.broadcast %cst_19 : f32 to vector<8x128xf32>
    %33 = arith.addf %32, %31 : vector<8x128xf32>
    %34 = arith.divf %32, %33 : vector<8x128xf32>
    %35 = arith.mulf %26, %11 : vector<8x128xf32>
    %36 = arith.mulf %25, %28 : vector<8x128xf32>
    %37 = arith.addf %35, %36 : vector<8x128xf32>
    %38 = math.tanh %37 : vector<8x128xf32>
    %39 = arith.mulf %34, %38 : vector<8x128xf32>
    %40 = tpu.concatenate %39, %12 in 1 : vector<8x128xf32>, vector<8x128xf32> -> vector<8x256xf32>
    %41 = arith.truncf %40 : vector<8x256xf32> to vector<8x256xbf16>
    %c0_20 = arith.constant 0 : index
    %c0_21 = arith.constant 0 : index
    %42 = vector.load %arg4[%c0_20, %c0_21] : memref<256x512xbf16, #tpu.memory_space<vmem>>, vector<256x512xbf16>
    %cst_22 = arith.constant dense<0.000000e+00> : vector<8x512xf32>
    %43 = tpu.matmul %41, %42, %cst_22 {dimension_numbers = #tpu.dot_dimension_numbers<[1], [0], [0], [1], [0, 0, 1, 1], [], []>} : vector<8x256xbf16>, vector<256x512xbf16>, vector<8x512xf32> -> vector<8x512xf32>
    %44 = arith.addf %43, %9 : vector<8x512xf32>
    %45 = vector.extract_strided_slice %44 {offsets = [0, 0], sizes = [8, 256], strides = [1, 1]} : vector<8x512xf32> to vector<8x256xf32>
    %46 = arith.negf %45 : vector<8x256xf32>
    %47 = math.exp %46 : vector<8x256xf32>
    %cst_23 = arith.constant 1.000000e+00 : f32
    %48 = vector.broadcast %cst_23 : f32 to vector<8x256xf32>
    %49 = arith.addf %48, %47 : vector<8x256xf32>
    %50 = arith.divf %48, %49 : vector<8x256xf32>
    %51 = vector.extract_strided_slice %50 {offsets = [0, 0], sizes = [8, 128], strides = [1, 1]} : vector<8x256xf32> to vector<8x128xf32>
    %52 = vector.extract_strided_slice %50 {offsets = [0, 128], sizes = [8, 128], strides = [1, 1]} : vector<8x256xf32> to vector<8x128xf32>
    %53 = vector.extract_strided_slice %44 {offsets = [0, 256], sizes = [8, 128], strides = [1, 1]} : vector<8x512xf32> to vector<8x128xf32>
    %54 = math.tanh %53 : vector<8x128xf32>
    %55 = vector.extract_strided_slice %44 {offsets = [0, 384], sizes = [8, 128], strides = [1, 1]} : vector<8x512xf32> to vector<8x128xf32>
    %56 = arith.negf %55 : vector<8x128xf32>
    %57 = math.exp %56 : vector<8x128xf32>
    %cst_24 = arith.constant 1.000000e+00 : f32
    %58 = vector.broadcast %cst_24 : f32 to vector<8x128xf32>
    %59 = arith.addf %58, %57 : vector<8x128xf32>
    %60 = arith.divf %58, %59 : vector<8x128xf32>
    %61 = arith.mulf %52, %13 : vector<8x128xf32>
    %62 = arith.mulf %51, %54 : vector<8x128xf32>
    %63 = arith.addf %61, %62 : vector<8x128xf32>
    %64 = math.tanh %63 : vector<8x128xf32>
    %65 = arith.mulf %60, %64 : vector<8x128xf32>
    %c0_25 = arith.constant 0 : index
    %c0_26 = arith.constant 0 : index
    %66 = vector.load %arg10[%c0_25, %c0_26] : memref<64x128xf32, #tpu.memory_space<vmem>>, vector<8x128xf32>
    tpu.vector_store %arg10[%c0_25, %c0_26], %65 {strides = array<i32>} : memref<64x128xf32, #tpu.memory_space<vmem>>, vector<8x128xf32>,
    %c8 = arith.constant 8 : index
    %c0_27 = arith.constant 0 : index
    %67 = vector.load %arg9[%c8, %c0_27] : memref<64x512xf32, #tpu.memory_space<vmem>>, vector<8x512xf32>
    %68 = arith.truncf %39 : vector<8x128xf32> to vector<8x128xbf16>
    %c0_28 = arith.constant 0 : index
    %c0_29 = arith.constant 0 : index
    %69 = vector.load %arg2[%c0_28, %c0_29] : memref<128x512xbf16, #tpu.memory_space<vmem>>, vector<128x512xbf16>
    %cst_30 = arith.constant dense<0.000000e+00> : vector<8x512xf32>
    %70 = tpu.matmul %68, %69, %cst_30 {dimension_numbers = #tpu.dot_dimension_numbers<[1], [0], [0], [1], [0, 0, 1, 1], [], []>} : vector<8x128xbf16>, vector<128x512xbf16>, vector<8x512xf32> -> vector<8x512xf32>
    %71 = arith.addf %67, %70 : vector<8x512xf32>
    %72 = vector.extract_strided_slice %71 {offsets = [0, 0], sizes = [8, 256], strides = [1, 1]} : vector<8x512xf32> to vector<8x256xf32>
    %73 = arith.negf %72 : vector<8x256xf32>
    %74 = math.exp %73 : vector<8x256xf32>
    %cst_31 = arith.constant 1.000000e+00 : f32
    %75 = vector.broadcast %cst_31 : f32 to vector<8x256xf32>
    %76 = arith.addf %75, %74 : vector<8x256xf32>
    %77 = arith.divf %75, %76 : vector<8x256xf32>
    %78 = vector.extract_strided_slice %77 {offsets = [0, 0], sizes = [8, 128], strides = [1, 1]} : vector<8x256xf32> to vector<8x128xf32>
    %79 = vector.extract_strided_slice %77 {offsets = [0, 128], sizes = [8, 128], strides = [1, 1]} : vector<8x256xf32> to vector<8x128xf32>
    %80 = vector.extract_strided_slice %71 {offsets = [0, 256], sizes = [8, 128], strides = [1, 1]} : vector<8x512xf32> to vector<8x128xf32>
    %81 = math.tanh %80 : vector<8x128xf32>
    %82 = vector.extract_strided_slice %71 {offsets = [0, 384], sizes = [8, 128], strides = [1, 1]} : vector<8x512xf32> to vector<8x128xf32>
    %83 = arith.negf %82 : vector<8x128xf32>
    %84 = math.exp %83 : vector<8x128xf32>
    %cst_32 = arith.constant 1.000000e+00 : f32
    %85 = vector.broadcast %cst_32 : f32 to vector<8x128xf32>
    %86 = arith.addf %85, %84 : vector<8x128xf32>
    %87 = arith.divf %85, %86 : vector<8x128xf32>
    %88 = arith.mulf %79, %37 : vector<8x128xf32>
    %89 = arith.mulf %78, %81 : vector<8x128xf32>
    %90 = arith.addf %88, %89 : vector<8x128xf32>
    %91 = math.tanh %90 : vector<8x128xf32>
    %92 = arith.mulf %87, %91 : vector<8x128xf32>
    %93 = tpu.concatenate %92, %65 in 1 : vector<8x128xf32>, vector<8x128xf32> -> vector<8x256xf32>
    %94 = arith.truncf %93 : vector<8x256xf32> to vector<8x256xbf16>
    %c0_33 = arith.constant 0 : index
    %c0_34 = arith.constant 0 : index
    %95 = vector.load %arg4[%c0_33, %c0_34] : memref<256x512xbf16, #tpu.memory_space<vmem>>, vector<256x512xbf16>
    %cst_35 = arith.constant dense<0.000000e+00> : vector<8x512xf32>
    %96 = tpu.matmul %94, %95, %cst_35 {dimension_numbers = #tpu.dot_dimension_numbers<[1], [0], [0], [1], [0, 0, 1, 1], [], []>} : vector<8x256xbf16>, vector<256x512xbf16>, vector<8x512xf32> -> vector<8x512xf32>
    %97 = arith.addf %96, %9 : vector<8x512xf32>
    %98 = vector.extract_strided_slice %97 {offsets = [0, 0], sizes = [8, 256], strides = [1, 1]} : vector<8x512xf32> to vector<8x256xf32>
    %99 = arith.negf %98 : vector<8x256xf32>
    %100 = math.exp %99 : vector<8x256xf32>
    %cst_36 = arith.constant 1.000000e+00 : f32
    %101 = vector.broadcast %cst_36 : f32 to vector<8x256xf32>
    %102 = arith.addf %101, %100 : vector<8x256xf32>
    %103 = arith.divf %101, %102 : vector<8x256xf32>
    %104 = vector.extract_strided_slice %103 {offsets = [0, 0], sizes = [8, 128], strides = [1, 1]} : vector<8x256xf32> to vector<8x128xf32>
    %105 = vector.extract_strided_slice %103 {offsets = [0, 128], sizes = [8, 128], strides = [1, 1]} : vector<8x256xf32> to vector<8x128xf32>
    %106 = vector.extract_strided_slice %97 {offsets = [0, 256], sizes = [8, 128], strides = [1, 1]} : vector<8x512xf32> to vector<8x128xf32>
    %107 = math.tanh %106 : vector<8x128xf32>
    %108 = vector.extract_strided_slice %97 {offsets = [0, 384], sizes = [8, 128], strides = [1, 1]} : vector<8x512xf32> to vector<8x128xf32>
    %109 = arith.negf %108 : vector<8x128xf32>
    %110 = math.exp %109 : vector<8x128xf32>
    %cst_37 = arith.constant 1.000000e+00 : f32
    %111 = vector.broadcast %cst_37 : f32 to vector<8x128xf32>
    %112 = arith.addf %111, %110 : vector<8x128xf32>
    %113 = arith.divf %111, %112 : vector<8x128xf32>
    %114 = arith.mulf %105, %63 : vector<8x128xf32>
    %115 = arith.mulf %104, %107 : vector<8x128xf32>
    %116 = arith.addf %114, %115 : vector<8x128xf32>
    %117 = math.tanh %116 : vector<8x128xf32>
    %118 = arith.mulf %113, %117 : vector<8x128xf32>
    %c8_38 = arith.constant 8 : index
    %c0_39 = arith.constant 0 : index
    %119 = vector.load %arg10[%c8_38, %c0_39] : memref<64x128xf32, #tpu.memory_space<vmem>>, vector<8x128xf32>
    tpu.vector_store %arg10[%c8_38, %c0_39], %118 {strides = array<i32>} : memref<64x128xf32, #tpu.memory_space<vmem>>, vector<8x128xf32>,
    %c16 = arith.constant 16 : index
    %c0_40 = arith.constant 0 : index
    %120 = vector.load %arg9[%c16, %c0_40] : memref<64x512xf32, #tpu.memory_space<vmem>>, vector<8x512xf32>
    %121 = arith.truncf %92 : vector<8x128xf32> to vector<8x128xbf16>
    %c0_41 = arith.constant 0 : index
    %c0_42 = arith.constant 0 : index
    %122 = vector.load %arg2[%c0_41, %c0_42] : memref<128x512xbf16, #tpu.memory_space<vmem>>, vector<128x512xbf16>
    %cst_43 = arith.constant dense<0.000000e+00> : vector<8x512xf32>
    %123 = tpu.matmul %121, %122, %cst_43 {dimension_numbers = #tpu.dot_dimension_numbers<[1], [0], [0], [1], [0, 0, 1, 1], [], []>} : vector<8x128xbf16>, vector<128x512xbf16>, vector<8x512xf32> -> vector<8x512xf32>
    %124 = arith.addf %120, %123 : vector<8x512xf32>
    %125 = vector.extract_strided_slice %124 {offsets = [0, 0], sizes = [8, 256], strides = [1, 1]} : vector<8x512xf32> to vector<8x256xf32>
    %126 = arith.negf %125 : vector<8x256xf32>
    %127 = math.exp %126 : vector<8x256xf32>
    %cst_44 = arith.constant 1.000000e+00 : f32
    %128 = vector.broadcast %cst_44 : f32 to vector<8x256xf32>
    %129 = arith.addf %128, %127 : vector<8x256xf32>
    %130 = arith.divf %128, %129 : vector<8x256xf32>
    %131 = vector.extract_strided_slice %130 {offsets = [0, 0], sizes = [8, 128], strides = [1, 1]} : vector<8x256xf32> to vector<8x128xf32>
    %132 = vector.extract_strided_slice %130 {offsets = [0, 128], sizes = [8, 128], strides = [1, 1]} : vector<8x256xf32> to vector<8x128xf32>
    %133 = vector.extract_strided_slice %124 {offsets = [0, 256], sizes = [8, 128], strides = [1, 1]} : vector<8x512xf32> to vector<8x128xf32>
    %134 = math.tanh %133 : vector<8x128xf32>
    %135 = vector.extract_strided_slice %124 {offsets = [0, 384], sizes = [8, 128], strides = [1, 1]} : vector<8x512xf32> to vector<8x128xf32>
    %136 = arith.negf %135 : vector<8x128xf32>
    %137 = math.exp %136 : vector<8x128xf32>
    %cst_45 = arith.constant 1.000000e+00 : f32
    %138 = vector.broadcast %cst_45 : f32 to vector<8x128xf32>
    %139 = arith.addf %138, %137 : vector<8x128xf32>
    %140 = arith.divf %138, %139 : vector<8x128xf32>
    %141 = arith.mulf %132, %90 : vector<8x128xf32>
    %142 = arith.mulf %131, %134 : vector<8x128xf32>
    %143 = arith.addf %141, %142 : vector<8x128xf32>
    %144 = math.tanh %143 : vector<8x128xf32>
    %145 = arith.mulf %140, %144 : vector<8x128xf32>
    %146 = tpu.concatenate %145, %118 in 1 : vector<8x128xf32>, vector<8x128xf32> -> vector<8x256xf32>
    %147 = arith.truncf %146 : vector<8x256xf32> to vector<8x256xbf16>
    %c0_46 = arith.constant 0 : index
    %c0_47 = arith.constant 0 : index
    %148 = vector.load %arg4[%c0_46, %c0_47] : memref<256x512xbf16, #tpu.memory_space<vmem>>, vector<256x512xbf16>
    %cst_48 = arith.constant dense<0.000000e+00> : vector<8x512xf32>
    %149 = tpu.matmul %147, %148, %cst_48 {dimension_numbers = #tpu.dot_dimension_numbers<[1], [0], [0], [1], [0, 0, 1, 1], [], []>} : vector<8x256xbf16>, vector<256x512xbf16>, vector<8x512xf32> -> vector<8x512xf32>
    %150 = arith.addf %149, %9 : vector<8x512xf32>
    %151 = vector.extract_strided_slice %150 {offsets = [0, 0], sizes = [8, 256], strides = [1, 1]} : vector<8x512xf32> to vector<8x256xf32>
    %152 = arith.negf %151 : vector<8x256xf32>
    %153 = math.exp %152 : vector<8x256xf32>
    %cst_49 = arith.constant 1.000000e+00 : f32
    %154 = vector.broadcast %cst_49 : f32 to vector<8x256xf32>
    %155 = arith.addf %154, %153 : vector<8x256xf32>
    %156 = arith.divf %154, %155 : vector<8x256xf32>
    %157 = vector.extract_strided_slice %156 {offsets = [0, 0], sizes = [8, 128], strides = [1, 1]} : vector<8x256xf32> to vector<8x128xf32>
    %158 = vector.extract_strided_slice %156 {offsets = [0, 128], sizes = [8, 128], strides = [1, 1]} : vector<8x256xf32> to vector<8x128xf32>
    %159 = vector.extract_strided_slice %150 {offsets = [0, 256], sizes = [8, 128], strides = [1, 1]} : vector<8x512xf32> to vector<8x128xf32>
    %160 = math.tanh %159 : vector<8x128xf32>
    %161 = vector.extract_strided_slice %150 {offsets = [0, 384], sizes = [8, 128], strides = [1, 1]} : vector<8x512xf32> to vector<8x128xf32>
    %162 = arith.negf %161 : vector<8x128xf32>
    %163 = math.exp %162 : vector<8x128xf32>
    %cst_50 = arith.constant 1.000000e+00 : f32
    %164 = vector.broadcast %cst_50 : f32 to vector<8x128xf32>
    %165 = arith.addf %164, %163 : vector<8x128xf32>
    %166 = arith.divf %164, %165 : vector<8x128xf32>
    %167 = arith.mulf %158, %116 : vector<8x128xf32>
    %168 = arith.mulf %157, %160 : vector<8x128xf32>
    %169 = arith.addf %167, %168 : vector<8x128xf32>
    %170 = math.tanh %169 : vector<8x128xf32>
    %171 = arith.mulf %166, %170 : vector<8x128xf32>
    %c16_51 = arith.constant 16 : index
    %c0_52 = arith.constant 0 : index
    %172 = vector.load %arg10[%c16_51, %c0_52] : memref<64x128xf32, #tpu.memory_space<vmem>>, vector<8x128xf32>
    tpu.vector_store %arg10[%c16_51, %c0_52], %171 {strides = array<i32>} : memref<64x128xf32, #tpu.memory_space<vmem>>, vector<8x128xf32>,
    %c24 = arith.constant 24 : index
    %c0_53 = arith.constant 0 : index
    %173 = vector.load %arg9[%c24, %c0_53] : memref<64x512xf32, #tpu.memory_space<vmem>>, vector<8x512xf32>
    %174 = arith.truncf %145 : vector<8x128xf32> to vector<8x128xbf16>
    %c0_54 = arith.constant 0 : index
    %c0_55 = arith.constant 0 : index
    %175 = vector.load %arg2[%c0_54, %c0_55] : memref<128x512xbf16, #tpu.memory_space<vmem>>, vector<128x512xbf16>
    %cst_56 = arith.constant dense<0.000000e+00> : vector<8x512xf32>
    %176 = tpu.matmul %174, %175, %cst_56 {dimension_numbers = #tpu.dot_dimension_numbers<[1], [0], [0], [1], [0, 0, 1, 1], [], []>} : vector<8x128xbf16>, vector<128x512xbf16>, vector<8x512xf32> -> vector<8x512xf32>
    %177 = arith.addf %173, %176 : vector<8x512xf32>
    %178 = vector.extract_strided_slice %177 {offsets = [0, 0], sizes = [8, 256], strides = [1, 1]} : vector<8x512xf32> to vector<8x256xf32>
    %179 = arith.negf %178 : vector<8x256xf32>
    %180 = math.exp %179 : vector<8x256xf32>
    %cst_57 = arith.constant 1.000000e+00 : f32
    %181 = vector.broadcast %cst_57 : f32 to vector<8x256xf32>
    %182 = arith.addf %181, %180 : vector<8x256xf32>
    %183 = arith.divf %181, %182 : vector<8x256xf32>
    %184 = vector.extract_strided_slice %183 {offsets = [0, 0], sizes = [8, 128], strides = [1, 1]} : vector<8x256xf32> to vector<8x128xf32>
    %185 = vector.extract_strided_slice %183 {offsets = [0, 128], sizes = [8, 128], strides = [1, 1]} : vector<8x256xf32> to vector<8x128xf32>
    %186 = vector.extract_strided_slice %177 {offsets = [0, 256], sizes = [8, 128], strides = [1, 1]} : vector<8x512xf32> to vector<8x128xf32>
    %187 = math.tanh %186 : vector<8x128xf32>
    %188 = vector.extract_strided_slice %177 {offsets = [0, 384], sizes = [8, 128], strides = [1, 1]} : vector<8x512xf32> to vector<8x128xf32>
    %189 = arith.negf %188 : vector<8x128xf32>
    %190 = math.exp %189 : vector<8x128xf32>
    %cst_58 = arith.constant 1.000000e+00 : f32
    %191 = vector.broadcast %cst_58 : f32 to vector<8x128xf32>
    %192 = arith.addf %191, %190 : vector<8x128xf32>
    %193 = arith.divf %191, %192 : vector<8x128xf32>
    %194 = arith.mulf %185, %143 : vector<8x128xf32>
    %195 = arith.mulf %184, %187 : vector<8x128xf32>
    %196 = arith.addf %194, %195 : vector<8x128xf32>
    %197 = math.tanh %196 : vector<8x128xf32>
    %198 = arith.mulf %193, %197 : vector<8x128xf32>
    %199 = tpu.concatenate %198, %171 in 1 : vector<8x128xf32>, vector<8x128xf32> -> vector<8x256xf32>
    %200 = arith.truncf %199 : vector<8x256xf32> to vector<8x256xbf16>
    %c0_59 = arith.constant 0 : index
    %c0_60 = arith.constant 0 : index
    %201 = vector.load %arg4[%c0_59, %c0_60] : memref<256x512xbf16, #tpu.memory_space<vmem>>, vector<256x512xbf16>
    %cst_61 = arith.constant dense<0.000000e+00> : vector<8x512xf32>
    %202 = tpu.matmul %200, %201, %cst_61 {dimension_numbers = #tpu.dot_dimension_numbers<[1], [0], [0], [1], [0, 0, 1, 1], [], []>} : vector<8x256xbf16>, vector<256x512xbf16>, vector<8x512xf32> -> vector<8x512xf32>
    %203 = arith.addf %202, %9 : vector<8x512xf32>
    %204 = vector.extract_strided_slice %203 {offsets = [0, 0], sizes = [8, 256], strides = [1, 1]} : vector<8x512xf32> to vector<8x256xf32>
    %205 = arith.negf %204 : vector<8x256xf32>
    %206 = math.exp %205 : vector<8x256xf32>
    %cst_62 = arith.constant 1.000000e+00 : f32
    %207 = vector.broadcast %cst_62 : f32 to vector<8x256xf32>
    %208 = arith.addf %207, %206 : vector<8x256xf32>
    %209 = arith.divf %207, %208 : vector<8x256xf32>
    %210 = vector.extract_strided_slice %209 {offsets = [0, 0], sizes = [8, 128], strides = [1, 1]} : vector<8x256xf32> to vector<8x128xf32>
    %211 = vector.extract_strided_slice %209 {offsets = [0, 128], sizes = [8, 128], strides = [1, 1]} : vector<8x256xf32> to vector<8x128xf32>
    %212 = vector.extract_strided_slice %203 {offsets = [0, 256], sizes = [8, 128], strides = [1, 1]} : vector<8x512xf32> to vector<8x128xf32>
    %213 = math.tanh %212 : vector<8x128xf32>
    %214 = vector.extract_strided_slice %203 {offsets = [0, 384], sizes = [8, 128], strides = [1, 1]} : vector<8x512xf32> to vector<8x128xf32>
    %215 = arith.negf %214 : vector<8x128xf32>
    %216 = math.exp %215 : vector<8x128xf32>
    %cst_63 = arith.constant 1.000000e+00 : f32
    %217 = vector.broadcast %cst_63 : f32 to vector<8x128xf32>
    %218 = arith.addf %217, %216 : vector<8x128xf32>
    %219 = arith.divf %217, %218 : vector<8x128xf32>
    %220 = arith.mulf %211, %169 : vector<8x128xf32>
    %221 = arith.mulf %210, %213 : vector<8x128xf32>
    %222 = arith.addf %220, %221 : vector<8x128xf32>
    %223 = math.tanh %222 : vector<8x128xf32>
    %224 = arith.mulf %219, %223 : vector<8x128xf32>
    %c24_64 = arith.constant 24 : index
    %c0_65 = arith.constant 0 : index
    %225 = vector.load %arg10[%c24_64, %c0_65] : memref<64x128xf32, #tpu.memory_space<vmem>>, vector<8x128xf32>
    tpu.vector_store %arg10[%c24_64, %c0_65], %224 {strides = array<i32>} : memref<64x128xf32, #tpu.memory_space<vmem>>, vector<8x128xf32>,
    %c32 = arith.constant 32 : index
    %c0_66 = arith.constant 0 : index
    %226 = vector.load %arg9[%c32, %c0_66] : memref<64x512xf32, #tpu.memory_space<vmem>>, vector<8x512xf32>
    %227 = arith.truncf %198 : vector<8x128xf32> to vector<8x128xbf16>
    %c0_67 = arith.constant 0 : index
    %c0_68 = arith.constant 0 : index
    %228 = vector.load %arg2[%c0_67, %c0_68] : memref<128x512xbf16, #tpu.memory_space<vmem>>, vector<128x512xbf16>
    %cst_69 = arith.constant dense<0.000000e+00> : vector<8x512xf32>
    %229 = tpu.matmul %227, %228, %cst_69 {dimension_numbers = #tpu.dot_dimension_numbers<[1], [0], [0], [1], [0, 0, 1, 1], [], []>} : vector<8x128xbf16>, vector<128x512xbf16>, vector<8x512xf32> -> vector<8x512xf32>
    %230 = arith.addf %226, %229 : vector<8x512xf32>
    %231 = vector.extract_strided_slice %230 {offsets = [0, 0], sizes = [8, 256], strides = [1, 1]} : vector<8x512xf32> to vector<8x256xf32>
    %232 = arith.negf %231 : vector<8x256xf32>
    %233 = math.exp %232 : vector<8x256xf32>
    %cst_70 = arith.constant 1.000000e+00 : f32
    %234 = vector.broadcast %cst_70 : f32 to vector<8x256xf32>
    %235 = arith.addf %234, %233 : vector<8x256xf32>
    %236 = arith.divf %234, %235 : vector<8x256xf32>
    %237 = vector.extract_strided_slice %236 {offsets = [0, 0], sizes = [8, 128], strides = [1, 1]} : vector<8x256xf32> to vector<8x128xf32>
    %238 = vector.extract_strided_slice %236 {offsets = [0, 128], sizes = [8, 128], strides = [1, 1]} : vector<8x256xf32> to vector<8x128xf32>
    %239 = vector.extract_strided_slice %230 {offsets = [0, 256], sizes = [8, 128], strides = [1, 1]} : vector<8x512xf32> to vector<8x128xf32>
    %240 = math.tanh %239 : vector<8x128xf32>
    %241 = vector.extract_strided_slice %230 {offsets = [0, 384], sizes = [8, 128], strides = [1, 1]} : vector<8x512xf32> to vector<8x128xf32>
    %242 = arith.negf %241 : vector<8x128xf32>
    %243 = math.exp %242 : vector<8x128xf32>
    %cst_71 = arith.constant 1.000000e+00 : f32
    %244 = vector.broadcast %cst_71 : f32 to vector<8x128xf32>
    %245 = arith.addf %244, %243 : vector<8x128xf32>
    %246 = arith.divf %244, %245 : vector<8x128xf32>
    %247 = arith.mulf %238, %196 : vector<8x128xf32>
    %248 = arith.mulf %237, %240 : vector<8x128xf32>
    %249 = arith.addf %247, %248 : vector<8x128xf32>
    %250 = math.tanh %249 : vector<8x128xf32>
    %251 = arith.mulf %246, %250 : vector<8x128xf32>
    %252 = tpu.concatenate %251, %224 in 1 : vector<8x128xf32>, vector<8x128xf32> -> vector<8x256xf32>
    %253 = arith.truncf %252 : vector<8x256xf32> to vector<8x256xbf16>
    %c0_72 = arith.constant 0 : index
    %c0_73 = arith.constant 0 : index
    %254 = vector.load %arg4[%c0_72, %c0_73] : memref<256x512xbf16, #tpu.memory_space<vmem>>, vector<256x512xbf16>
    %cst_74 = arith.constant dense<0.000000e+00> : vector<8x512xf32>
    %255 = tpu.matmul %253, %254, %cst_74 {dimension_numbers = #tpu.dot_dimension_numbers<[1], [0], [0], [1], [0, 0, 1, 1], [], []>} : vector<8x256xbf16>, vector<256x512xbf16>, vector<8x512xf32> -> vector<8x512xf32>
    %256 = arith.addf %255, %9 : vector<8x512xf32>
    %257 = vector.extract_strided_slice %256 {offsets = [0, 0], sizes = [8, 256], strides = [1, 1]} : vector<8x512xf32> to vector<8x256xf32>
    %258 = arith.negf %257 : vector<8x256xf32>
    %259 = math.exp %258 : vector<8x256xf32>
    %cst_75 = arith.constant 1.000000e+00 : f32
    %260 = vector.broadcast %cst_75 : f32 to vector<8x256xf32>
    %261 = arith.addf %260, %259 : vector<8x256xf32>
    %262 = arith.divf %260, %261 : vector<8x256xf32>
    %263 = vector.extract_strided_slice %262 {offsets = [0, 0], sizes = [8, 128], strides = [1, 1]} : vector<8x256xf32> to vector<8x128xf32>
    %264 = vector.extract_strided_slice %262 {offsets = [0, 128], sizes = [8, 128], strides = [1, 1]} : vector<8x256xf32> to vector<8x128xf32>
    %265 = vector.extract_strided_slice %256 {offsets = [0, 256], sizes = [8, 128], strides = [1, 1]} : vector<8x512xf32> to vector<8x128xf32>
    %266 = math.tanh %265 : vector<8x128xf32>
    %267 = vector.extract_strided_slice %256 {offsets = [0, 384], sizes = [8, 128], strides = [1, 1]} : vector<8x512xf32> to vector<8x128xf32>
    %268 = arith.negf %267 : vector<8x128xf32>
    %269 = math.exp %268 : vector<8x128xf32>
    %cst_76 = arith.constant 1.000000e+00 : f32
    %270 = vector.broadcast %cst_76 : f32 to vector<8x128xf32>
    %271 = arith.addf %270, %269 : vector<8x128xf32>
    %272 = arith.divf %270, %271 : vector<8x128xf32>
    %273 = arith.mulf %264, %222 : vector<8x128xf32>
    %274 = arith.mulf %263, %266 : vector<8x128xf32>
    %275 = arith.addf %273, %274 : vector<8x128xf32>
    %276 = math.tanh %275 : vector<8x128xf32>
    %277 = arith.mulf %272, %276 : vector<8x128xf32>
    %c32_77 = arith.constant 32 : index
    %c0_78 = arith.constant 0 : index
    %278 = vector.load %arg10[%c32_77, %c0_78] : memref<64x128xf32, #tpu.memory_space<vmem>>, vector<8x128xf32>
    tpu.vector_store %arg10[%c32_77, %c0_78], %277 {strides = array<i32>} : memref<64x128xf32, #tpu.memory_space<vmem>>, vector<8x128xf32>,
    %c40 = arith.constant 40 : index
    %c0_79 = arith.constant 0 : index
    %279 = vector.load %arg9[%c40, %c0_79] : memref<64x512xf32, #tpu.memory_space<vmem>>, vector<8x512xf32>
    %280 = arith.truncf %251 : vector<8x128xf32> to vector<8x128xbf16>
    %c0_80 = arith.constant 0 : index
    %c0_81 = arith.constant 0 : index
    %281 = vector.load %arg2[%c0_80, %c0_81] : memref<128x512xbf16, #tpu.memory_space<vmem>>, vector<128x512xbf16>
    %cst_82 = arith.constant dense<0.000000e+00> : vector<8x512xf32>
    %282 = tpu.matmul %280, %281, %cst_82 {dimension_numbers = #tpu.dot_dimension_numbers<[1], [0], [0], [1], [0, 0, 1, 1], [], []>} : vector<8x128xbf16>, vector<128x512xbf16>, vector<8x512xf32> -> vector<8x512xf32>
    %283 = arith.addf %279, %282 : vector<8x512xf32>
    %284 = vector.extract_strided_slice %283 {offsets = [0, 0], sizes = [8, 256], strides = [1, 1]} : vector<8x512xf32> to vector<8x256xf32>
    %285 = arith.negf %284 : vector<8x256xf32>
    %286 = math.exp %285 : vector<8x256xf32>
    %cst_83 = arith.constant 1.000000e+00 : f32
    %287 = vector.broadcast %cst_83 : f32 to vector<8x256xf32>
    %288 = arith.addf %287, %286 : vector<8x256xf32>
    %289 = arith.divf %287, %288 : vector<8x256xf32>
    %290 = vector.extract_strided_slice %289 {offsets = [0, 0], sizes = [8, 128], strides = [1, 1]} : vector<8x256xf32> to vector<8x128xf32>
    %291 = vector.extract_strided_slice %289 {offsets = [0, 128], sizes = [8, 128], strides = [1, 1]} : vector<8x256xf32> to vector<8x128xf32>
    %292 = vector.extract_strided_slice %283 {offsets = [0, 256], sizes = [8, 128], strides = [1, 1]} : vector<8x512xf32> to vector<8x128xf32>
    %293 = math.tanh %292 : vector<8x128xf32>
    %294 = vector.extract_strided_slice %283 {offsets = [0, 384], sizes = [8, 128], strides = [1, 1]} : vector<8x512xf32> to vector<8x128xf32>
    %295 = arith.negf %294 : vector<8x128xf32>
    %296 = math.exp %295 : vector<8x128xf32>
    %cst_84 = arith.constant 1.000000e+00 : f32
    %297 = vector.broadcast %cst_84 : f32 to vector<8x128xf32>
    %298 = arith.addf %297, %296 : vector<8x128xf32>
    %299 = arith.divf %297, %298 : vector<8x128xf32>
    %300 = arith.mulf %291, %249 : vector<8x128xf32>
    %301 = arith.mulf %290, %293 : vector<8x128xf32>
    %302 = arith.addf %300, %301 : vector<8x128xf32>
    %303 = math.tanh %302 : vector<8x128xf32>
    %304 = arith.mulf %299, %303 : vector<8x128xf32>
    %305 = tpu.concatenate %304, %277 in 1 : vector<8x128xf32>, vector<8x128xf32> -> vector<8x256xf32>
    %306 = arith.truncf %305 : vector<8x256xf32> to vector<8x256xbf16>
    %c0_85 = arith.constant 0 : index
    %c0_86 = arith.constant 0 : index
    %307 = vector.load %arg4[%c0_85, %c0_86] : memref<256x512xbf16, #tpu.memory_space<vmem>>, vector<256x512xbf16>
    %cst_87 = arith.constant dense<0.000000e+00> : vector<8x512xf32>
    %308 = tpu.matmul %306, %307, %cst_87 {dimension_numbers = #tpu.dot_dimension_numbers<[1], [0], [0], [1], [0, 0, 1, 1], [], []>} : vector<8x256xbf16>, vector<256x512xbf16>, vector<8x512xf32> -> vector<8x512xf32>
    %309 = arith.addf %308, %9 : vector<8x512xf32>
    %310 = vector.extract_strided_slice %309 {offsets = [0, 0], sizes = [8, 256], strides = [1, 1]} : vector<8x512xf32> to vector<8x256xf32>
    %311 = arith.negf %310 : vector<8x256xf32>
    %312 = math.exp %311 : vector<8x256xf32>
    %cst_88 = arith.constant 1.000000e+00 : f32
    %313 = vector.broadcast %cst_88 : f32 to vector<8x256xf32>
    %314 = arith.addf %313, %312 : vector<8x256xf32>
    %315 = arith.divf %313, %314 : vector<8x256xf32>
    %316 = vector.extract_strided_slice %315 {offsets = [0, 0], sizes = [8, 128], strides = [1, 1]} : vector<8x256xf32> to vector<8x128xf32>
    %317 = vector.extract_strided_slice %315 {offsets = [0, 128], sizes = [8, 128], strides = [1, 1]} : vector<8x256xf32> to vector<8x128xf32>
    %318 = vector.extract_strided_slice %309 {offsets = [0, 256], sizes = [8, 128], strides = [1, 1]} : vector<8x512xf32> to vector<8x128xf32>
    %319 = math.tanh %318 : vector<8x128xf32>
    %320 = vector.extract_strided_slice %309 {offsets = [0, 384], sizes = [8, 128], strides = [1, 1]} : vector<8x512xf32> to vector<8x128xf32>
    %321 = arith.negf %320 : vector<8x128xf32>
    %322 = math.exp %321 : vector<8x128xf32>
    %cst_89 = arith.constant 1.000000e+00 : f32
    %323 = vector.broadcast %cst_89 : f32 to vector<8x128xf32>
    %324 = arith.addf %323, %322 : vector<8x128xf32>
    %325 = arith.divf %323, %324 : vector<8x128xf32>
    %326 = arith.mulf %317, %275 : vector<8x128xf32>
    %327 = arith.mulf %316, %319 : vector<8x128xf32>
    %328 = arith.addf %326, %327 : vector<8x128xf32>
    %329 = math.tanh %328 : vector<8x128xf32>
    %330 = arith.mulf %325, %329 : vector<8x128xf32>
    %c40_90 = arith.constant 40 : index
    %c0_91 = arith.constant 0 : index
    %331 = vector.load %arg10[%c40_90, %c0_91] : memref<64x128xf32, #tpu.memory_space<vmem>>, vector<8x128xf32>
    tpu.vector_store %arg10[%c40_90, %c0_91], %330 {strides = array<i32>} : memref<64x128xf32, #tpu.memory_space<vmem>>, vector<8x128xf32>,
    %c48 = arith.constant 48 : index
    %c0_92 = arith.constant 0 : index
    %332 = vector.load %arg9[%c48, %c0_92] : memref<64x512xf32, #tpu.memory_space<vmem>>, vector<8x512xf32>
    %333 = arith.truncf %304 : vector<8x128xf32> to vector<8x128xbf16>
    %c0_93 = arith.constant 0 : index
    %c0_94 = arith.constant 0 : index
    %334 = vector.load %arg2[%c0_93, %c0_94] : memref<128x512xbf16, #tpu.memory_space<vmem>>, vector<128x512xbf16>
    %cst_95 = arith.constant dense<0.000000e+00> : vector<8x512xf32>
    %335 = tpu.matmul %333, %334, %cst_95 {dimension_numbers = #tpu.dot_dimension_numbers<[1], [0], [0], [1], [0, 0, 1, 1], [], []>} : vector<8x128xbf16>, vector<128x512xbf16>, vector<8x512xf32> -> vector<8x512xf32>
    %336 = arith.addf %332, %335 : vector<8x512xf32>
    %337 = vector.extract_strided_slice %336 {offsets = [0, 0], sizes = [8, 256], strides = [1, 1]} : vector<8x512xf32> to vector<8x256xf32>
    %338 = arith.negf %337 : vector<8x256xf32>
    %339 = math.exp %338 : vector<8x256xf32>
    %cst_96 = arith.constant 1.000000e+00 : f32
    %340 = vector.broadcast %cst_96 : f32 to vector<8x256xf32>
    %341 = arith.addf %340, %339 : vector<8x256xf32>
    %342 = arith.divf %340, %341 : vector<8x256xf32>
    %343 = vector.extract_strided_slice %342 {offsets = [0, 0], sizes = [8, 128], strides = [1, 1]} : vector<8x256xf32> to vector<8x128xf32>
    %344 = vector.extract_strided_slice %342 {offsets = [0, 128], sizes = [8, 128], strides = [1, 1]} : vector<8x256xf32> to vector<8x128xf32>
    %345 = vector.extract_strided_slice %336 {offsets = [0, 256], sizes = [8, 128], strides = [1, 1]} : vector<8x512xf32> to vector<8x128xf32>
    %346 = math.tanh %345 : vector<8x128xf32>
    %347 = vector.extract_strided_slice %336 {offsets = [0, 384], sizes = [8, 128], strides = [1, 1]} : vector<8x512xf32> to vector<8x128xf32>
    %348 = arith.negf %347 : vector<8x128xf32>
    %349 = math.exp %348 : vector<8x128xf32>
    %cst_97 = arith.constant 1.000000e+00 : f32
    %350 = vector.broadcast %cst_97 : f32 to vector<8x128xf32>
    %351 = arith.addf %350, %349 : vector<8x128xf32>
    %352 = arith.divf %350, %351 : vector<8x128xf32>
    %353 = arith.mulf %344, %302 : vector<8x128xf32>
    %354 = arith.mulf %343, %346 : vector<8x128xf32>
    %355 = arith.addf %353, %354 : vector<8x128xf32>
    %356 = math.tanh %355 : vector<8x128xf32>
    %357 = arith.mulf %352, %356 : vector<8x128xf32>
    %358 = tpu.concatenate %357, %330 in 1 : vector<8x128xf32>, vector<8x128xf32> -> vector<8x256xf32>
    %359 = arith.truncf %358 : vector<8x256xf32> to vector<8x256xbf16>
    %c0_98 = arith.constant 0 : index
    %c0_99 = arith.constant 0 : index
    %360 = vector.load %arg4[%c0_98, %c0_99] : memref<256x512xbf16, #tpu.memory_space<vmem>>, vector<256x512xbf16>
    %cst_100 = arith.constant dense<0.000000e+00> : vector<8x512xf32>
    %361 = tpu.matmul %359, %360, %cst_100 {dimension_numbers = #tpu.dot_dimension_numbers<[1], [0], [0], [1], [0, 0, 1, 1], [], []>} : vector<8x256xbf16>, vector<256x512xbf16>, vector<8x512xf32> -> vector<8x512xf32>
    %362 = arith.addf %361, %9 : vector<8x512xf32>
    %363 = vector.extract_strided_slice %362 {offsets = [0, 0], sizes = [8, 256], strides = [1, 1]} : vector<8x512xf32> to vector<8x256xf32>
    %364 = arith.negf %363 : vector<8x256xf32>
    %365 = math.exp %364 : vector<8x256xf32>
    %cst_101 = arith.constant 1.000000e+00 : f32
    %366 = vector.broadcast %cst_101 : f32 to vector<8x256xf32>
    %367 = arith.addf %366, %365 : vector<8x256xf32>
    %368 = arith.divf %366, %367 : vector<8x256xf32>
    %369 = vector.extract_strided_slice %368 {offsets = [0, 0], sizes = [8, 128], strides = [1, 1]} : vector<8x256xf32> to vector<8x128xf32>
    %370 = vector.extract_strided_slice %368 {offsets = [0, 128], sizes = [8, 128], strides = [1, 1]} : vector<8x256xf32> to vector<8x128xf32>
    %371 = vector.extract_strided_slice %362 {offsets = [0, 256], sizes = [8, 128], strides = [1, 1]} : vector<8x512xf32> to vector<8x128xf32>
    %372 = math.tanh %371 : vector<8x128xf32>
    %373 = vector.extract_strided_slice %362 {offsets = [0, 384], sizes = [8, 128], strides = [1, 1]} : vector<8x512xf32> to vector<8x128xf32>
    %374 = arith.negf %373 : vector<8x128xf32>
    %375 = math.exp %374 : vector<8x128xf32>
    %cst_102 = arith.constant 1.000000e+00 : f32
    %376 = vector.broadcast %cst_102 : f32 to vector<8x128xf32>
    %377 = arith.addf %376, %375 : vector<8x128xf32>
    %378 = arith.divf %376, %377 : vector<8x128xf32>
    %379 = arith.mulf %370, %328 : vector<8x128xf32>
    %380 = arith.mulf %369, %372 : vector<8x128xf32>
    %381 = arith.addf %379, %380 : vector<8x128xf32>
    %382 = math.tanh %381 : vector<8x128xf32>
    %383 = arith.mulf %378, %382 : vector<8x128xf32>
    %c48_103 = arith.constant 48 : index
    %c0_104 = arith.constant 0 : index
    %384 = vector.load %arg10[%c48_103, %c0_104] : memref<64x128xf32, #tpu.memory_space<vmem>>, vector<8x128xf32>
    tpu.vector_store %arg10[%c48_103, %c0_104], %383 {strides = array<i32>} : memref<64x128xf32, #tpu.memory_space<vmem>>, vector<8x128xf32>,
    %c56 = arith.constant 56 : index
    %c0_105 = arith.constant 0 : index
    %385 = vector.load %arg9[%c56, %c0_105] : memref<64x512xf32, #tpu.memory_space<vmem>>, vector<8x512xf32>
    %386 = arith.truncf %357 : vector<8x128xf32> to vector<8x128xbf16>
    %c0_106 = arith.constant 0 : index
    %c0_107 = arith.constant 0 : index
    %387 = vector.load %arg2[%c0_106, %c0_107] : memref<128x512xbf16, #tpu.memory_space<vmem>>, vector<128x512xbf16>
    %cst_108 = arith.constant dense<0.000000e+00> : vector<8x512xf32>
    %388 = tpu.matmul %386, %387, %cst_108 {dimension_numbers = #tpu.dot_dimension_numbers<[1], [0], [0], [1], [0, 0, 1, 1], [], []>} : vector<8x128xbf16>, vector<128x512xbf16>, vector<8x512xf32> -> vector<8x512xf32>
    %389 = arith.addf %385, %388 : vector<8x512xf32>
    %390 = vector.extract_strided_slice %389 {offsets = [0, 0], sizes = [8, 256], strides = [1, 1]} : vector<8x512xf32> to vector<8x256xf32>
    %391 = arith.negf %390 : vector<8x256xf32>
    %392 = math.exp %391 : vector<8x256xf32>
    %cst_109 = arith.constant 1.000000e+00 : f32
    %393 = vector.broadcast %cst_109 : f32 to vector<8x256xf32>
    %394 = arith.addf %393, %392 : vector<8x256xf32>
    %395 = arith.divf %393, %394 : vector<8x256xf32>
    %396 = vector.extract_strided_slice %395 {offsets = [0, 0], sizes = [8, 128], strides = [1, 1]} : vector<8x256xf32> to vector<8x128xf32>
    %397 = vector.extract_strided_slice %395 {offsets = [0, 128], sizes = [8, 128], strides = [1, 1]} : vector<8x256xf32> to vector<8x128xf32>
    %398 = vector.extract_strided_slice %389 {offsets = [0, 256], sizes = [8, 128], strides = [1, 1]} : vector<8x512xf32> to vector<8x128xf32>
    %399 = math.tanh %398 : vector<8x128xf32>
    %400 = vector.extract_strided_slice %389 {offsets = [0, 384], sizes = [8, 128], strides = [1, 1]} : vector<8x512xf32> to vector<8x128xf32>
    %401 = arith.negf %400 : vector<8x128xf32>
    %402 = math.exp %401 : vector<8x128xf32>
    %cst_110 = arith.constant 1.000000e+00 : f32
    %403 = vector.broadcast %cst_110 : f32 to vector<8x128xf32>
    %404 = arith.addf %403, %402 : vector<8x128xf32>
    %405 = arith.divf %403, %404 : vector<8x128xf32>
    %406 = arith.mulf %397, %355 : vector<8x128xf32>
    %407 = arith.mulf %396, %399 : vector<8x128xf32>
    %408 = arith.addf %406, %407 : vector<8x128xf32>
    %409 = math.tanh %408 : vector<8x128xf32>
    %410 = arith.mulf %405, %409 : vector<8x128xf32>
    %411 = tpu.concatenate %410, %383 in 1 : vector<8x128xf32>, vector<8x128xf32> -> vector<8x256xf32>
    %412 = arith.truncf %411 : vector<8x256xf32> to vector<8x256xbf16>
    %c0_111 = arith.constant 0 : index
    %c0_112 = arith.constant 0 : index
    %413 = vector.load %arg4[%c0_111, %c0_112] : memref<256x512xbf16, #tpu.memory_space<vmem>>, vector<256x512xbf16>
    %cst_113 = arith.constant dense<0.000000e+00> : vector<8x512xf32>
    %414 = tpu.matmul %412, %413, %cst_113 {dimension_numbers = #tpu.dot_dimension_numbers<[1], [0], [0], [1], [0, 0, 1, 1], [], []>} : vector<8x256xbf16>, vector<256x512xbf16>, vector<8x512xf32> -> vector<8x512xf32>
    %415 = arith.addf %414, %9 : vector<8x512xf32>
    %416 = vector.extract_strided_slice %415 {offsets = [0, 0], sizes = [8, 256], strides = [1, 1]} : vector<8x512xf32> to vector<8x256xf32>
    %417 = arith.negf %416 : vector<8x256xf32>
    %418 = math.exp %417 : vector<8x256xf32>
    %cst_114 = arith.constant 1.000000e+00 : f32
    %419 = vector.broadcast %cst_114 : f32 to vector<8x256xf32>
    %420 = arith.addf %419, %418 : vector<8x256xf32>
    %421 = arith.divf %419, %420 : vector<8x256xf32>
    %422 = vector.extract_strided_slice %421 {offsets = [0, 0], sizes = [8, 128], strides = [1, 1]} : vector<8x256xf32> to vector<8x128xf32>
    %423 = vector.extract_strided_slice %421 {offsets = [0, 128], sizes = [8, 128], strides = [1, 1]} : vector<8x256xf32> to vector<8x128xf32>
    %424 = vector.extract_strided_slice %415 {offsets = [0, 256], sizes = [8, 128], strides = [1, 1]} : vector<8x512xf32> to vector<8x128xf32>
    %425 = math.tanh %424 : vector<8x128xf32>
    %426 = vector.extract_strided_slice %415 {offsets = [0, 384], sizes = [8, 128], strides = [1, 1]} : vector<8x512xf32> to vector<8x128xf32>
    %427 = arith.negf %426 : vector<8x128xf32>
    %428 = math.exp %427 : vector<8x128xf32>
    %cst_115 = arith.constant 1.000000e+00 : f32
    %429 = vector.broadcast %cst_115 : f32 to vector<8x128xf32>
    %430 = arith.addf %429, %428 : vector<8x128xf32>
    %431 = arith.divf %429, %430 : vector<8x128xf32>
    %432 = arith.mulf %423, %381 : vector<8x128xf32>
    %433 = arith.mulf %422, %425 : vector<8x128xf32>
    %434 = arith.addf %432, %433 : vector<8x128xf32>
    %435 = math.tanh %434 : vector<8x128xf32>
    %436 = arith.mulf %431, %435 : vector<8x128xf32>
    %c56_116 = arith.constant 56 : index
    %c0_117 = arith.constant 0 : index
    %437 = vector.load %arg10[%c56_116, %c0_117] : memref<64x128xf32, #tpu.memory_space<vmem>>, vector<8x128xf32>
    tpu.vector_store %arg10[%c56_116, %c0_117], %436 {strides = array<i32>} : memref<64x128xf32, #tpu.memory_space<vmem>>, vector<8x128xf32>,
    %c0_118 = arith.constant 0 : index
    %c0_119 = arith.constant 0 : index
    %438 = vector.load %arg10[%c0_118, %c0_119] : memref<64x128xf32, #tpu.memory_space<vmem>>, vector<64x128xf32>
    %439 = arith.truncf %438 : vector<64x128xf32> to vector<64x128xbf16>
    %c0_120 = arith.constant 0 : index
    %c0_121 = arith.constant 0 : index
    %440 = vector.load %arg6[%c0_120, %c0_121] : memref<128x4xbf16, #tpu.memory_space<vmem>>, vector<128x4xbf16>
    %cst_122 = arith.constant dense<0.000000e+00> : vector<64x4xf32>
    %441 = tpu.matmul %439, %440, %cst_122 {dimension_numbers = #tpu.dot_dimension_numbers<[1], [0], [0], [1], [0, 0, 1, 1], [], []>} : vector<64x128xbf16>, vector<128x4xbf16>, vector<64x4xf32> -> vector<64x4xf32>
    %c0_123 = arith.constant 0 : index
    %c0_124 = arith.constant 0 : index
    %442 = vector.load %arg7[%c0_123, %c0_124] : memref<1x4xf32, #tpu.memory_space<vmem>>, vector<1x4xf32>
    %443 = vector.broadcast %442 : vector<1x4xf32> to vector<64x4xf32>
    %444 = arith.addf %441, %443 : vector<64x4xf32>
    %c0_125 = arith.constant 0 : index
    %c0_126 = arith.constant 0 : index
    %445 = vector.load %arg8[%c0_125, %c0_126] : memref<64x4xf32, #tpu.memory_space<vmem>>, vector<64x4xf32>
    tpu.vector_store %arg8[%c0_125, %c0_126], %444 {strides = array<i32>} : memref<64x4xf32, #tpu.memory_space<vmem>>, vector<64x4xf32>,
    return
  }
}

</mosaic_0001>

<bundles_post_ra>
// kernel: tpu_custom_call.1
= control target key start
LH: loop header
LB: loop body
LE: loop exit
PB: predicated region body
PF: predicated region fallthrough
CT: control target
= control target key end

     0   :  { %13 = vsyncpa [#allocation5], 0  ;;  %s10675_s0 = inlined_call_operand.vmem [shape: bf16[64,36], index: 0, kind: input, shape index: {}]   ;;  %s10676_s1 = inlined_call_operand.vmem [shape: bf16[36,512], index: 1, kind: input, shape index: {}]   ;;  %s10677_s2 = inlined_call_operand.hbm [shape: bf16[128,512], index: 2, kind: input, shape index: {}]   ;;  %s10678_s3 = inlined_call_operand.vmem [shape: f32[1,512], index: 3, kind: input, shape index: {}]   ;;  %s10679_s4 = inlined_call_operand.hbm [shape: bf16[256,512], index: 4, kind: input, shape index: {}]   ;;  %s10680_s5 = inlined_call_operand.vmem [shape: f32[1,512], index: 5, kind: input, shape index: {}]   ;;  %s10681_s6 = inlined_call_operand.vmem [shape: bf16[128,4], index: 6, kind: input, shape index: {}]   ;;  %s10682_s7 = inlined_call_operand.vmem [shape: f32[1,4], index: 7, kind: input, shape index: {}]   ;;  %s10683_s8 = inlined_call_operand.vmem [shape: f32[64,4], index: 8, kind: output, shape index: {}]  }
   0x1   :  { %14 = vsyncpa [#allocation7], 0  ;;  %s8782_s27 = smov [#allocation4]   ;;  %s8734_s9 = scalar_lea.hbm %s10677_s2, 4096 }
   0x2   :  { %s24_s28 = sshll.u32 %s8782_s27, 4  ;;  %p8735_p0 = scmp.ne.s32.totalorder %s10677_s2, %s8734_s9  ;;  %s25_s28 = int_to_ptr.vmem [resolvable:$true] %s24_s28 }
   0x3   :  { %p8738_p1 = scmp.lt.u32.totalorder %s8734_s9, %s10677_s2 }
   0x5   :  { %p8740_p2 = pnand %p8738_p1, %p8735_p0 }
   0x7   :  { %8743 = shalt.err (!%p8740_p2)
}
   0x8   :  { %s8744_s14 = scalar_lea.vmem %s25_s28, 4096  ;;  %p8749_p4 = scmp.lt.s32.totalorder %s25_s28, %s25_s28 }
   0x9   :  { %p8745_p3 = scmp.ne.s32.totalorder %s25_s28, %s8744_s14  ;;  %p8750_p5 = scmp.lt.s32.totalorder %s8744_s14, %s8744_s14 }
   0xb   :  { %p8751_p6 = por %p8750_p5, %p8749_p4 }
   0xd   :  { %p8752_p7 = pnand %p8751_p6, %p8745_p3 }
   0xf   :  { %8755 = shalt.err (!%p8752_p7)
}
  0x10   :  { %s8783_s15 = smov 256   ;;  %s8784_s16 = smov 16  }
  0x11   :  { %30 = dma.hbm_to_vmem [thread:$0]  %s10677_s2, 4096, %s25_s28, [#allocation5], %s8783_s15, %s8783_s15, %s8784_s16  }
  0x12   :  { %s8785_s19 = smov [#allocation6]   ;;  %s8756_s23 = scalar_lea.hbm %s10679_s4, 8192 }
  0x13   :  { %s38_s20 = sshll.u32 %s8785_s19, 4  ;;  %p8757_p8 = scmp.ne.s32.totalorder %s10679_s4, %s8756_s23  ;;  %s39_s20 = int_to_ptr.vmem [resolvable:$true] %s38_s20 }
  0x14   :  { %p8760_p9 = scmp.lt.u32.totalorder %s8756_s23, %s10679_s4 }
  0x16   :  { %p8762_p10 = pnand %p8760_p9, %p8757_p8 }
  0x18   :  { %8765 = shalt.err (!%p8762_p10)
}
  0x19   :  { %s8766_s29 = scalar_lea.vmem %s39_s20, 8192  ;;  %p8771_p12 = scmp.lt.s32.totalorder %s39_s20, %s39_s20 }
  0x1a   :  { %p8767_p11 = scmp.ne.s32.totalorder %s39_s20, %s8766_s29  ;;  %p8772_p13 = scmp.lt.s32.totalorder %s8766_s29, %s8766_s29 }
  0x1c   :  { %p8773_p0 = por %p8772_p13, %p8771_p12 }
  0x1e   :  { %p8774_p1 = pnand %p8773_p0, %p8767_p11 }
  0x20   :  { %8777 = shalt.err (!%p8774_p1)
}
  0x21   :  { %44 = dma.hbm_to_vmem [thread:$0]  %s10679_s4, 8192, %s39_s20, [#allocation7], %s8783_s15, %s8783_s15, %s8784_s16  }
  0x22   :  { %8778 = dma.done.wait [#allocation5], 4096  }
  0x23   :  { %8779 = vsyncadd [#allocation5], 4294963200 }
  0x24   :  { %8780 = dma.done.wait [#allocation7], 8192  }
  0x25   :  { %8781 = vsyncadd [#allocation7], 4294959104  ;;  %v10684_v0 = vmov 0   ;;  %v7842_v1 = vld [vmem:[%s10676_s1 + $0x4] ss:$16 sps:$4 sm:$0xff]   ;;  %vm181_vm0 = vcmask 1041408  }
  0x26   :  { %226 = vmatprep.mubr.bf16.mxu1 %v10684_v0  ;;  %622 = vmatprep.mubr.bf16.mxu0 %v10684_v0  ;;  %v7844_v2 = vld [vmem:[#allocation4 + $0x4] ss:$16 sps:$4 sm:$0xff]   ;;  %v7846_v3 = vld [vmem:[%s10676_s1] ss:$16 sps:$4 sm:$0xff]   ;;  %v7862_v15 = vld [vmem:[%s10676_s1 + $0xc] ss:$16 sps:$4 sm:$0xff]  }
  0x27   :  { %194 = vmatprep.subr.bf16.mxu1 %v7842_v1  ;;  %v7847_v4 = vld [vmem:[#allocation4] ss:$16 sps:$4 sm:$0xff]   ;;  %590 = vmatprep.subr.bf16.mxu0 %v7844_v2  ;;  %v7848_v5 = vld [vmem:[%s10676_s1 + $0x24] ss:$16 sps:$4 sm:$0xff]   ;;  %vm168_vm1 = vcmask 293888   ;;  %v7869_v25 = vld [vmem:[%s10675_s0 + $0x8] sm:$0xff]  }
  0x28   :  { %195 = vmatpush1.bf16.msra.mxu1 %v7846_v3  ;;  %591 = vmatpush1.bf16.msra.mxu0 %v7847_v4  ;;  %v7850_v6 = vld [vmem:[#allocation4 + $0x24] ss:$16 sps:$4 sm:$0xff]   ;;  %v7852_v7 = vld [vmem:[%s10676_s1 + $0x20] ss:$16 sps:$4 sm:$0xff]   ;;  %v7860_v18 = vld [vmem:[%s10676_s1 + $0x8] ss:$16 sps:$4 sm:$0xff]  }
  0x29   :  { %196 = vmatprep.subr.bf16.mxu1 %v7848_v5  ;;  %v7853_v8 = vld [vmem:[#allocation4 + $0x20] ss:$16 sps:$4 sm:$0xff]   ;;  %592 = vmatprep.subr.bf16.mxu0 %v7850_v6  ;;  %v7855_v11 = vld [vmem:[#allocation4 + $0x44] ss:$16 sps:$4 sm:$0xff]   ;;  %v7875_v21 = vld [vmem:[%s10676_s1 + $0x2c] ss:$16 sps:$4 sm:$0xff]  }
  0x2a   :  { %v74_v9 = vld [vmem:[%s10676_s1 + $0x40] sm:$0x33]  ;;  %v7873_v23 = vld [vmem:[%s10676_s1 + $0x28] ss:$16 sps:$4 sm:$0xff]   ;;  %v7888_v32 = vld [vmem:[#allocation4 + $0xc] ss:$16 sps:$4 sm:$0xff]  }
  0x2b   :  { %v6962_v10 = vcombine.high %v74_v9, %v74_v9  ;;  %v6961_v12 = vcombine.low %v74_v9, %v74_v9  ;;  %v7858_v13 = vld [vmem:[#allocation4 + $0x40] ss:$16 sps:$4 sm:$0xff]   ;;  %v7863_v16 = vld [vmem:[#allocation4 + $0x64] ss:$16 sps:$4 sm:$0xff]   ;;  %v75_v26 = vld [vmem:[%s10676_s1 + $0x48] sm:$0x33] }
  0x2c   :  { %197 = vmatpush1.bf16.msra.mxu1 %v7852_v7  ;;  %593 = vmatpush1.bf16.msra.mxu0 %v7853_v8  ;;  %v7859_v17 = vld [vmem:[%s10675_s0] sm:$0xff]   ;;  %v6964_v28 = vcombine.high %v75_v26, %v75_v26  ;;  %v6963_v29 = vcombine.low %v75_v26, %v75_v26  ;;  %v7879_v35 = vld [vmem:[%s10675_s0 + $0x10] sm:$0xff]   ;;  %v7885_v37 = vld [vmem:[%s10675_s0 + $0x18] sm:$0xff]   ;;  %vm6934_vm2 = vcmask 31744  }
  0x2d   :  { %6965 = vmatprep.subr.msk.bf16.mxu1 %vm181_vm0, %v6962_v10  ;;  %594 = vmatprep.subr.bf16.mxu0 %v7855_v11  ;;  %v183_v14 = vsel %vm181_vm0, %v6961_v12, 0  ;;  %v7865_v19 = vld [vmem:[#allocation4 + $0x60] ss:$16 sps:$4 sm:$0xff]   ;;  %v7866_v20 = vld [vmem:[#allocation4 + $0x84] ss:$16 sps:$4 sm:$0xff]  }
  0x2e   :  { %v7868_v22 = vld [vmem:[#allocation4 + $0x80] ss:$16 sps:$4 sm:$0xff]   ;;  %v7870_v24 = vld [vmem:[#allocation4 + $0xa4] ss:$16 sps:$4 sm:$0xff]   ;;  %v189_v31 = vsel %vm181_vm0, %v6963_v29, 0 }
  0x2f   :  { %v7872_v27 = vld [vmem:[#allocation4 + $0xa0] ss:$16 sps:$4 sm:$0xff]   ;;  %v7876_v30 = vld [vmem:[#allocation4 + $0xc4] ss:$16 sps:$4 sm:$0xff]   ;;  %v7886_v38 = vld [vmem:[#allocation4 + $0x8] ss:$16 sps:$4 sm:$0xff]  }
  0x30   :  { %199 = vmatpush1.bf16.msra.mxu1 %v183_v14  ;;  %595 = vmatpush1.bf16.msra.mxu0 %v7858_v13  ;;  %v7878_v33 = vld [vmem:[#allocation4 + $0xc0] ss:$16 sps:$4 sm:$0xff]   ;;  %v7880_v34 = vld [vmem:[#allocation4 + $0xe4] ss:$16 sps:$4 sm:$0xff]   ;;  %v7891_v39 = vld [vmem:[#allocation4 + $0x2c] ss:$16 sps:$4 sm:$0xff]  }
  0x31   :  { %267 = vmatprep.subr.bf16.mxu1 %v7862_v15  ;;  %596 = vmatprep.subr.bf16.mxu0 %v7863_v16  ;;  %v7882_v36 = vld [vmem:[#allocation4 + $0xe0] ss:$16 sps:$4 sm:$0xff]   ;;  %v7889_v40 = vld [vmem:[#allocation4 + $0x28] ss:$16 sps:$4 sm:$0xff]   ;;  %v7894_v41 = vld [vmem:[#allocation4 + $0x4c] ss:$16 sps:$4 sm:$0xff]  }
  0x32   :  { %v7892_v42 = vld [vmem:[#allocation4 + $0x48] ss:$16 sps:$4 sm:$0xff]   ;;  %v7897_v43 = vld [vmem:[#allocation4 + $0x6c] ss:$16 sps:$4 sm:$0xff]   ;;  %v8923_v53 = vld [vmem:[#allocation6 + $0x4] ss:$16 sps:$4 sm:$0xff]  }
  0x33   :  { %6966 = vmatmul.mubr.msk.bf16.vlgmr.msra.gmra.mrb[0].mxu1 %vm168_vm1, %v7859_v17  ;;  %v7895_v44 = vld [vmem:[#allocation4 + $0x68] ss:$16 sps:$4 sm:$0xff]   ;;  %v7900_v45 = vld [vmem:[#allocation4 + $0x8c] ss:$16 sps:$4 sm:$0xff]   ;;  %v8927_v55 = vld [vmem:[#allocation6] ss:$16 sps:$4 sm:$0xff]  }
  0x34   :  { %268 = vmatpush1.bf16.msra.mxu1 %v7860_v18  ;;  %597 = vmatpush1.bf16.msra.mxu0 %v7865_v19  ;;  %v7898_v46 = vld [vmem:[#allocation4 + $0x88] ss:$16 sps:$4 sm:$0xff]   ;;  %v7903_v47 = vld [vmem:[#allocation4 + $0xac] ss:$16 sps:$4 sm:$0xff]   ;;  %v8935_v57 = vld [vmem:[#allocation6 + $0x24] ss:$16 sps:$4 sm:$0xff]  }
  0x35   :  { %598 = vmatprep.subr.bf16.mxu0 %v7866_v20  ;;  %236 = vmatprep.mubr.bf16.mxu1 %v10684_v0  ;;  %v7901_v48 = vld [vmem:[#allocation4 + $0xa8] ss:$16 sps:$4 sm:$0xff]   ;;  %v7906_v49 = vld [vmem:[#allocation4 + $0xcc] ss:$16 sps:$4 sm:$0xff]   ;;  %v8939_v59 = vld [vmem:[#allocation6 + $0x20] ss:$16 sps:$4 sm:$0xff]  }
  0x36   :  { %269 = vmatprep.subr.bf16.mxu1 %v7875_v21  ;;  %v7904_v50 = vld [vmem:[#allocation4 + $0xc8] ss:$16 sps:$4 sm:$0xff]   ;;  %v7909_v51 = vld [vmem:[#allocation4 + $0xec] ss:$16 sps:$4 sm:$0xff]   ;;  %v8947_v61 = vld [vmem:[#allocation6 + $0x44] ss:$16 sps:$4 sm:$0xff]  }
  0x37   :  { %v7907_v52 = vld [vmem:[#allocation4 + $0xe8] ss:$16 sps:$4 sm:$0xff]   ;;  %v8925_v54 = vld [vmem:[#allocation6 + $0xc] ss:$16 sps:$4 sm:$0xff]   ;;  %v8951_v63 = vld [vmem:[#allocation6 + $0x40] ss:$16 sps:$4 sm:$0xff]  }
  0x38   :  { %599 = vmatpush1.bf16.msra.mxu0 %v7868_v22  ;;  %270 = vmatpush1.bf16.msra.mxu1 %v7873_v23  ;;  %v8929_v56 = vld [vmem:[#allocation6 + $0x8] ss:$16 sps:$4 sm:$0xff]   ;;  %v8937_v58 = vld [vmem:[#allocation6 + $0x2c] ss:$16 sps:$4 sm:$0xff]   ;;  %v8959_v2 = vld [vmem:[#allocation6 + $0x64] ss:$16 sps:$4 sm:$0xff]  }
  0x39   :  { %600 = vmatprep.subr.bf16.mxu0 %v7870_v24  ;;  %6970 = vmatprep.subr.msk.bf16.mxu1 %vm181_vm0, %v6964_v28  ;;  %v8941_v60 = vld [vmem:[#allocation6 + $0x28] ss:$16 sps:$4 sm:$0xff]   ;;  %v8949_v62 = vld [vmem:[#allocation6 + $0x4c] ss:$16 sps:$4 sm:$0xff]   ;;  %v8963_v4 = vld [vmem:[#allocation6 + $0x60] ss:$16 sps:$4 sm:$0xff]  }
  0x3a   :  { %v8953_v1 = vld [vmem:[#allocation6 + $0x48] ss:$16 sps:$4 sm:$0xff]   ;;  %v8961_v3 = vld [vmem:[#allocation6 + $0x6c] ss:$16 sps:$4 sm:$0xff]   ;;  %v8971_v6 = vld [vmem:[#allocation6 + $0x84] ss:$16 sps:$4 sm:$0xff]  }
  0x3b   :  { %6967 = vmatmul.mubr.msk.bf16.gmra.mrb[4].mxu1 %vm168_vm1, %v7869_v25  ;;  %v8965_v5 = vld [vmem:[#allocation6 + $0x68] ss:$16 sps:$4 sm:$0xff]   ;;  %v8973_v7 = vld [vmem:[#allocation6 + $0x8c] ss:$16 sps:$4 sm:$0xff]   ;;  %v8975_v8 = vld [vmem:[#allocation6 + $0x80] ss:$16 sps:$4 sm:$0xff]  }
  0x3c   :  { %601 = vmatpush1.bf16.msra.mxu0 %v7872_v27  ;;  %246 = vmatprep.mubr.bf16.mxu1 %v10684_v0  ;;  %v8977_v9 = vld [vmem:[#allocation6 + $0x88] ss:$16 sps:$4 sm:$0xff]   ;;  %v8983_v10 = vld [vmem:[#allocation6 + $0xa4] ss:$16 sps:$4 sm:$0xff]   ;;  %v8985_v11 = vld [vmem:[#allocation6 + $0xac] ss:$16 sps:$4 sm:$0xff]  }
  0x3d   :  { %602 = vmatprep.subr.bf16.mxu0 %v7876_v30  ;;  %272 = vmatpush1.bf16.msra.mxu1 %v189_v31  ;;  %v8987_v12 = vld [vmem:[#allocation6 + $0xa0] ss:$16 sps:$4 sm:$0xff]   ;;  %v8989_v13 = vld [vmem:[#allocation6 + $0xa8] ss:$16 sps:$4 sm:$0xff]   ;;  %v8995_v14 = vld [vmem:[#allocation6 + $0xc4] ss:$16 sps:$4 sm:$0xff]  }
  0x3e   :  { %631 = vmatprep.subr.bf16.mxu1 %v7888_v32  ;;  %v8997_v15 = vld [vmem:[#allocation6 + $0xcc] ss:$16 sps:$4 sm:$0xff]   ;;  %v8999_v16 = vld [vmem:[#allocation6 + $0xc0] ss:$16 sps:$4 sm:$0xff]   ;;  %v9007_v18 = vld [vmem:[#allocation6 + $0xe4] ss:$16 sps:$4 sm:$0xff]  }
  0x3f   :  { %v9009_v19 = vld [vmem:[#allocation6 + $0xec] ss:$16 sps:$4 sm:$0xff]   ;;  %v9011_v20 = vld [vmem:[#allocation6 + $0xe0] ss:$16 sps:$4 sm:$0xff]   ;;  %v9013_v21 = vld [vmem:[#allocation6 + $0xe8] ss:$16 sps:$4 sm:$0xff]  }
  0x40   :  { %603 = vmatpush1.bf16.msra.mxu0 %v7878_v33  ;;  %v9019_v22 = vld [vmem:[#allocation6 + $0x104] ss:$16 sps:$4 sm:$0xff]   ;;  %v9021_v23 = vld [vmem:[#allocation6 + $0x10c] ss:$16 sps:$4 sm:$0xff]   ;;  %v9023_v24 = vld [vmem:[#allocation6 + $0x100] ss:$16 sps:$4 sm:$0xff]  }
  0x41   :  { %604 = vmatprep.subr.bf16.mxu0 %v7880_v34  ;;  %v9031_v26 = vld [vmem:[#allocation6 + $0x124] ss:$16 sps:$4 sm:$0xff]   ;;  %v9033_v27 = vld [vmem:[#allocation6 + $0x12c] ss:$16 sps:$4 sm:$0xff]   ;;  %v9035_v28 = vld [vmem:[#allocation6 + $0x120] ss:$16 sps:$4 sm:$0xff]  }
  0x42   :  { %v9037_v29 = vld [vmem:[#allocation6 + $0x128] ss:$16 sps:$4 sm:$0xff]   ;;  %v9043_v30 = vld [vmem:[#allocation6 + $0x144] ss:$16 sps:$4 sm:$0xff]   ;;  %v9045_v31 = vld [vmem:[#allocation6 + $0x14c] ss:$16 sps:$4 sm:$0xff]  }
  0x43   :  { %6968 = vmatmul.mubr.msk.bf16.gmra.mrb[8].mxu1 %vm168_vm1, %v7879_v35  ;;  %10896 = vst [vmem:[#allocation10_spill] sm:$0xff] %v9045_v31  ;;  %v9047_v32 = vld [vmem:[#allocation6 + $0x140] ss:$16 sps:$4 sm:$0xff]   ;;  %v9049_v33 = vld [vmem:[#allocation6 + $0x148] ss:$16 sps:$4 sm:$0xff]  }
  0x44   :  { %605 = vmatpush1.bf16.msra.mxu0 %v7882_v36  ;;  %256 = vmatprep.mubr.bf16.mxu1 %v10684_v0  ;;  %10897 = vst [vmem:[#allocation11_spill] sm:$0xff] %v9047_v32  ;;  %10898 = vst [vmem:[#allocation12_spill] sm:$0xff] %v9049_v33  ;;  %v9055_v34 = vld [vmem:[#allocation6 + $0x164] ss:$16 sps:$4 sm:$0xff]   ;;  %v9059_v36 = vld [vmem:[#allocation6 + $0x160] ss:$16 sps:$4 sm:$0xff]  }
  0x45   :  { %1086 = vmatprep.subr.bf16.mxu0 %v8923_v53  ;;  %10899 = vst [vmem:[#allocation13_spill] sm:$0xff] %v9055_v34  ;;  %10901 = vst [vmem:[#allocation15_spill] sm:$0xff] %v9059_v36 }
  0x47   :  { %623 = vmatmul.mubr.bf16.vlgmr.msra.gmra.mrb[0].mxu0 %v10684_v0 }
  0x48   :  { %1087 = vmatpush1.bf16.msra.mxu0 %v8927_v55 }
  0x49   :  { %1088 = vmatprep.subr.bf16.mxu0 %v8935_v57 }
  0x4b   :  { %6969 = vmatmul.mubr.msk.bf16.gmra.mrb[12].mxu1 %vm168_vm1, %v7885_v37 }
  0x4c   :  { %299 = vmatprep.mubr.bf16.mxu1 %v10684_v0  ;;  %1089 = vmatpush1.bf16.msra.mxu0 %v8939_v59 }
  0x4d   :  { %1090 = vmatprep.subr.bf16.mxu0 %v8947_v61 }
  0x50   :  { %1091 = vmatpush1.bf16.msra.mxu0 %v8951_v63 }
  0x51   :  { %1092 = vmatprep.subr.bf16.mxu0 %v8959_v2 }
  0x53   :  { %6971 = vmatmul.mubr.msk.bf16.vlgmr.msra.gmra.mrb[16].mxu1 %vm168_vm1, %v7859_v17  ;;  %v9001_v17 = vld [vmem:[#allocation6 + $0xc8] ss:$16 sps:$4 sm:$0xff]  }
  0x54   :  { %632 = vmatpush1.bf16.msra.mxu1 %v7886_v38  ;;  %309 = vmatprep.mubr.bf16.mxu1 %v10684_v0  ;;  %v9067_v38 = vld [vmem:[#allocation6 + $0x184] ss:$16 sps:$4 sm:$0xff]  }
  0x55   :  { %633 = vmatprep.subr.bf16.mxu1 %v7891_v39  ;;  %1093 = vmatpush1.bf16.msra.mxu0 %v8963_v4  ;;  %10903 = vst [vmem:[#allocation17_spill] sm:$0xff] %v9067_v38  ;;  %v9069_v39 = vld [vmem:[#allocation6 + $0x18c] ss:$16 sps:$4 sm:$0xff]  }
  0x56   :  { %1094 = vmatprep.subr.bf16.mxu0 %v8971_v6  ;;  %10904 = vst [vmem:[#allocation18_spill] sm:$0xff] %v9069_v39 }
  0x58   :  { %634 = vmatpush1.bf16.msra.mxu1 %v7889_v40  ;;  %v9071_v40 = vld [vmem:[#allocation6 + $0x180] ss:$16 sps:$4 sm:$0xff]  }
  0x59   :  { %635 = vmatprep.subr.bf16.mxu1 %v7894_v41  ;;  %1095 = vmatpush1.bf16.msra.mxu0 %v8975_v8  ;;  %10905 = vst [vmem:[#allocation19_spill] sm:$0xff] %v9071_v40  ;;  %v9073_v41 = vld [vmem:[#allocation6 + $0x188] ss:$16 sps:$4 sm:$0xff]  }
  0x5a   :  { %1096 = vmatprep.subr.bf16.mxu0 %v8983_v10  ;;  %10906 = vst [vmem:[#allocation20_spill] sm:$0xff] %v9073_v41 }
  0x5b   :  { %6972 = vmatmul.mubr.msk.bf16.gmra.mrb[20].mxu1 %vm168_vm1, %v7869_v25  ;;  %v9025_v25 = vld [vmem:[#allocation6 + $0x108] ss:$16 sps:$4 sm:$0xff]  }
  0x5c   :  { %636 = vmatpush1.bf16.msra.mxu1 %v7892_v42  ;;  %319 = vmatprep.mubr.bf16.mxu1 %v10684_v0  ;;  %v9079_v42 = vld [vmem:[#allocation6 + $0x1a0] ss:$16 sps:$4 sm:$0xff]  }
  0x5d   :  { %637 = vmatprep.subr.bf16.mxu1 %v7897_v43  ;;  %1097 = vmatpush1.bf16.msra.mxu0 %v8987_v12  ;;  %10907 = vst [vmem:[#allocation21_spill] sm:$0xff] %v9079_v42  ;;  %v9081_v43 = vld [vmem:[#allocation6 + $0x1a4] ss:$16 sps:$4 sm:$0xff]  }
  0x5e   :  { %1098 = vmatprep.subr.bf16.mxu0 %v8995_v14  ;;  %10908 = vst [vmem:[#allocation22_spill] sm:$0xff] %v9081_v43 }
  0x60   :  { %638 = vmatpush1.bf16.msra.mxu1 %v7895_v44  ;;  %v9083_v44 = vld [vmem:[#allocation6 + $0x1a8] ss:$16 sps:$4 sm:$0xff]  }
  0x61   :  { %639 = vmatprep.subr.bf16.mxu1 %v7900_v45  ;;  %1099 = vmatpush1.bf16.msra.mxu0 %v8999_v16  ;;  %10909 = vst [vmem:[#allocation23_spill] sm:$0xff] %v9083_v44  ;;  %v9085_v45 = vld [vmem:[#allocation6 + $0x1ac] ss:$16 sps:$4 sm:$0xff]  }
  0x62   :  { %1100 = vmatprep.subr.bf16.mxu0 %v9007_v18  ;;  %10910 = vst [vmem:[#allocation24_spill] sm:$0xff] %v9085_v45 }
  0x63   :  { %6973 = vmatmul.mubr.msk.bf16.gmra.mrb[24].mxu1 %vm168_vm1, %v7879_v35  ;;  %v9057_v35 = vld [vmem:[#allocation6 + $0x16c] ss:$16 sps:$4 sm:$0xff]  }
  0x64   :  { %640 = vmatpush1.bf16.msra.mxu1 %v7898_v46  ;;  %329 = vmatprep.mubr.bf16.mxu1 %v10684_v0  ;;  %10900 = vst [vmem:[#allocation14_spill] sm:$0xff] %v9057_v35  ;;  %v9087_v46 = vld [vmem:[#allocation6 + $0x1c4] ss:$16 sps:$4 sm:$0xff]  }
  0x65   :  { %641 = vmatprep.subr.bf16.mxu1 %v7903_v47  ;;  %1101 = vmatpush1.bf16.msra.mxu0 %v9011_v20  ;;  %10911 = vst [vmem:[#allocation25_spill] sm:$0xff] %v9087_v46  ;;  %v9090_v47 = vld [vmem:[#allocation6 + $0x1cc] ss:$16 sps:$4 sm:$0xff]  }
  0x66   :  { %1102 = vmatprep.subr.bf16.mxu0 %v9019_v22  ;;  %10912 = vst [vmem:[#allocation26_spill] sm:$0xff] %v9090_v47 }
  0x68   :  { %642 = vmatpush1.bf16.msra.mxu1 %v7901_v48  ;;  %v9094_v48 = vld [vmem:[#allocation6 + $0x1c0] ss:$16 sps:$4 sm:$0xff]  }
  0x69   :  { %643 = vmatprep.subr.bf16.mxu1 %v7906_v49  ;;  %1103 = vmatpush1.bf16.msra.mxu0 %v9023_v24  ;;  %10913 = vst [vmem:[#allocation27_spill] sm:$0xff] %v9094_v48  ;;  %v9098_v49 = vld [vmem:[#allocation6 + $0x1c8] ss:$16 sps:$4 sm:$0xff]  }
  0x6a   :  { %1104 = vmatprep.subr.bf16.mxu0 %v9031_v26  ;;  %10914 = vst [vmem:[#allocation28_spill] sm:$0xff] %v9098_v49 }
  0x6b   :  { %6974 = vmatmul.mubr.msk.bf16.gmra.mrb[28].mxu1 %vm168_vm1, %v7885_v37  ;;  %v9061_v37 = vld [vmem:[#allocation6 + $0x168] ss:$16 sps:$4 sm:$0xff]  }
  0x6c   :  { %644 = vmatpush1.bf16.msra.mxu1 %v7904_v50  ;;  %663 = vmatprep.mubr.bf16.mxu1 %v10684_v0  ;;  %10902 = vst [vmem:[#allocation16_spill] sm:$0xff] %v9061_v37  ;;  %v9100_v50 = vld [vmem:[#allocation6 + $0x1e4] ss:$16 sps:$4 sm:$0xff]  }
  0x6d   :  { %645 = vmatprep.subr.bf16.mxu1 %v7909_v51  ;;  %1105 = vmatpush1.bf16.msra.mxu0 %v9035_v28  ;;  %10915 = vst [vmem:[#allocation29_spill] sm:$0xff] %v9100_v50  ;;  %v9103_v51 = vld [vmem:[#allocation6 + $0x1ec] ss:$16 sps:$4 sm:$0xff]  }
  0x6e   :  { %1106 = vmatprep.subr.bf16.mxu0 %v9043_v30  ;;  %10916 = vst [vmem:[#allocation30_spill] sm:$0xff] %v9103_v51 }
  0x70   :  { %646 = vmatpush1.bf16.msra.mxu1 %v7907_v52  ;;  %v8787_v52 = vmov 0.0|0.0  }
  0x71   :  { %1127 = vmatprep.subr.bf16.mxu1 %v8925_v54  ;;  %1107 = vmatpush1.bf16.msra.mxu0 %v9047_v32 }
  0x72   :  { %1108 = vmatprep.subr.bf16.mxu0 %v9055_v34  ;;  %1118 = vmatprep.mubr.bf16.mxu0 %v8787_v52 }
  0x73   :  { %664 = vmatmul.mubr.bf16.vlgmr.msra.gmra.mrb[32].mxu1 %v10684_v0  ;;  %v9106_v0 = vld [vmem:[#allocation6 + $0x1e0] ss:$16 sps:$4 sm:$0xff]  }
  0x74   :  { %1128 = vmatpush1.bf16.msra.mxu1 %v8929_v56  ;;  %1159 = vmatprep.mubr.bf16.mxu1 %v8787_v52  ;;  %10917 = vst [vmem:[#allocation31_spill] sm:$0xff] %v9106_v0  ;;  %v78_v52 = vlaneseq }
  0x75   :  { %1129 = vmatprep.subr.bf16.mxu1 %v8937_v58  ;;  %1109 = vmatpush1.bf16.msra.mxu0 %v9059_v36 }
  0x76   :  { %1110 = vmatprep.subr.bf16.mxu0 %v9067_v38 }
  0x78   :  { %1130 = vmatpush1.bf16.msra.mxu1 %v8941_v60 }
  0x79   :  { %1131 = vmatprep.subr.bf16.mxu1 %v8949_v62  ;;  %1111 = vmatpush1.bf16.msra.mxu0 %v9071_v40 }
  0x7a   :  { %1112 = vmatprep.subr.bf16.mxu0 %v9081_v43 }
  0x7c   :  { %1132 = vmatpush1.bf16.msra.mxu1 %v8953_v1 }
  0x7d   :  { %1133 = vmatprep.subr.bf16.mxu1 %v8961_v3  ;;  %1113 = vmatpush1.bf16.msra.mxu0 %v9079_v42 }
  0x7e   :  { %1114 = vmatprep.subr.bf16.mxu0 %v9087_v46  ;;  %v9110_v46 = vld [vmem:[#allocation6 + $0x1e8] ss:$16 sps:$4 sm:$0xff]  }
  0x7f   :  { %10918 = vst [vmem:[#allocation32_spill] sm:$0xff] %v9110_v46 }
  0x80   :  { %1134 = vmatpush1.bf16.msra.mxu1 %v8965_v5 }
  0x81   :  { %1135 = vmatprep.subr.bf16.mxu1 %v8973_v7  ;;  %1115 = vmatpush1.bf16.msra.mxu0 %v9094_v48  ;;  %v9115_v48 = vshrl.u32 %v78_v52, 7 }
  0x82   :  { %1116 = vmatprep.subr.bf16.mxu0 %v9100_v50  ;;  %v76_v50 = vld [vmem:[%s10678_s3] sm:$0xf] }
  0x83   :  { %v10704_v42 = vsub.s32 0, %v9115_v48 }
  0x84   :  { %1136 = vmatpush1.bf16.msra.mxu1 %v8977_v9 }
  0x85   :  { %1137 = vmatprep.subr.bf16.mxu1 %v8985_v11  ;;  %1117 = vmatpush1.bf16.msra.mxu0 %v9106_v0  ;;  %v81_v0 = vrot.slane %v76_v50, %v10704_v42 }
  0x88   :  { %1138 = vmatpush1.bf16.msra.mxu1 %v8989_v13 }
  0x89   :  { %1139 = vmatprep.subr.bf16.mxu1 %v8997_v15 }
  0x8c   :  { %1140 = vmatpush1.bf16.msra.mxu1 %v9001_v17 }
  0x8d   :  { %1141 = vmatprep.subr.bf16.mxu1 %v9009_v19 }
  0x90   :  { %1142 = vmatpush1.bf16.msra.mxu1 %v9013_v21 }
  0x91   :  { %1143 = vmatprep.subr.bf16.mxu1 %v9021_v23 }
  0x94   :  { %1144 = vmatpush1.bf16.msra.mxu1 %v9025_v25 }
  0x95   :  { %1145 = vmatprep.subr.bf16.mxu1 %v9033_v27 }
  0x98   :  { %1146 = vmatpush1.bf16.msra.mxu1 %v9037_v29 }
  0x99   :  { %1147 = vmatprep.subr.bf16.mxu1 %v9045_v31 }
  0x9c   :  { %1148 = vmatpush1.bf16.msra.mxu1 %v9049_v33 }
  0x9d   :  { %1149 = vmatprep.subr.bf16.mxu1 %v9057_v35 }
  0xa0   :  { %1150 = vmatpush1.bf16.msra.mxu1 %v9061_v37 }
  0xa1   :  { %1151 = vmatprep.subr.bf16.mxu1 %v9069_v39 }
  0xa4   :  { %1152 = vmatpush1.bf16.msra.mxu1 %v9073_v41 }
  0xa5   :  { %1153 = vmatprep.subr.bf16.mxu1 %v9085_v45 }
  0xa8   :  { %1154 = vmatpush1.bf16.msra.mxu1 %v9083_v44  ;;  %v8703_v44 = vld [vmem:[#allocation4 + $0xc] ss:$16 sps:$4 sm:$0xff]  }
  0xa9   :  { %1155 = vmatprep.subr.bf16.mxu1 %v9090_v47  ;;  %v8702_v47 = vld [vmem:[#allocation4 + $0x4] ss:$16 sps:$4 sm:$0xff]  }
  0xaa   :  { %1389 = vmatprep.subr.bf16.mxu0 %v8702_v47 }
  0xac   :  { %1156 = vmatpush1.bf16.msra.mxu1 %v9098_v49  ;;  %v10707_v49 = vsub.s32 1, %v9115_v48 }
  0xad   :  { %1157 = vmatprep.subr.bf16.mxu1 %v9103_v51 }
  0xae   :  { %v85_v47 = vrot.slane %v76_v50, %v10707_v49 }
  0xb0   :  { %1158 = vmatpush1.bf16.msra.mxu1 %v9110_v46 }
  0xb1   :  { %1430 = vmatprep.subr.bf16.mxu1 %v8703_v44 }
 0x106   :  { %v228_v51 = vpop.f32.mrb[0].mxu1 }
 0x107   :  { %v230_v46 = vpop.f32.mrb[1].mxu1 }
 0x108   :  { %v232_v44 = vpop.f32.mrb[2].mxu1 }
 0x109   :  { %v9126_v45 = vadd.f32 %v232_v44, %v81_v0  ;;  %v234_v52 = vpop.f32.mrb[3].mxu1 }
 0x10a   :  { %v9128_v43 = vadd.f32 %v234_v52, %v85_v47 }
 0x10b   :  { %10919 = vst [vmem:[#allocation33_spill] sm:$0xff] %v9126_v45 }
 0x10c   :  { %10920 = vst [vmem:[#allocation34_spill] sm:$0xff] %v9128_v43  ;;  %v229_v43 = vadd.f32 %v228_v51, %v81_v0 }
 0x10e   :  { %v238_v41 = vpop.f32.mrb[4].mxu1 }
 0x10f   :  { %v9130_v40 = vadd.f32 %v238_v41, %v81_v0  ;;  %v240_v39 = vpop.f32.mrb[5].mxu1 }
 0x110   :  { %v9132_v38 = vadd.f32 %v240_v39, %v85_v47  ;;  %v242_v37 = vpop.f32.mrb[6].mxu1 }
 0x111   :  { %10921 = vst [vmem:[#allocation35_spill] sm:$0xff] %v9130_v40  ;;  %v9134_v36 = vadd.f32 %v242_v37, %v81_v0  ;;  %v244_v42 = vpop.f32.mrb[7].mxu1  ;;  %v231_v40 = vadd.f32 %v230_v46, %v85_v47  ;;  %v10711_v46 = vsub.s32 2, %v9115_v48 }
 0x112   :  { %10922 = vst [vmem:[#allocation36_spill] sm:$0xff] %v9132_v38  ;;  %v9136_v35 = vadd.f32 %v244_v42, %v85_v47 }
 0x113   :  { %10923 = vst [vmem:[#allocation37_spill] sm:$0xff] %v9134_v36 }
 0x114   :  { %10924 = vst [vmem:[#allocation38_spill] sm:$0xff] %v9136_v35 }
 0x116   :  { %v248_v34 = vpop.f32.mrb[8].mxu1 }
 0x117   :  { %v9138_v49 = vadd.f32 %v248_v34, %v81_v0  ;;  %v250_v44 = vpop.f32.mrb[9].mxu1 }
 0x118   :  { %v9140_v45 = vadd.f32 %v250_v44, %v85_v47  ;;  %v252_v52 = vpop.f32.mrb[10].mxu1 }
 0x119   :  { %10925 = vst [vmem:[#allocation39_spill] sm:$0xff] %v9138_v49  ;;  %v9142_v33 = vadd.f32 %v252_v52, %v81_v0  ;;  %v254_v41 = vpop.f32.mrb[11].mxu1 }
 0x11a   :  { %10926 = vst [vmem:[#allocation40_spill] sm:$0xff] %v9140_v45  ;;  %v9144_v39 = vadd.f32 %v254_v41, %v85_v47  ;;  %v624_v38 = vpop.f32.mrb[0].mxu0 }
 0x11b   :  { %10927 = vst [vmem:[#allocation41_spill] sm:$0xff] %v9142_v33  ;;  %v672_v37 = vadd.f32 %v624_v38, %v229_v43  ;;  %v626_v36 = vpop.f32.mrb[1].mxu0  ;;  %v10712_v38 = vsub.s32 3, %v9115_v48 }
 0x11c   :  { %10928 = vst [vmem:[#allocation42_spill] sm:$0xff] %v9144_v39  ;;  %v673_v32 = vadd.f32 %v626_v36, %v231_v40  ;;  %v628_v42 = vpop.f32.mrb[2].mxu0 }
 0x11d   :  { %v629_v35 = vpop.f32.mrb[3].mxu0 }
 0x11e   :  { %v258_v31 = vpop.f32.mrb[12].mxu1  ;;  %v89_v35 = vrot.slane %v76_v50, %v10711_v46 }
 0x11f   :  { %v9146_v34 = vadd.f32 %v258_v31, %v81_v0  ;;  %v260_v49 = vpop.f32.mrb[13].mxu1  ;;  %v93_v31 = vrot.slane %v76_v50, %v10712_v38  ;;  %v7007_v50 = vmul.f32 -1.442695, %v672_v37 }
 0x120   :  { %v9148_v44 = vadd.f32 %v260_v49, %v85_v47  ;;  %v262_v45 = vpop.f32.mrb[14].mxu1 }
 0x121   :  { %10929 = vst [vmem:[#allocation43_spill] sm:$0xff] %v9146_v34  ;;  %v9150_v51 = vadd.f32 %v262_v45, %v81_v0  ;;  %v264_v52 = vpop.f32.mrb[15].mxu1 }
 0x122   :  { %10930 = vst [vmem:[#allocation44_spill] sm:$0xff] %v9148_v44  ;;  %v9152_v33 = vadd.f32 %v264_v52, %v85_v47  ;;  %v7008_v44 = vmul.f32 -1.442695, %v673_v32 }
 0x123   :  { %10931 = vst [vmem:[#allocation45_spill] sm:$0xff] %v9150_v51 }
 0x124   :  { %10932 = vst [vmem:[#allocation46_spill] sm:$0xff] %v9152_v33  ;;  %8446 = vpow2.f32 %v7008_v44 }
 0x125   :  { %8448 = vpow2.f32 %v7007_v50 }
 0x126   :  { %v301_v43 = vpop.f32.mrb[16].mxu1 }
 0x127   :  { %v303_v36 = vpop.f32.mrb[17].mxu1 }
 0x128   :  { %v305_v40 = vpop.f32.mrb[18].mxu1 }
 0x129   :  { %v9160_v49 = vadd.f32 %v305_v40, %v89_v35  ;;  %v307_v0 = vpop.f32.mrb[19].mxu1 }
 0x12a   :  { %v9162_v45 = vadd.f32 %v307_v0, %v93_v31 }
 0x12b   :  { %10933 = vst [vmem:[#allocation47_spill] sm:$0xff] %v9160_v49 }
 0x12c   :  { %10934 = vst [vmem:[#allocation48_spill] sm:$0xff] %v9162_v45 }
 0x12e   :  { %v311_v47 = vpop.f32.mrb[20].mxu1 }
 0x12f   :  { %v9164_v41 = vadd.f32 %v311_v47, %v89_v35  ;;  %v313_v42 = vpop.f32.mrb[21].mxu1 }
 0x130   :  { %v9166_v52 = vadd.f32 %v313_v42, %v93_v31  ;;  %v315_v33 = vpop.f32.mrb[22].mxu1 }
 0x131   :  { %10935 = vst [vmem:[#allocation49_spill] sm:$0xff] %v9164_v41  ;;  %v9168_v51 = vadd.f32 %v315_v33, %v89_v35  ;;  %v317_v46 = vpop.f32.mrb[23].mxu1 }
 0x132   :  { %10936 = vst [vmem:[#allocation50_spill] sm:$0xff] %v9166_v52  ;;  %v9170_v34 = vadd.f32 %v317_v46, %v93_v31  ;;  %v8447_v46 = vpop.eup %8446 }
 0x133   :  { %10937 = vst [vmem:[#allocation51_spill] sm:$0xff] %v9168_v51  ;;  %v8449_v50 = vpop.eup %8448 }
 0x134   :  { %10938 = vst [vmem:[#allocation52_spill] sm:$0xff] %v9170_v34  ;;  %v304_v34 = vadd.f32 %v303_v36, %v93_v31 }
 0x136   :  { %v321_v40 = vpop.f32.mrb[24].mxu1 }
 0x137   :  { %v9172_v38 = vadd.f32 %v321_v40, %v89_v35  ;;  %v323_v0 = vpop.f32.mrb[25].mxu1 }
 0x138   :  { %v9174_v39 = vadd.f32 %v323_v0, %v93_v31  ;;  %v325_v47 = vpop.f32.mrb[26].mxu1 }
 0x139   :  { %10939 = vst [vmem:[#allocation53_spill] sm:$0xff] %v9172_v38  ;;  %v9176_v41 = vadd.f32 %v325_v47, %v89_v35  ;;  %v327_v42 = vpop.f32.mrb[27].mxu1  ;;  %v682_v47 = vadd.f32 1.0, %v8449_v50 }
 0x13a   :  { %10940 = vst [vmem:[#allocation54_spill] sm:$0xff] %v9174_v39  ;;  %v9178_v52 = vadd.f32 %v327_v42, %v93_v31  ;;  %v683_v39 = vadd.f32 1.0, %v8447_v46 }
 0x13b   :  { %10941 = vst [vmem:[#allocation55_spill] sm:$0xff] %v9176_v41  ;;  %v302_v41 = vadd.f32 %v301_v43, %v89_v35 }
 0x13c   :  { %10942 = vst [vmem:[#allocation56_spill] sm:$0xff] %v9178_v52  ;;  %8450 = vrcp.f32 %v683_v39 }
 0x13d   :  { %8452 = vrcp.f32 %v682_v47  ;;  %v8712_v47 = vld [vmem:[#allocation4 + $0x40] ss:$16 sps:$4 sm:$0xff]  }
 0x13e   :  { %v331_v33 = vpop.f32.mrb[28].mxu1 }
 0x13f   :  { %v9180_v51 = vadd.f32 %v331_v33, %v89_v35  ;;  %v333_v32 = vpop.f32.mrb[29].mxu1 }
 0x140   :  { %v9182_v37 = vadd.f32 %v333_v32, %v93_v31  ;;  %v335_v44 = vpop.f32.mrb[30].mxu1 }
 0x141   :  { %10943 = vst [vmem:[#allocation57_spill] sm:$0xff] %v9180_v51  ;;  %v9184_v40 = vadd.f32 %v335_v44, %v89_v35  ;;  %v337_v38 = vpop.f32.mrb[31].mxu1 }
 0x142   :  { %10944 = vst [vmem:[#allocation58_spill] sm:$0xff] %v9182_v37  ;;  %v9186_v0 = vadd.f32 %v337_v38, %v93_v31  ;;  %v8705_v31 = vld [vmem:[#allocation4 + $0x8] ss:$16 sps:$4 sm:$0xff]  }
 0x143   :  { %10945 = vst [vmem:[#allocation59_spill] sm:$0xff] %v9184_v40 }
 0x144   :  { %10946 = vst [vmem:[#allocation60_spill] sm:$0xff] %v9186_v0 }
 0x146   :  { %v665_v42 = vpop.f32.mrb[32].mxu1  ;;  %v8451_v44 = vpop.eup %8450 }
 0x147   :  { %v674_v52 = vadd.f32 %v665_v42, %v302_v41  ;;  %v667_v33 = vpop.f32.mrb[33].mxu1  ;;  %v8453_v40 = vpop.eup %8452  ;;  %v695_v38 = vmul.f32 0.0, %v8451_v44  ;;  %v10947_v41 = vmov 0   ;;  %v8713_v42 = vld [vmem:[#allocation4 + $0x48] ss:$16 sps:$4 sm:$0xff]  }
 0x148   :  { %v675_v51 = vadd.f32 %v667_v33, %v304_v34  ;;  %v669_v45 = vpop.f32.mrb[34].mxu1  ;;  %v8714_v33 = vld [vmem:[#allocation4 + $0x64] ss:$16 sps:$4 sm:$0xff]   ;;  %v8716_v44 = vld [vmem:[#allocation4 + $0x60] ss:$16 sps:$4 sm:$0xff]  }
 0x149   :  { %8454 = vtanh.f32 %v674_v52  ;;  %v670_v32 = vpop.f32.mrb[35].mxu1  ;;  %v8707_v45 = vld [vmem:[#allocation4 + $0x2c] ss:$16 sps:$4 sm:$0xff]   ;;  %v8708_v52 = vld [vmem:[#allocation4 + $0x20] ss:$16 sps:$4 sm:$0xff]  }
 0x14a   :  { %v7009_v37 = vmul.f32 -1.442695, %v675_v51  ;;  %v8704_v51 = vld [vmem:[#allocation4] ss:$16 sps:$4 sm:$0xff]   ;;  %v8715_v32 = vld [vmem:[#allocation4 + $0x6c] ss:$16 sps:$4 sm:$0xff]  }
 0x14c   :  { %8456 = vpow2.f32 %v7009_v37  ;;  %v8709_v37 = vld [vmem:[#allocation4 + $0x28] ss:$16 sps:$4 sm:$0xff]  }
 0x153   :  { %v8455_v49 = vpop.eup %8454 }
 0x154   :  { %v696_v0 = vmul.f32 %v8455_v49, %v8453_v40  ;;  %v8706_v49 = vld [vmem:[#allocation4 + $0x24] ss:$16 sps:$4 sm:$0xff]  }
 0x155   :  { %v8710_v40 = vld [vmem:[#allocation4 + $0x44] ss:$16 sps:$4 sm:$0xff]  }
 0x156   :  { %v8457_v46 = vpop.eup %8456  ;;  %v9188_v50 = vadd.f32 %v696_v0, %v695_v38  ;;  %v8711_v0 = vld [vmem:[#allocation4 + $0x4c] ss:$16 sps:$4 sm:$0xff]   ;;  %v8717_v38 = vld [vmem:[#allocation4 + $0x68] ss:$16 sps:$4 sm:$0xff]  }
 0x157   :  { %v692_v43 = vadd.f32 1.0, %v8457_v46  ;;  %v8718_v46 = vld [vmem:[#allocation4 + $0x84] ss:$16 sps:$4 sm:$0xff]  }
 0x158   :  { %8458 = vtanh.f32 %v9188_v50 }
 0x159   :  { %8460 = vrcp.f32 %v692_v43  ;;  %v8719_v43 = vld [vmem:[#allocation4 + $0x8c] ss:$16 sps:$4 sm:$0xff]  }
 0x162   :  { %v8459_v39 = vpop.eup %8458 }
 0x163   :  { %v8461_v35 = vpop.eup %8460 }
 0x164   :  { %v699_v34 = vmul.f32 %v8461_v35, %v8459_v39  ;;  %v8720_v39 = vld [vmem:[#allocation4 + $0x80] ss:$16 sps:$4 sm:$0xff]   ;;  %v8721_v35 = vld [vmem:[#allocation4 + $0x88] ss:$16 sps:$4 sm:$0xff]  }
 0x166   :  { %v9191_v36 = vpack.c.bf16 %v699_v34, %v699_v34  ;;  %v8722_v34 = vld [vmem:[#allocation4 + $0xa4] ss:$16 sps:$4 sm:$0xff]  }
 0x168   :  { %1119 = vmatmul.mubr.bf16.vlgmr.msra.gmra.mrb[4].mxu0 %v9191_v36  ;;  %1160 = vmatmul.mubr.bf16.vlgmr.msra.gmra.mrb[36].mxu1 %v9191_v36 }
 0x169   :  { %1390 = vmatpush1.bf16.msra.mxu0 %v8704_v51  ;;  %1431 = vmatpush1.bf16.msra.mxu1 %v8705_v31  ;;  %v8723_v51 = vld [vmem:[#allocation4 + $0xac] ss:$16 sps:$4 sm:$0xff]   ;;  %v8724_v31 = vld [vmem:[#allocation4 + $0xa0] ss:$16 sps:$4 sm:$0xff]  }
 0x16a   :  { %1391 = vmatprep.subr.bf16.mxu0 %v8706_v49  ;;  %1432 = vmatprep.subr.bf16.mxu1 %v8707_v45  ;;  %v8725_v49 = vld [vmem:[#allocation4 + $0xa8] ss:$16 sps:$4 sm:$0xff]   ;;  %v8726_v45 = vld [vmem:[#allocation4 + $0xc4] ss:$16 sps:$4 sm:$0xff]  }
 0x16b   :  { %1421 = vmatprep.mubr.bf16.mxu0 %v10947_v41  ;;  %1462 = vmatprep.mubr.bf16.mxu1 %v10947_v41 }
 0x16d   :  { %1392 = vmatpush1.bf16.msra.mxu0 %v8708_v52  ;;  %1433 = vmatpush1.bf16.msra.mxu1 %v8709_v37  ;;  %v8727_v52 = vld [vmem:[#allocation4 + $0xcc] ss:$16 sps:$4 sm:$0xff]   ;;  %v8728_v37 = vld [vmem:[#allocation4 + $0xc0] ss:$16 sps:$4 sm:$0xff]  }
 0x16e   :  { %1393 = vmatprep.subr.bf16.mxu0 %v8710_v40  ;;  %1434 = vmatprep.subr.bf16.mxu1 %v8711_v0  ;;  %v8729_v40 = vld [vmem:[#allocation4 + $0xc8] ss:$16 sps:$4 sm:$0xff]   ;;  %v8730_v0 = vld [vmem:[#allocation4 + $0xe4] ss:$16 sps:$4 sm:$0xff]  }
 0x171   :  { %1394 = vmatpush1.bf16.msra.mxu0 %v8712_v47  ;;  %1435 = vmatpush1.bf16.msra.mxu1 %v8713_v42  ;;  %v8731_v47 = vld [vmem:[#allocation4 + $0xec] ss:$16 sps:$4 sm:$0xff]   ;;  %v8732_v42 = vld [vmem:[#allocation4 + $0xe0] ss:$16 sps:$4 sm:$0xff]  }
 0x172   :  { %1395 = vmatprep.subr.bf16.mxu0 %v8714_v33  ;;  %1436 = vmatprep.subr.bf16.mxu1 %v8715_v32  ;;  %v8733_v33 = vld [vmem:[#allocation4 + $0xe8] ss:$16 sps:$4 sm:$0xff]   ;;  %v10975_v32 = vsub.s32 3, %v9115_v48 }
 0x175   :  { %1396 = vmatpush1.bf16.msra.mxu0 %v8716_v44  ;;  %1437 = vmatpush1.bf16.msra.mxu1 %v8717_v38 }
 0x176   :  { %1397 = vmatprep.subr.bf16.mxu0 %v8718_v46  ;;  %1438 = vmatprep.subr.bf16.mxu1 %v8719_v43  ;;  %v10977_v46 = vsub.s32 2, %v9115_v48 }
 0x179   :  { %1398 = vmatpush1.bf16.msra.mxu0 %v8720_v39  ;;  %1439 = vmatpush1.bf16.msra.mxu1 %v8721_v35 }
 0x17a   :  { %1399 = vmatprep.subr.bf16.mxu0 %v8722_v34  ;;  %1440 = vmatprep.subr.bf16.mxu1 %v8723_v51 }
 0x17d   :  { %1400 = vmatpush1.bf16.msra.mxu0 %v8724_v31  ;;  %1441 = vmatpush1.bf16.msra.mxu1 %v8725_v49 }
 0x17e   :  { %1401 = vmatprep.subr.bf16.mxu0 %v8726_v45  ;;  %1442 = vmatprep.subr.bf16.mxu1 %v8727_v52 }
 0x181   :  { %1402 = vmatpush1.bf16.msra.mxu0 %v8728_v37  ;;  %1443 = vmatpush1.bf16.msra.mxu1 %v8729_v40 }
 0x182   :  { %1403 = vmatprep.subr.bf16.mxu0 %v8730_v0  ;;  %1444 = vmatprep.subr.bf16.mxu1 %v8731_v47 }
 0x185   :  { %1404 = vmatpush1.bf16.msra.mxu0 %v8732_v42  ;;  %1445 = vmatpush1.bf16.msra.mxu1 %v8733_v33 }
 0x186   :  { %1885 = vmatprep.subr.bf16.mxu0 %v8923_v53  ;;  %1926 = vmatprep.subr.bf16.mxu1 %v8925_v54  ;;  %v10948_v53 = vld [vmem:[#allocation10_spill] sm:$0xff]  ;;  %v10949_v54 = vld [vmem:[#allocation11_spill] sm:$0xff] }
 0x188   :  { %1422 = vmatmul.mubr.bf16.vlgmr.msra.gmra.mrb[8].mxu0 %v9191_v36  ;;  %1463 = vmatmul.mubr.bf16.vlgmr.msra.gmra.mrb[40].mxu1 %v9191_v36 }
 0x189   :  { %1886 = vmatpush1.bf16.msra.mxu0 %v8927_v55  ;;  %1927 = vmatpush1.bf16.msra.mxu1 %v8929_v56  ;;  %v10950_v55 = vld [vmem:[#allocation12_spill] sm:$0xff]  ;;  %v10951_v56 = vld [vmem:[#allocation13_spill] sm:$0xff] }
 0x18a   :  { %1887 = vmatprep.subr.bf16.mxu0 %v8935_v57  ;;  %1928 = vmatprep.subr.bf16.mxu1 %v8937_v58  ;;  %v10952_v57 = vld [vmem:[#allocation14_spill] sm:$0xff]  ;;  %v10953_v58 = vld [vmem:[#allocation15_spill] sm:$0xff] }
 0x18d   :  { %1888 = vmatpush1.bf16.msra.mxu0 %v8939_v59  ;;  %1929 = vmatpush1.bf16.msra.mxu1 %v8941_v60  ;;  %v10954_v59 = vld [vmem:[#allocation16_spill] sm:$0xff]  ;;  %v10955_v60 = vld [vmem:[#allocation17_spill] sm:$0xff] }
 0x18e   :  { %1889 = vmatprep.subr.bf16.mxu0 %v8947_v61  ;;  %1930 = vmatprep.subr.bf16.mxu1 %v8949_v62  ;;  %v10956_v61 = vld [vmem:[#allocation18_spill] sm:$0xff]  ;;  %v10957_v62 = vld [vmem:[#allocation19_spill] sm:$0xff] }
 0x191   :  { %1890 = vmatpush1.bf16.msra.mxu0 %v8951_v63  ;;  %1931 = vmatpush1.bf16.msra.mxu1 %v8953_v1  ;;  %v10958_v63 = vld [vmem:[#allocation20_spill] sm:$0xff]  ;;  %v10959_v1 = vld [vmem:[#allocation22_spill] sm:$0xff] }
 0x192   :  { %1891 = vmatprep.subr.bf16.mxu0 %v8959_v2  ;;  %1932 = vmatprep.subr.bf16.mxu1 %v8961_v3  ;;  %v10960_v2 = vld [vmem:[#allocation24_spill] sm:$0xff]  ;;  %v10961_v3 = vld [vmem:[#allocation21_spill] sm:$0xff] }
 0x195   :  { %1892 = vmatpush1.bf16.msra.mxu0 %v8963_v4  ;;  %1933 = vmatpush1.bf16.msra.mxu1 %v8965_v5  ;;  %v10962_v4 = vld [vmem:[#allocation23_spill] sm:$0xff]  ;;  %v10963_v5 = vld [vmem:[#allocation25_spill] sm:$0xff] }
 0x196   :  { %1893 = vmatprep.subr.bf16.mxu0 %v8971_v6  ;;  %1934 = vmatprep.subr.bf16.mxu1 %v8973_v7  ;;  %v10964_v6 = vld [vmem:[#allocation26_spill] sm:$0xff]  ;;  %v10965_v7 = vld [vmem:[#allocation27_spill] sm:$0xff] }
 0x199   :  { %1894 = vmatpush1.bf16.msra.mxu0 %v8975_v8  ;;  %1935 = vmatpush1.bf16.msra.mxu1 %v8977_v9  ;;  %v10966_v8 = vld [vmem:[#allocation28_spill] sm:$0xff]  ;;  %v10967_v9 = vld [vmem:[#allocation29_spill] sm:$0xff] }
 0x19a   :  { %1895 = vmatprep.subr.bf16.mxu0 %v8983_v10  ;;  %1936 = vmatprep.subr.bf16.mxu1 %v8985_v11  ;;  %v10968_v10 = vld [vmem:[#allocation30_spill] sm:$0xff]  ;;  %v10969_v11 = vld [vmem:[#allocation31_spill] sm:$0xff] }
 0x19d   :  { %1896 = vmatpush1.bf16.msra.mxu0 %v8987_v12  ;;  %1937 = vmatpush1.bf16.msra.mxu1 %v8989_v13  ;;  %v10970_v12 = vld [vmem:[#allocation32_spill] sm:$0xff] }
 0x19e   :  { %1897 = vmatprep.subr.bf16.mxu0 %v8995_v14  ;;  %1938 = vmatprep.subr.bf16.mxu1 %v8997_v15  ;;  %v9263_v13 = vld [vmem:[#allocation4 + $0x4] ss:$16 sps:$4 sm:$0xff]   ;;  %v9265_v14 = vld [vmem:[#allocation4 + $0xc] ss:$16 sps:$4 sm:$0xff]   ;;  %v372_v15 = vld [vmem:[%s10680_s5] sm:$0xf] }
 0x19f   :  { %v9284_v44 = vrot.slane %v372_v15, %v10975_v32  ;;  %v9289_v43 = vrot.slane %v372_v15, %v10977_v46  ;;  %v9309_v32 = vld [vmem:[#allocation4 + $0x8] ss:$16 sps:$4 sm:$0xff]   ;;  %v9313_v46 = vld [vmem:[#allocation4 + $0x24] ss:$16 sps:$4 sm:$0xff]  }
 0x1a1   :  { %1898 = vmatpush1.bf16.msra.mxu0 %v8999_v16  ;;  %1939 = vmatpush1.bf16.msra.mxu1 %v9001_v17  ;;  %v10971_v16 = vsub.s32 0, %v9115_v48  ;;  %10976 = vst [vmem:[#allocation12_spill] sm:$0xff] %v9284_v44  ;;  %10978 = vst [vmem:[#allocation13_spill] sm:$0xff] %v9289_v43 }
 0x1a2   :  { %1899 = vmatprep.subr.bf16.mxu0 %v9007_v18  ;;  %1940 = vmatprep.subr.bf16.mxu1 %v9009_v19  ;;  %v10973_v18 = vsub.s32 1, %v9115_v48 }
 0x1a3   :  { %v9274_v17 = vrot.slane %v372_v15, %v10971_v16 }
 0x1a4   :  { %v9278_v19 = vrot.slane %v372_v15, %v10973_v18 }
 0x1a5   :  { %1900 = vmatpush1.bf16.msra.mxu0 %v9011_v20  ;;  %1941 = vmatpush1.bf16.msra.mxu1 %v9013_v21  ;;  %10972 = vst [vmem:[#allocation10_spill] sm:$0xff] %v9274_v17 }
 0x1a6   :  { %1901 = vmatprep.subr.bf16.mxu0 %v9019_v22  ;;  %1942 = vmatprep.subr.bf16.mxu1 %v9021_v23  ;;  %10974 = vst [vmem:[#allocation11_spill] sm:$0xff] %v9278_v19 }
 0x1a9   :  { %1902 = vmatpush1.bf16.msra.mxu0 %v9023_v24  ;;  %1943 = vmatpush1.bf16.msra.mxu1 %v9025_v25 }
 0x1aa   :  { %1903 = vmatprep.subr.bf16.mxu0 %v9031_v26  ;;  %1944 = vmatprep.subr.bf16.mxu1 %v9033_v27 }
 0x1ad   :  { %1904 = vmatpush1.bf16.msra.mxu0 %v9035_v28  ;;  %1945 = vmatpush1.bf16.msra.mxu1 %v9037_v29 }
 0x1ae   :  { %1905 = vmatprep.subr.bf16.mxu0 %v9043_v30  ;;  %1946 = vmatprep.subr.bf16.mxu1 %v10948_v53 }
 0x1b1   :  { %1906 = vmatpush1.bf16.msra.mxu0 %v10949_v54  ;;  %1947 = vmatpush1.bf16.msra.mxu1 %v10950_v55  ;;  %v10979_v54 = vld [vmem:[#allocation33_spill] sm:$0xff] }
 0x1b2   :  { %1907 = vmatprep.subr.bf16.mxu0 %v10951_v56  ;;  %1948 = vmatprep.subr.bf16.mxu1 %v10952_v57  ;;  %v10980_v56 = vld [vmem:[#allocation47_spill] sm:$0xff] }
 0x1b5   :  { %1908 = vmatpush1.bf16.msra.mxu0 %v10953_v58  ;;  %1949 = vmatpush1.bf16.msra.mxu1 %v10954_v59 }
 0x1b6   :  { %1909 = vmatprep.subr.bf16.mxu0 %v10955_v60  ;;  %1950 = vmatprep.subr.bf16.mxu1 %v10956_v61  ;;  %v10981_v60 = vld [vmem:[#allocation34_spill] sm:$0xff] }
 0x1b9   :  { %1910 = vmatpush1.bf16.msra.mxu0 %v10957_v62  ;;  %1951 = vmatpush1.bf16.msra.mxu1 %v10958_v63  ;;  %v10982_v62 = vld [vmem:[#allocation48_spill] sm:$0xff] }
 0x1ba   :  { %1911 = vmatprep.subr.bf16.mxu0 %v10959_v1  ;;  %1952 = vmatprep.subr.bf16.mxu1 %v10960_v2 }
 0x1bd   :  { %1912 = vmatpush1.bf16.msra.mxu0 %v10961_v3  ;;  %1953 = vmatpush1.bf16.msra.mxu1 %v10962_v4 }
 0x1be   :  { %1913 = vmatprep.subr.bf16.mxu0 %v10963_v5  ;;  %1954 = vmatprep.subr.bf16.mxu1 %v10964_v6 }
 0x1c1   :  { %1914 = vmatpush1.bf16.msra.mxu0 %v10965_v7  ;;  %1955 = vmatpush1.bf16.msra.mxu1 %v10966_v8 }
 0x1c2   :  { %1915 = vmatprep.subr.bf16.mxu0 %v10967_v9  ;;  %1956 = vmatprep.subr.bf16.mxu1 %v10968_v10 }
 0x1c5   :  { %1916 = vmatpush1.bf16.msra.mxu0 %v10969_v11  ;;  %1957 = vmatpush1.bf16.msra.mxu1 %v10970_v12 }
 0x1c6   :  { %2188 = vmatprep.subr.bf16.mxu0 %v9263_v13  ;;  %2229 = vmatprep.subr.bf16.mxu1 %v9265_v14 }
 0x23b   :  { %v1120_v20 = vpop.f32.mrb[4].mxu0  ;;  %v1161_v21 = vpop.f32.mrb[36].mxu1 }
 0x23c   :  { %v1121_v22 = vadd.f32 %v1120_v20, %v9274_v17  ;;  %v1122_v23 = vpop.f32.mrb[5].mxu0  ;;  %v1163_v24 = vpop.f32.mrb[37].mxu1  ;;  %v1162_v35 = vadd.f32 %v1161_v21, %v9289_v43 }
 0x23d   :  { %v1123_v25 = vadd.f32 %v1122_v23, %v9278_v19  ;;  %v1124_v26 = vpop.f32.mrb[6].mxu0  ;;  %v1165_v27 = vpop.f32.mrb[38].mxu1  ;;  %v1164_v38 = vadd.f32 %v1163_v24, %v9284_v44 }
 0x23e   :  { %v7074_v28 = vmul.f32 -1.442695, %v1121_v22  ;;  %v1125_v29 = vpop.f32.mrb[7].mxu0  ;;  %v1166_v30 = vpop.f32.mrb[39].mxu1 }
 0x23f   :  { %v7075_v36 = vmul.f32 -1.442695, %v1123_v25  ;;  %v7076_v39 = vmul.f32 -1.442695, %v1164_v38 }
 0x240   :  { %8462 = vpow2.f32 %v7074_v28 }
 0x241   :  { %8464 = vpow2.f32 %v7075_v36  ;;  %v9307_v36 = vld [vmem:[#allocation4] ss:$16 sps:$4 sm:$0xff]  }
 0x242   :  { %8466 = vpow2.f32 %v7076_v39  ;;  %v9315_v39 = vld [vmem:[#allocation4 + $0x2c] ss:$16 sps:$4 sm:$0xff]  }
 0x243   :  { %8468 = vtanh.f32 %v1162_v35  ;;  %v9323_v35 = vld [vmem:[#allocation4 + $0x28] ss:$16 sps:$4 sm:$0xff]  }
 0x24a   :  { %v8463_v34 = vpop.eup %8462 }
 0x24b   :  { %v8465_v51 = vpop.eup %8464  ;;  %v1174_v31 = vadd.f32 1.0, %v8463_v34  ;;  %v9327_v34 = vld [vmem:[#allocation4 + $0x44] ss:$16 sps:$4 sm:$0xff]  }
 0x24c   :  { %v1175_v49 = vadd.f32 1.0, %v8465_v51  ;;  %v8467_v45 = vpop.eup %8466  ;;  %v9329_v51 = vld [vmem:[#allocation4 + $0x4c] ss:$16 sps:$4 sm:$0xff]  }
 0x24d   :  { %8470 = vrcp.f32 %v1174_v31  ;;  %v8469_v52 = vpop.eup %8468  ;;  %v1184_v47 = vadd.f32 1.0, %v8467_v45  ;;  %v9335_v31 = vld [vmem:[#allocation4 + $0x40] ss:$16 sps:$4 sm:$0xff]   ;;  %v9341_v45 = vld [vmem:[#allocation4 + $0x64] ss:$16 sps:$4 sm:$0xff]  }
 0x24e   :  { %8472 = vrcp.f32 %v1175_v49  ;;  %v9337_v49 = vld [vmem:[#allocation4 + $0x48] ss:$16 sps:$4 sm:$0xff]  }
 0x24f   :  { %8474 = vrcp.f32 %v1184_v47  ;;  %v9355_v47 = vld [vmem:[#allocation4 + $0x8c] ss:$16 sps:$4 sm:$0xff]  }
 0x257   :  { %v8471_v37 = vpop.eup %8470 }
 0x258   :  { %v8473_v40 = vpop.eup %8472  ;;  %v1188_v0 = vmul.f32 %v8471_v37, %v8469_v52  ;;  %v9343_v52 = vld [vmem:[#allocation4 + $0x6c] ss:$16 sps:$4 sm:$0xff]   ;;  %v9347_v37 = vld [vmem:[#allocation4 + $0x60] ss:$16 sps:$4 sm:$0xff]  }
 0x259   :  { %v1187_v48 = vmul.f32 0.0, %v8473_v40  ;;  %v8475_v7 = vpop.eup %8474  ;;  %v9349_v40 = vld [vmem:[#allocation4 + $0x68] ss:$16 sps:$4 sm:$0xff]  }
 0x25b   :  { %v9292_v42 = vadd.f32 %v1188_v0, %v1187_v48  ;;  %v1423_v33 = vpop.f32.mrb[8].mxu0  ;;  %v1464_v53 = vpop.f32.mrb[40].mxu1  ;;  %v9353_v0 = vld [vmem:[#allocation4 + $0x84] ss:$16 sps:$4 sm:$0xff]   ;;  %v9359_v48 = vld [vmem:[#allocation4 + $0x80] ss:$16 sps:$4 sm:$0xff]  }
 0x25c   :  { %v1471_v55 = vadd.f32 %v1423_v33, %v10979_v54  ;;  %v1473_v57 = vadd.f32 %v1464_v53, %v10980_v56  ;;  %v1425_v58 = vpop.f32.mrb[9].mxu0  ;;  %v1466_v59 = vpop.f32.mrb[41].mxu1  ;;  %v9361_v33 = vld [vmem:[#allocation4 + $0x88] ss:$16 sps:$4 sm:$0xff]   ;;  %v9365_v53 = vld [vmem:[#allocation4 + $0xa4] ss:$16 sps:$4 sm:$0xff]  }
 0x25d   :  { %8476 = vtanh.f32 %v9292_v42  ;;  %v1472_v61 = vadd.f32 %v1425_v58, %v10981_v60  ;;  %v1474_v63 = vadd.f32 %v1466_v59, %v10982_v62  ;;  %v1427_v1 = vpop.f32.mrb[10].mxu0  ;;  %v1468_v2 = vpop.f32.mrb[42].mxu1  ;;  %v9367_v54 = vld [vmem:[#allocation4 + $0xac] ss:$16 sps:$4 sm:$0xff]   ;;  %v9373_v56 = vld [vmem:[#allocation4 + $0xa8] ss:$16 sps:$4 sm:$0xff]  }
 0x25e   :  { %v7109_v3 = vmul.f32 -1.442695, %v1471_v55  ;;  %v1428_v4 = vpop.f32.mrb[11].mxu0  ;;  %v1469_v5 = vpop.f32.mrb[43].mxu1  ;;  %v9371_v55 = vld [vmem:[#allocation4 + $0xa0] ss:$16 sps:$4 sm:$0xff]  }
 0x25f   :  { %v7110_v6 = vmul.f32 -1.442695, %v1472_v61  ;;  %v7111_v9 = vmul.f32 -1.442695, %v1474_v63  ;;  %v9379_v58 = vld [vmem:[#allocation4 + $0xcc] ss:$16 sps:$4 sm:$0xff]  }
 0x260   :  { %8478 = vpow2.f32 %v7109_v3  ;;  %v9383_v59 = vld [vmem:[#allocation4 + $0xc0] ss:$16 sps:$4 sm:$0xff]   ;;  %v9385_v60 = vld [vmem:[#allocation4 + $0xc8] ss:$16 sps:$4 sm:$0xff]   ;;  %v9389_v61 = vld [vmem:[#allocation4 + $0xe4] ss:$16 sps:$4 sm:$0xff]  }
 0x261   :  { %8480 = vpow2.f32 %v7110_v6  ;;  %v9391_v62 = vld [vmem:[#allocation4 + $0xec] ss:$16 sps:$4 sm:$0xff]   ;;  %v9395_v63 = vld [vmem:[#allocation4 + $0xe0] ss:$16 sps:$4 sm:$0xff]   ;;  %v9397_v1 = vld [vmem:[#allocation4 + $0xe8] ss:$16 sps:$4 sm:$0xff]  }
 0x262   :  { %8482 = vpow2.f32 %v7111_v9  ;;  %v9405_v2 = vld [vmem:[#allocation6 + $0x4] ss:$16 sps:$4 sm:$0xff]   ;;  %v9407_v3 = vld [vmem:[#allocation6 + $0xc] ss:$16 sps:$4 sm:$0xff]   ;;  %v9409_v4 = vld [vmem:[#allocation6] ss:$16 sps:$4 sm:$0xff]  }
 0x263   :  { %8484 = vtanh.f32 %v1473_v57  ;;  %v9377_v57 = vld [vmem:[#allocation4 + $0xc4] ss:$16 sps:$4 sm:$0xff]   ;;  %v9411_v5 = vld [vmem:[#allocation6 + $0x8] ss:$16 sps:$4 sm:$0xff]  }
 0x264   :  { %v9417_v6 = vld [vmem:[#allocation6 + $0x24] ss:$16 sps:$4 sm:$0xff]   ;;  %v9423_v9 = vld [vmem:[#allocation6 + $0x28] ss:$16 sps:$4 sm:$0xff]  }
 0x267   :  { %v8477_v8 = vpop.eup %8476 }
 0x268   :  { %v9299_v10 = vmul.f32 %v8477_v8, %v8475_v7  ;;  %v9419_v7 = vld [vmem:[#allocation6 + $0x2c] ss:$16 sps:$4 sm:$0xff]   ;;  %v9421_v8 = vld [vmem:[#allocation6 + $0x20] ss:$16 sps:$4 sm:$0xff]  }
 0x26a   :  { %10983 = vst [vmem:[#allocation14_spill] sm:$0xff] %v9299_v10  ;;  %v8479_v11 = vpop.eup %8478  ;;  %v1500_v12 = vpack.c.bf16 %v9299_v10, %v9299_v10  ;;  %v9477_v10 = vld [vmem:[#allocation6 + $0xc4] ss:$16 sps:$4 sm:$0xff]  }
 0x26b   :  { %v8481_v15 = vpop.eup %8480  ;;  %v1481_v16 = vadd.f32 1.0, %v8479_v11  ;;  %v9429_v11 = vld [vmem:[#allocation6 + $0x44] ss:$16 sps:$4 sm:$0xff]   ;;  %10998 = vst [vmem:[#allocation29_spill] sm:$0xff] %v9477_v10 }
 0x26c   :  { %v1482_v18 = vadd.f32 1.0, %v8481_v15  ;;  %1917 = vmatprep.mubr.bf16.mxu0 %v1500_v12  ;;  %1958 = vmatprep.mubr.bf16.mxu1 %v1500_v12  ;;  %v8483_v20 = vpop.eup %8482  ;;  %v9431_v12 = vld [vmem:[#allocation6 + $0x4c] ss:$16 sps:$4 sm:$0xff]   ;;  %v9433_v15 = vld [vmem:[#allocation6 + $0x40] ss:$16 sps:$4 sm:$0xff]  }
 0x26d   :  { %8486 = vrcp.f32 %v1481_v16  ;;  %v8485_v21 = vpop.eup %8484  ;;  %v1491_v25 = vadd.f32 1.0, %v8483_v20  ;;  %10984 = vst [vmem:[#allocation15_spill] sm:$0xff] %v9433_v15  ;;  %v9435_v16 = vld [vmem:[#allocation6 + $0x48] ss:$16 sps:$4 sm:$0xff]   ;;  %v9443_v20 = vld [vmem:[#allocation6 + $0x6c] ss:$16 sps:$4 sm:$0xff]  }
 0x26e   :  { %8488 = vrcp.f32 %v1482_v18  ;;  %10985 = vst [vmem:[#allocation16_spill] sm:$0xff] %v9435_v16  ;;  %v9441_v18 = vld [vmem:[#allocation6 + $0x64] ss:$16 sps:$4 sm:$0xff]   ;;  %10987 = vst [vmem:[#allocation18_spill] sm:$0xff] %v9443_v20 }
 0x26f   :  { %8490 = vrcp.f32 %v1491_v25  ;;  %10986 = vst [vmem:[#allocation17_spill] sm:$0xff] %v9441_v18  ;;  %v9457_v25 = vld [vmem:[#allocation6 + $0x80] ss:$16 sps:$4 sm:$0xff]  }
 0x270   :  { %10992 = vst [vmem:[#allocation21_spill] sm:$0xff] %v9457_v25 }
 0x277   :  { %v8487_v22 = vpop.eup %8486 }
 0x278   :  { %v8489_v23 = vpop.eup %8488  ;;  %v1495_v24 = vmul.f32 %v8487_v22, %v8485_v21  ;;  %v9445_v21 = vld [vmem:[#allocation6 + $0x60] ss:$16 sps:$4 sm:$0xff]   ;;  %v9447_v22 = vld [vmem:[#allocation6 + $0x68] ss:$16 sps:$4 sm:$0xff]  }
 0x279   :  { %v1494_v26 = vmul.f32 %v8489_v23, %v9188_v50  ;;  %v8491_v28 = vpop.eup %8490  ;;  %v9321_v50 = vld [vmem:[#allocation4 + $0x20] ss:$16 sps:$4 sm:$0xff]   ;;  %10988 = vst [vmem:[#allocation19_spill] sm:$0xff] %v9445_v21  ;;  %10989 = vst [vmem:[#allocation20_spill] sm:$0xff] %v9447_v22  ;;  %v9453_v23 = vld [vmem:[#allocation6 + $0x84] ss:$16 sps:$4 sm:$0xff]  }
 0x27a   :  { %10990 = vst [vmem:[#allocation22_spill] sm:$0xff] %v9453_v23 }
 0x27b   :  { %v9304_v27 = vadd.f32 %v1495_v24, %v1494_v26  ;;  %v9455_v24 = vld [vmem:[#allocation6 + $0x8c] ss:$16 sps:$4 sm:$0xff]   ;;  %v9459_v26 = vld [vmem:[#allocation6 + $0x88] ss:$16 sps:$4 sm:$0xff]  }
 0x27c   :  { %10991 = vst [vmem:[#allocation24_spill] sm:$0xff] %v9455_v24  ;;  %10993 = vst [vmem:[#allocation23_spill] sm:$0xff] %v9459_v26 }
 0x27d   :  { %8492 = vtanh.f32 %v9304_v27 }
 0x287   :  { %v8493_v29 = vpop.eup %8492 }
 0x288   :  { %v1498_v30 = vmul.f32 %v8493_v29, %v8491_v28  ;;  %v9465_v28 = vld [vmem:[#allocation6 + $0xa4] ss:$16 sps:$4 sm:$0xff]   ;;  %v9467_v29 = vld [vmem:[#allocation6 + $0xac] ss:$16 sps:$4 sm:$0xff]  }
 0x289   :  { %10994 = vst [vmem:[#allocation25_spill] sm:$0xff] %v9465_v28  ;;  %10995 = vst [vmem:[#allocation26_spill] sm:$0xff] %v9467_v29 }
 0x28a   :  { %v9311_v38 = vpack.c.bf16 %v1498_v30, %v1498_v30  ;;  %v9469_v30 = vld [vmem:[#allocation6 + $0xa0] ss:$16 sps:$4 sm:$0xff]  }
 0x28b   :  { %10996 = vst [vmem:[#allocation27_spill] sm:$0xff] %v9469_v30 }
 0x28c   :  { %1918 = vmatmul.mubr.bf16.vlgmr.msra.gmra.mrb[12].mxu0 %v9311_v38  ;;  %1959 = vmatmul.mubr.bf16.vlgmr.msra.gmra.mrb[44].mxu1 %v9311_v38 }
 0x28d   :  { %2189 = vmatpush1.bf16.msra.mxu0 %v9307_v36  ;;  %2230 = vmatpush1.bf16.msra.mxu1 %v9309_v32 }
 0x28e   :  { %2190 = vmatprep.subr.bf16.mxu0 %v9313_v46  ;;  %2231 = vmatprep.subr.bf16.mxu1 %v9315_v39 }
 0x28f   :  { %2220 = vmatprep.mubr.bf16.mxu0 %v10947_v41  ;;  %2261 = vmatprep.mubr.bf16.mxu1 %v10947_v41 }
 0x291   :  { %2191 = vmatpush1.bf16.msra.mxu0 %v9321_v50  ;;  %2232 = vmatpush1.bf16.msra.mxu1 %v9323_v35 }
 0x292   :  { %2192 = vmatprep.subr.bf16.mxu0 %v9327_v34  ;;  %2233 = vmatprep.subr.bf16.mxu1 %v9329_v51 }
 0x295   :  { %2193 = vmatpush1.bf16.msra.mxu0 %v9335_v31  ;;  %2234 = vmatpush1.bf16.msra.mxu1 %v9337_v49 }
 0x296   :  { %2194 = vmatprep.subr.bf16.mxu0 %v9341_v45  ;;  %2235 = vmatprep.subr.bf16.mxu1 %v9343_v52 }
 0x299   :  { %2195 = vmatpush1.bf16.msra.mxu0 %v9347_v37  ;;  %2236 = vmatpush1.bf16.msra.mxu1 %v9349_v40 }
 0x29a   :  { %2196 = vmatprep.subr.bf16.mxu0 %v9353_v0  ;;  %2237 = vmatprep.subr.bf16.mxu1 %v9355_v47 }
 0x29d   :  { %2197 = vmatpush1.bf16.msra.mxu0 %v9359_v48  ;;  %2238 = vmatpush1.bf16.msra.mxu1 %v9361_v33 }
 0x29e   :  { %2198 = vmatprep.subr.bf16.mxu0 %v9365_v53  ;;  %2239 = vmatprep.subr.bf16.mxu1 %v9367_v54 }
 0x2a1   :  { %2199 = vmatpush1.bf16.msra.mxu0 %v9371_v55  ;;  %2240 = vmatpush1.bf16.msra.mxu1 %v9373_v56 }
 0x2a2   :  { %2200 = vmatprep.subr.bf16.mxu0 %v9377_v57  ;;  %2241 = vmatprep.subr.bf16.mxu1 %v9379_v58 }
 0x2a5   :  { %2201 = vmatpush1.bf16.msra.mxu0 %v9383_v59  ;;  %2242 = vmatpush1.bf16.msra.mxu1 %v9385_v60 }
 0x2a6   :  { %2202 = vmatprep.subr.bf16.mxu0 %v9389_v61  ;;  %2243 = vmatprep.subr.bf16.mxu1 %v9391_v62 }
 0x2a9   :  { %2203 = vmatpush1.bf16.msra.mxu0 %v9395_v63  ;;  %2244 = vmatpush1.bf16.msra.mxu1 %v9397_v1 }
 0x2aa   :  { %2684 = vmatprep.subr.bf16.mxu0 %v9405_v2  ;;  %2725 = vmatprep.subr.bf16.mxu1 %v9407_v3 }
 0x2ac   :  { %2221 = vmatmul.mubr.bf16.vlgmr.msra.gmra.mrb[16].mxu0 %v9311_v38  ;;  %2262 = vmatmul.mubr.bf16.vlgmr.msra.gmra.mrb[48].mxu1 %v9311_v38  ;;  %v9471_v38 = vld [vmem:[#allocation6 + $0xa8] ss:$16 sps:$4 sm:$0xff]  }
 0x2ad   :  { %2685 = vmatpush1.bf16.msra.mxu0 %v9409_v4  ;;  %2726 = vmatpush1.bf16.msra.mxu1 %v9411_v5  ;;  %10997 = vst [vmem:[#allocation28_spill] sm:$0xff] %v9471_v38 }
 0x2ae   :  { %2686 = vmatprep.subr.bf16.mxu0 %v9417_v6  ;;  %2727 = vmatprep.subr.bf16.mxu1 %v9419_v7 }
 0x2b1   :  { %2687 = vmatpush1.bf16.msra.mxu0 %v9421_v8  ;;  %2728 = vmatpush1.bf16.msra.mxu1 %v9423_v9 }
 0x2b2   :  { %2688 = vmatprep.subr.bf16.mxu0 %v9429_v11  ;;  %2729 = vmatprep.subr.bf16.mxu1 %v9431_v12 }
 0x2b5   :  { %2689 = vmatpush1.bf16.msra.mxu0 %v9433_v15  ;;  %2730 = vmatpush1.bf16.msra.mxu1 %v9435_v16 }
 0x2b6   :  { %2690 = vmatprep.subr.bf16.mxu0 %v9441_v18  ;;  %2731 = vmatprep.subr.bf16.mxu1 %v9443_v20 }
 0x2b9   :  { %2691 = vmatpush1.bf16.msra.mxu0 %v9445_v21  ;;  %2732 = vmatpush1.bf16.msra.mxu1 %v9447_v22 }
 0x2ba   :  { %2692 = vmatprep.subr.bf16.mxu0 %v9453_v23  ;;  %2733 = vmatprep.subr.bf16.mxu1 %v9455_v24  ;;  %v9483_v24 = vld [vmem:[#allocation6 + $0xc8] ss:$16 sps:$4 sm:$0xff]   ;;  %v9559_v23 = vld [vmem:[#allocation6 + $0x1a4] ss:$16 sps:$4 sm:$0xff]  }
 0x2bb   :  { %11001 = vst [vmem:[#allocation32_spill] sm:$0xff] %v9483_v24  ;;  %11026 = vst [vmem:[#allocation81_spill] sm:$0xff] %v9559_v23 }
 0x2bd   :  { %2693 = vmatpush1.bf16.msra.mxu0 %v9457_v25  ;;  %2734 = vmatpush1.bf16.msra.mxu1 %v9459_v26  ;;  %v9479_v25 = vld [vmem:[#allocation6 + $0xcc] ss:$16 sps:$4 sm:$0xff]   ;;  %v9481_v26 = vld [vmem:[#allocation6 + $0xc0] ss:$16 sps:$4 sm:$0xff]  }
 0x2be   :  { %2694 = vmatprep.subr.bf16.mxu0 %v9465_v28  ;;  %2735 = vmatprep.subr.bf16.mxu1 %v9467_v29  ;;  %10999 = vst [vmem:[#allocation30_spill] sm:$0xff] %v9479_v25  ;;  %11000 = vst [vmem:[#allocation31_spill] sm:$0xff] %v9481_v26  ;;  %v9489_v29 = vld [vmem:[#allocation6 + $0xe4] ss:$16 sps:$4 sm:$0xff]   ;;  %v9495_v28 = vld [vmem:[#allocation6 + $0xe8] ss:$16 sps:$4 sm:$0xff]  }
 0x2bf   :  { %11002 = vst [vmem:[#allocation33_spill] sm:$0xff] %v9489_v29  ;;  %11005 = vst [vmem:[#allocation48_spill] sm:$0xff] %v9495_v28 }
 0x2c1   :  { %2695 = vmatpush1.bf16.msra.mxu0 %v9469_v30  ;;  %2736 = vmatpush1.bf16.msra.mxu1 %v9471_v38  ;;  %v9491_v30 = vld [vmem:[#allocation6 + $0xec] ss:$16 sps:$4 sm:$0xff]   ;;  %v9493_v38 = vld [vmem:[#allocation6 + $0xe0] ss:$16 sps:$4 sm:$0xff]  }
 0x2c2   :  { %2696 = vmatprep.subr.bf16.mxu0 %v9477_v10  ;;  %2737 = vmatprep.subr.bf16.mxu1 %v9479_v25  ;;  %11003 = vst [vmem:[#allocation47_spill] sm:$0xff] %v9491_v30  ;;  %11004 = vst [vmem:[#allocation34_spill] sm:$0xff] %v9493_v38  ;;  %v9501_v25 = vld [vmem:[#allocation6 + $0x104] ss:$16 sps:$4 sm:$0xff]   ;;  %v9507_v10 = vld [vmem:[#allocation6 + $0x108] ss:$16 sps:$4 sm:$0xff]  }
 0x2c3   :  { %11006 = vst [vmem:[#allocation61_spill] sm:$0xff] %v9501_v25  ;;  %11009 = vst [vmem:[#allocation64_spill] sm:$0xff] %v9507_v10 }
 0x2c5   :  { %2697 = vmatpush1.bf16.msra.mxu0 %v9481_v26  ;;  %2738 = vmatpush1.bf16.msra.mxu1 %v9483_v24  ;;  %v9503_v26 = vld [vmem:[#allocation6 + $0x10c] ss:$16 sps:$4 sm:$0xff]   ;;  %v9505_v24 = vld [vmem:[#allocation6 + $0x100] ss:$16 sps:$4 sm:$0xff]  }
 0x2c6   :  { %2698 = vmatprep.subr.bf16.mxu0 %v9489_v29  ;;  %2739 = vmatprep.subr.bf16.mxu1 %v9491_v30  ;;  %11007 = vst [vmem:[#allocation62_spill] sm:$0xff] %v9503_v26  ;;  %11008 = vst [vmem:[#allocation63_spill] sm:$0xff] %v9505_v24  ;;  %v9513_v30 = vld [vmem:[#allocation6 + $0x124] ss:$16 sps:$4 sm:$0xff]   ;;  %v9519_v29 = vld [vmem:[#allocation6 + $0x128] ss:$16 sps:$4 sm:$0xff]  }
 0x2c7   :  { %11010 = vst [vmem:[#allocation65_spill] sm:$0xff] %v9513_v30  ;;  %11013 = vst [vmem:[#allocation68_spill] sm:$0xff] %v9519_v29 }
 0x2c9   :  { %2699 = vmatpush1.bf16.msra.mxu0 %v9493_v38  ;;  %2740 = vmatpush1.bf16.msra.mxu1 %v9495_v28  ;;  %v9515_v38 = vld [vmem:[#allocation6 + $0x12c] ss:$16 sps:$4 sm:$0xff]   ;;  %v9517_v28 = vld [vmem:[#allocation6 + $0x120] ss:$16 sps:$4 sm:$0xff]  }
 0x2ca   :  { %2700 = vmatprep.subr.bf16.mxu0 %v9501_v25  ;;  %2741 = vmatprep.subr.bf16.mxu1 %v9503_v26  ;;  %11011 = vst [vmem:[#allocation66_spill] sm:$0xff] %v9515_v38  ;;  %11012 = vst [vmem:[#allocation67_spill] sm:$0xff] %v9517_v28  ;;  %v9525_v26 = vld [vmem:[#allocation6 + $0x144] ss:$16 sps:$4 sm:$0xff]   ;;  %v9531_v25 = vld [vmem:[#allocation6 + $0x148] ss:$16 sps:$4 sm:$0xff]  }
 0x2cb   :  { %11014 = vst [vmem:[#allocation69_spill] sm:$0xff] %v9525_v26  ;;  %11017 = vst [vmem:[#allocation72_spill] sm:$0xff] %v9531_v25 }
 0x2cd   :  { %2701 = vmatpush1.bf16.msra.mxu0 %v9505_v24  ;;  %2742 = vmatpush1.bf16.msra.mxu1 %v9507_v10  ;;  %v9527_v24 = vld [vmem:[#allocation6 + $0x14c] ss:$16 sps:$4 sm:$0xff]   ;;  %v9529_v10 = vld [vmem:[#allocation6 + $0x140] ss:$16 sps:$4 sm:$0xff]  }
 0x2ce   :  { %2702 = vmatprep.subr.bf16.mxu0 %v9513_v30  ;;  %2743 = vmatprep.subr.bf16.mxu1 %v9515_v38  ;;  %11015 = vst [vmem:[#allocation70_spill] sm:$0xff] %v9527_v24  ;;  %11016 = vst [vmem:[#allocation71_spill] sm:$0xff] %v9529_v10  ;;  %v9537_v38 = vld [vmem:[#allocation6 + $0x164] ss:$16 sps:$4 sm:$0xff]   ;;  %v9543_v30 = vld [vmem:[#allocation6 + $0x168] ss:$16 sps:$4 sm:$0xff]  }
 0x2cf   :  { %11018 = vst [vmem:[#allocation73_spill] sm:$0xff] %v9537_v38  ;;  %11021 = vst [vmem:[#allocation76_spill] sm:$0xff] %v9543_v30 }
 0x2d1   :  { %2703 = vmatpush1.bf16.msra.mxu0 %v9517_v28  ;;  %2744 = vmatpush1.bf16.msra.mxu1 %v9519_v29  ;;  %v9539_v28 = vld [vmem:[#allocation6 + $0x16c] ss:$16 sps:$4 sm:$0xff]   ;;  %v9541_v29 = vld [vmem:[#allocation6 + $0x160] ss:$16 sps:$4 sm:$0xff]  }
 0x2d2   :  { %2704 = vmatprep.subr.bf16.mxu0 %v9525_v26  ;;  %2745 = vmatprep.subr.bf16.mxu1 %v9527_v24  ;;  %11019 = vst [vmem:[#allocation74_spill] sm:$0xff] %v9539_v28  ;;  %11020 = vst [vmem:[#allocation75_spill] sm:$0xff] %v9541_v29  ;;  %v9549_v24 = vld [vmem:[#allocation6 + $0x184] ss:$16 sps:$4 sm:$0xff]   ;;  %v9555_v26 = vld [vmem:[#allocation6 + $0x188] ss:$16 sps:$4 sm:$0xff]  }
 0x2d3   :  { %11022 = vst [vmem:[#allocation77_spill] sm:$0xff] %v9549_v24  ;;  %11025 = vst [vmem:[#allocation80_spill] sm:$0xff] %v9555_v26 }
 0x2d5   :  { %2705 = vmatpush1.bf16.msra.mxu0 %v9529_v10  ;;  %2746 = vmatpush1.bf16.msra.mxu1 %v9531_v25  ;;  %v9551_v10 = vld [vmem:[#allocation6 + $0x18c] ss:$16 sps:$4 sm:$0xff]   ;;  %v9553_v25 = vld [vmem:[#allocation6 + $0x180] ss:$16 sps:$4 sm:$0xff]  }
 0x2d6   :  { %2706 = vmatprep.subr.bf16.mxu0 %v9537_v38  ;;  %2747 = vmatprep.subr.bf16.mxu1 %v9539_v28  ;;  %11023 = vst [vmem:[#allocation78_spill] sm:$0xff] %v9551_v10  ;;  %11024 = vst [vmem:[#allocation79_spill] sm:$0xff] %v9553_v25  ;;  %v9561_v38 = vld [vmem:[#allocation6 + $0x1ac] ss:$16 sps:$4 sm:$0xff]   ;;  %v9571_v28 = vld [vmem:[#allocation6 + $0x1c4] ss:$16 sps:$4 sm:$0xff]  }
 0x2d7   :  { %11027 = vst [vmem:[#allocation82_spill] sm:$0xff] %v9561_v38  ;;  %11030 = vst [vmem:[#allocation85_spill] sm:$0xff] %v9571_v28 }
 0x2d9   :  { %2707 = vmatpush1.bf16.msra.mxu0 %v9541_v29  ;;  %2748 = vmatpush1.bf16.msra.mxu1 %v9543_v30  ;;  %v9565_v30 = vld [vmem:[#allocation6 + $0x1a0] ss:$16 sps:$4 sm:$0xff]   ;;  %v9567_v29 = vld [vmem:[#allocation6 + $0x1a8] ss:$16 sps:$4 sm:$0xff]  }
 0x2da   :  { %2708 = vmatprep.subr.bf16.mxu0 %v9549_v24  ;;  %2749 = vmatprep.subr.bf16.mxu1 %v9551_v10  ;;  %11028 = vst [vmem:[#allocation83_spill] sm:$0xff] %v9565_v30  ;;  %11029 = vst [vmem:[#allocation84_spill] sm:$0xff] %v9567_v29  ;;  %v9573_v24 = vld [vmem:[#allocation6 + $0x1cc] ss:$16 sps:$4 sm:$0xff]   ;;  %v9577_v10 = vld [vmem:[#allocation6 + $0x1c0] ss:$16 sps:$4 sm:$0xff]  }
 0x2db   :  { %11031 = vst [vmem:[#allocation86_spill] sm:$0xff] %v9573_v24  ;;  %11032 = vst [vmem:[#allocation87_spill] sm:$0xff] %v9577_v10 }
 0x2dd   :  { %2709 = vmatpush1.bf16.msra.mxu0 %v9553_v25  ;;  %2750 = vmatpush1.bf16.msra.mxu1 %v9555_v26  ;;  %v9579_v25 = vld [vmem:[#allocation6 + $0x1c8] ss:$16 sps:$4 sm:$0xff]   ;;  %v9583_v26 = vld [vmem:[#allocation6 + $0x1e4] ss:$16 sps:$4 sm:$0xff]  }
 0x2de   :  { %2710 = vmatprep.subr.bf16.mxu0 %v9559_v23  ;;  %2751 = vmatprep.subr.bf16.mxu1 %v9561_v38  ;;  %11033 = vst [vmem:[#allocation88_spill] sm:$0xff] %v9579_v25  ;;  %11034 = vst [vmem:[#allocation89_spill] sm:$0xff] %v9583_v26  ;;  %v9585_v23 = vld [vmem:[#allocation6 + $0x1ec] ss:$16 sps:$4 sm:$0xff]   ;;  %v9589_v38 = vld [vmem:[#allocation6 + $0x1e0] ss:$16 sps:$4 sm:$0xff]  }
 0x2df   :  { %11035 = vst [vmem:[#allocation90_spill] sm:$0xff] %v9585_v23  ;;  %11036 = vst [vmem:[#allocation91_spill] sm:$0xff] %v9589_v38 }
 0x2e1   :  { %2711 = vmatpush1.bf16.msra.mxu0 %v9565_v30  ;;  %2752 = vmatpush1.bf16.msra.mxu1 %v9567_v29  ;;  %v9591_v30 = vld [vmem:[#allocation6 + $0x1e8] ss:$16 sps:$4 sm:$0xff]  }
 0x2e2   :  { %2712 = vmatprep.subr.bf16.mxu0 %v9571_v28  ;;  %2753 = vmatprep.subr.bf16.mxu1 %v9573_v24  ;;  %11037 = vst [vmem:[#allocation92_spill] sm:$0xff] %v9591_v30 }
 0x2e5   :  { %2713 = vmatpush1.bf16.msra.mxu0 %v9577_v10  ;;  %2754 = vmatpush1.bf16.msra.mxu1 %v9579_v25 }
 0x2e6   :  { %2714 = vmatprep.subr.bf16.mxu0 %v9583_v26  ;;  %2755 = vmatprep.subr.bf16.mxu1 %v9585_v23 }
 0x2e9   :  { %2715 = vmatpush1.bf16.msra.mxu0 %v9589_v38  ;;  %2756 = vmatpush1.bf16.msra.mxu1 %v9591_v30 }
 0x2ea   :  { %2987 = vmatprep.subr.bf16.mxu0 %v9263_v13  ;;  %3028 = vmatprep.subr.bf16.mxu1 %v9265_v14 }
 0x35f   :  { %v1919_v24 = vpop.f32.mrb[12].mxu0  ;;  %v1960_v10 = vpop.f32.mrb[44].mxu1 }
 0x360   :  { %v1920_v25 = vadd.f32 %v1919_v24, %v9274_v17  ;;  %v1921_v28 = vpop.f32.mrb[13].mxu0  ;;  %v1962_v29 = vpop.f32.mrb[45].mxu1  ;;  %v1961_v14 = vadd.f32 %v1960_v10, %v9289_v43  ;;  %v11041_v43 = vld [vmem:[#allocation50_spill] sm:$0xff] }
 0x361   :  { %v1922_v22 = vadd.f32 %v1921_v28, %v9278_v19  ;;  %v1923_v21 = vpop.f32.mrb[14].mxu0  ;;  %v1964_v26 = vpop.f32.mrb[46].mxu1  ;;  %v1963_v13 = vadd.f32 %v1962_v29, %v9284_v44 }
 0x362   :  { %v7176_v20 = vmul.f32 -1.442695, %v1920_v25  ;;  %v1924_v23 = vpop.f32.mrb[15].mxu0  ;;  %v1965_v18 = vpop.f32.mrb[47].mxu1 }
 0x363   :  { %v7177_v38 = vmul.f32 -1.442695, %v1922_v22  ;;  %v7178_v30 = vmul.f32 -1.442695, %v1963_v13 }
 0x364   :  { %8494 = vpow2.f32 %v7176_v20 }
 0x365   :  { %8496 = vpow2.f32 %v7177_v38  ;;  %v11038_v38 = vld [vmem:[#allocation35_spill] sm:$0xff] }
 0x366   :  { %8498 = vpow2.f32 %v7178_v30  ;;  %v11039_v30 = vld [vmem:[#allocation49_spill] sm:$0xff] }
 0x367   :  { %8500 = vtanh.f32 %v1961_v14 }
 0x36e   :  { %v8495_v16 = vpop.eup %8494 }
 0x36f   :  { %v8497_v15 = vpop.eup %8496  ;;  %v1973_v24 = vadd.f32 1.0, %v8495_v16 }
 0x370   :  { %v1974_v17 = vadd.f32 1.0, %v8497_v15  ;;  %v8499_v21 = vpop.eup %8498 }
 0x371   :  { %8502 = vrcp.f32 %v1973_v24  ;;  %v8501_v25 = vpop.eup %8500  ;;  %v1983_v20 = vadd.f32 1.0, %v8499_v21 }
 0x372   :  { %8504 = vrcp.f32 %v1974_v17  ;;  %v11040_v17 = vld [vmem:[#allocation36_spill] sm:$0xff] }
 0x373   :  { %8506 = vrcp.f32 %v1983_v20 }
 0x37b   :  { %v8503_v23 = vpop.eup %8502 }
 0x37c   :  { %v8505_v18 = vpop.eup %8504  ;;  %v1987_v22 = vmul.f32 %v8503_v23, %v8501_v25 }
 0x37d   :  { %v1986_v26 = vmul.f32 %v8505_v18, %v9292_v42 }
 0x37f   :  { %v9604_v28 = vadd.f32 %v1987_v22, %v1986_v26  ;;  %v2222_v29 = vpop.f32.mrb[16].mxu0  ;;  %v2263_v10 = vpop.f32.mrb[48].mxu1 }
 0x380   :  { %v2270_v16 = vadd.f32 %v2222_v29, %v11038_v38  ;;  %v2272_v13 = vadd.f32 %v2263_v10, %v11039_v30  ;;  %v2224_v15 = vpop.f32.mrb[17].mxu0  ;;  %v2265_v14 = vpop.f32.mrb[49].mxu1 }
 0x381   :  { %v2271_v24 = vadd.f32 %v2224_v15, %v11040_v17  ;;  %v2273_v44 = vadd.f32 %v2265_v14, %v11041_v43  ;;  %v2226_v19 = vpop.f32.mrb[18].mxu0  ;;  %v2267_v25 = vpop.f32.mrb[50].mxu1  ;;  %8508 = vtanh.f32 %v9604_v28 }
 0x382   :  { %v7211_v42 = vmul.f32 -1.442695, %v2270_v16  ;;  %v2227_v21 = vpop.f32.mrb[19].mxu0  ;;  %v2268_v23 = vpop.f32.mrb[51].mxu1 }
 0x383   :  { %v7212_v18 = vmul.f32 -1.442695, %v2271_v24  ;;  %v8507_v22 = vpop.eup %8506  ;;  %v7213_v26 = vmul.f32 -1.442695, %v2273_v44 }
 0x384   :  { %8510 = vpow2.f32 %v7211_v42 }
 0x385   :  { %8512 = vpow2.f32 %v7212_v18 }
 0x386   :  { %8514 = vpow2.f32 %v7213_v26  ;;  %v11086_v26 = vld [vmem:[#allocation82_spill] sm:$0xff] }
 0x387   :  { %8516 = vtanh.f32 %v2272_v13 }
 0x38b   :  { %v8509_v20 = vpop.eup %8508 }
 0x38c   :  { %v9611_v29 = vmul.f32 %v8509_v20, %v8507_v22  ;;  %v11084_v22 = vld [vmem:[#allocation80_spill] sm:$0xff]  ;;  %v11085_v20 = vld [vmem:[#allocation81_spill] sm:$0xff] }
 0x38e   :  { %11042 = vst [vmem:[#allocation35_spill] sm:$0xff] %v9611_v29  ;;  %v8511_v10 = vpop.eup %8510  ;;  %v2299_v38 = vpack.c.bf16 %v9611_v29, %v9611_v29  ;;  %v9911_v29 = vld [vmem:[#allocation6 + $0xc4] ss:$16 sps:$4 sm:$0xff]  }
 0x38f   :  { %v8513_v43 = vpop.eup %8512  ;;  %v2280_v19 = vadd.f32 1.0, %v8511_v10  ;;  %v11087_v10 = vld [vmem:[#allocation83_spill] sm:$0xff] }
 0x390   :  { %v2281_v30 = vadd.f32 1.0, %v8513_v43  ;;  %2716 = vmatprep.mubr.bf16.mxu0 %v2299_v38  ;;  %2757 = vmatprep.mubr.bf16.mxu1 %v2299_v38  ;;  %v8515_v16 = vpop.eup %8514  ;;  %v11088_v38 = vld [vmem:[#allocation84_spill] sm:$0xff]  ;;  %v11089_v43 = vld [vmem:[#allocation85_spill] sm:$0xff] }
 0x391   :  { %8518 = vrcp.f32 %v2280_v19  ;;  %v8517_v15 = vpop.eup %8516  ;;  %v2290_v24 = vadd.f32 1.0, %v8515_v16  ;;  %v11090_v19 = vld [vmem:[#allocation86_spill] sm:$0xff]  ;;  %v11092_v16 = vld [vmem:[#allocation88_spill] sm:$0xff] }
 0x392   :  { %8520 = vrcp.f32 %v2281_v30  ;;  %v11091_v30 = vld [vmem:[#allocation87_spill] sm:$0xff] }
 0x393   :  { %8522 = vrcp.f32 %v2290_v24  ;;  %v9715_v24 = vld [vmem:[#allocation4 + $0x4] ss:$16 sps:$4 sm:$0xff]  }
 0x39b   :  { %v8519_v14 = vpop.eup %8518 }
 0x39c   :  { %v8521_v17 = vpop.eup %8520  ;;  %v2294_v44 = vmul.f32 %v8519_v14, %v8517_v15  ;;  %v11093_v15 = vld [vmem:[#allocation89_spill] sm:$0xff]  ;;  %v11094_v14 = vld [vmem:[#allocation90_spill] sm:$0xff] }
 0x39d   :  { %v2293_v25 = vmul.f32 %v8521_v17, %v9304_v27  ;;  %v8523_v21 = vpop.eup %8522  ;;  %v11043_v27 = vld [vmem:[#allocation15_spill] sm:$0xff] }
 0x39e   :  { %v11095_v17 = vld [vmem:[#allocation91_spill] sm:$0xff] }
 0x39f   :  { %v9616_v42 = vadd.f32 %v2294_v44, %v2293_v25  ;;  %v11096_v44 = vld [vmem:[#allocation92_spill] sm:$0xff]  ;;  %v9717_v25 = vld [vmem:[#allocation4 + $0xc] ss:$16 sps:$4 sm:$0xff]  }
 0x3a1   :  { %8524 = vtanh.f32 %v9616_v42 }
 0x3ab   :  { %v8525_v13 = vpop.eup %8524 }
 0x3ac   :  { %v2297_v23 = vmul.f32 %v8525_v13, %v8523_v21 }
 0x3ae   :  { %v2298_v18 = vpack.c.bf16 %v2297_v23, %v2297_v23  ;;  %v11097_v23 = vld [vmem:[#allocation10_spill] sm:$0xff] }
 0x3b0   :  { %2717 = vmatmul.mubr.bf16.vlgmr.msra.gmra.mrb[20].mxu0 %v2298_v18  ;;  %2758 = vmatmul.mubr.bf16.vlgmr.msra.gmra.mrb[52].mxu1 %v2298_v18 }
 0x3b1   :  { %2988 = vmatpush1.bf16.msra.mxu0 %v9307_v36  ;;  %3029 = vmatpush1.bf16.msra.mxu1 %v9309_v32  ;;  %v11044_v36 = vld [vmem:[#allocation16_spill] sm:$0xff]  ;;  %v11045_v32 = vld [vmem:[#allocation17_spill] sm:$0xff] }
 0x3b2   :  { %2989 = vmatprep.subr.bf16.mxu0 %v9313_v46  ;;  %3030 = vmatprep.subr.bf16.mxu1 %v9315_v39  ;;  %v11046_v46 = vld [vmem:[#allocation18_spill] sm:$0xff]  ;;  %v11047_v39 = vld [vmem:[#allocation19_spill] sm:$0xff] }
 0x3b3   :  { %3019 = vmatprep.mubr.bf16.mxu0 %v10947_v41  ;;  %3060 = vmatprep.mubr.bf16.mxu1 %v10947_v41 }
 0x3b5   :  { %2990 = vmatpush1.bf16.msra.mxu0 %v9321_v50  ;;  %3031 = vmatpush1.bf16.msra.mxu1 %v9323_v35  ;;  %v11048_v50 = vld [vmem:[#allocation20_spill] sm:$0xff]  ;;  %v11049_v35 = vld [vmem:[#allocation22_spill] sm:$0xff] }
 0x3b6   :  { %2991 = vmatprep.subr.bf16.mxu0 %v9327_v34  ;;  %3032 = vmatprep.subr.bf16.mxu1 %v9329_v51  ;;  %v11050_v34 = vld [vmem:[#allocation24_spill] sm:$0xff]  ;;  %v11051_v51 = vld [vmem:[#allocation21_spill] sm:$0xff] }
 0x3b9   :  { %2992 = vmatpush1.bf16.msra.mxu0 %v9335_v31  ;;  %3033 = vmatpush1.bf16.msra.mxu1 %v9337_v49  ;;  %v11052_v31 = vld [vmem:[#allocation23_spill] sm:$0xff]  ;;  %v11053_v49 = vld [vmem:[#allocation25_spill] sm:$0xff] }
 0x3ba   :  { %2993 = vmatprep.subr.bf16.mxu0 %v9341_v45  ;;  %3034 = vmatprep.subr.bf16.mxu1 %v9343_v52  ;;  %v11054_v45 = vld [vmem:[#allocation26_spill] sm:$0xff]  ;;  %v11055_v52 = vld [vmem:[#allocation27_spill] sm:$0xff] }
 0x3bb   :  { %11120 = vst [vmem:[#allocation27_spill] sm:$0xff] %v9911_v29 }
 0x3bd   :  { %2994 = vmatpush1.bf16.msra.mxu0 %v9347_v37  ;;  %3035 = vmatpush1.bf16.msra.mxu1 %v9349_v40  ;;  %v11056_v37 = vld [vmem:[#allocation28_spill] sm:$0xff]  ;;  %v11057_v40 = vld [vmem:[#allocation29_spill] sm:$0xff] }
 0x3be   :  { %2995 = vmatprep.subr.bf16.mxu0 %v9353_v0  ;;  %3036 = vmatprep.subr.bf16.mxu1 %v9355_v47  ;;  %v11058_v0 = vld [vmem:[#allocation30_spill] sm:$0xff]  ;;  %v11059_v47 = vld [vmem:[#allocation31_spill] sm:$0xff] }
 0x3c1   :  { %2996 = vmatpush1.bf16.msra.mxu0 %v9359_v48  ;;  %3037 = vmatpush1.bf16.msra.mxu1 %v9361_v33  ;;  %v11060_v48 = vld [vmem:[#allocation32_spill] sm:$0xff]  ;;  %v11061_v33 = vld [vmem:[#allocation33_spill] sm:$0xff] }
 0x3c2   :  { %2997 = vmatprep.subr.bf16.mxu0 %v9365_v53  ;;  %3038 = vmatprep.subr.bf16.mxu1 %v9367_v54  ;;  %v11062_v53 = vld [vmem:[#allocation47_spill] sm:$0xff]  ;;  %v11063_v54 = vld [vmem:[#allocation34_spill] sm:$0xff] }
 0x3c5   :  { %2998 = vmatpush1.bf16.msra.mxu0 %v9371_v55  ;;  %3039 = vmatpush1.bf16.msra.mxu1 %v9373_v56  ;;  %v11064_v55 = vld [vmem:[#allocation48_spill] sm:$0xff]  ;;  %v11065_v56 = vld [vmem:[#allocation61_spill] sm:$0xff] }
 0x3c6   :  { %2999 = vmatprep.subr.bf16.mxu0 %v9377_v57  ;;  %3040 = vmatprep.subr.bf16.mxu1 %v9379_v58  ;;  %v11066_v57 = vld [vmem:[#allocation62_spill] sm:$0xff]  ;;  %v11067_v58 = vld [vmem:[#allocation63_spill] sm:$0xff] }
 0x3c9   :  { %3000 = vmatpush1.bf16.msra.mxu0 %v9383_v59  ;;  %3041 = vmatpush1.bf16.msra.mxu1 %v9385_v60  ;;  %v11068_v59 = vld [vmem:[#allocation64_spill] sm:$0xff]  ;;  %v11069_v60 = vld [vmem:[#allocation65_spill] sm:$0xff] }
 0x3ca   :  { %3001 = vmatprep.subr.bf16.mxu0 %v9389_v61  ;;  %3042 = vmatprep.subr.bf16.mxu1 %v9391_v62  ;;  %v11070_v61 = vld [vmem:[#allocation66_spill] sm:$0xff]  ;;  %v11071_v62 = vld [vmem:[#allocation67_spill] sm:$0xff] }
 0x3cd   :  { %3002 = vmatpush1.bf16.msra.mxu0 %v9395_v63  ;;  %3043 = vmatpush1.bf16.msra.mxu1 %v9397_v1  ;;  %v11072_v63 = vld [vmem:[#allocation68_spill] sm:$0xff]  ;;  %v11073_v1 = vld [vmem:[#allocation69_spill] sm:$0xff] }
 0x3ce   :  { %3483 = vmatprep.subr.bf16.mxu0 %v9405_v2  ;;  %3524 = vmatprep.subr.bf16.mxu1 %v9407_v3  ;;  %v11074_v2 = vld [vmem:[#allocation70_spill] sm:$0xff]  ;;  %v11075_v3 = vld [vmem:[#allocation71_spill] sm:$0xff] }
 0x3d0   :  { %3020 = vmatmul.mubr.bf16.vlgmr.msra.gmra.mrb[24].mxu0 %v2298_v18  ;;  %3061 = vmatmul.mubr.bf16.vlgmr.msra.gmra.mrb[56].mxu1 %v2298_v18 }
 0x3d1   :  { %3484 = vmatpush1.bf16.msra.mxu0 %v9409_v4  ;;  %3525 = vmatpush1.bf16.msra.mxu1 %v9411_v5  ;;  %v11076_v4 = vld [vmem:[#allocation72_spill] sm:$0xff]  ;;  %v11077_v5 = vld [vmem:[#allocation73_spill] sm:$0xff] }
 0x3d2   :  { %3485 = vmatprep.subr.bf16.mxu0 %v9417_v6  ;;  %3526 = vmatprep.subr.bf16.mxu1 %v9419_v7  ;;  %v11078_v6 = vld [vmem:[#allocation74_spill] sm:$0xff]  ;;  %v11079_v7 = vld [vmem:[#allocation75_spill] sm:$0xff] }
 0x3d5   :  { %3486 = vmatpush1.bf16.msra.mxu0 %v9421_v8  ;;  %3527 = vmatpush1.bf16.msra.mxu1 %v9423_v9  ;;  %v11080_v8 = vld [vmem:[#allocation76_spill] sm:$0xff]  ;;  %v11081_v9 = vld [vmem:[#allocation77_spill] sm:$0xff] }
 0x3d6   :  { %3487 = vmatprep.subr.bf16.mxu0 %v9429_v11  ;;  %3528 = vmatprep.subr.bf16.mxu1 %v9431_v12  ;;  %v11082_v11 = vld [vmem:[#allocation78_spill] sm:$0xff]  ;;  %v11083_v12 = vld [vmem:[#allocation79_spill] sm:$0xff] }
 0x3d9   :  { %3488 = vmatpush1.bf16.msra.mxu0 %v11043_v27  ;;  %3529 = vmatpush1.bf16.msra.mxu1 %v11044_v36 }
 0x3da   :  { %3489 = vmatprep.subr.bf16.mxu0 %v11045_v32  ;;  %3530 = vmatprep.subr.bf16.mxu1 %v11046_v46  ;;  %v11098_v32 = vld [vmem:[#allocation11_spill] sm:$0xff] }
 0x3dd   :  { %3490 = vmatpush1.bf16.msra.mxu0 %v11047_v39  ;;  %3531 = vmatpush1.bf16.msra.mxu1 %v11048_v50 }
 0x3de   :  { %3491 = vmatprep.subr.bf16.mxu0 %v11049_v35  ;;  %3532 = vmatprep.subr.bf16.mxu1 %v11050_v34 }
 0x3e1   :  { %3492 = vmatpush1.bf16.msra.mxu0 %v11051_v51  ;;  %3533 = vmatpush1.bf16.msra.mxu1 %v11052_v31 }
 0x3e2   :  { %3493 = vmatprep.subr.bf16.mxu0 %v11053_v49  ;;  %3534 = vmatprep.subr.bf16.mxu1 %v11054_v45  ;;  %v11099_v49 = vld [vmem:[#allocation12_spill] sm:$0xff] }
 0x3e5   :  { %3494 = vmatpush1.bf16.msra.mxu0 %v11055_v52  ;;  %3535 = vmatpush1.bf16.msra.mxu1 %v11056_v37  ;;  %v11100_v37 = vld [vmem:[#allocation13_spill] sm:$0xff] }
 0x3e6   :  { %3495 = vmatprep.subr.bf16.mxu0 %v11057_v40  ;;  %3536 = vmatprep.subr.bf16.mxu1 %v11058_v0 }
 0x3e9   :  { %3496 = vmatpush1.bf16.msra.mxu0 %v11059_v47  ;;  %3537 = vmatpush1.bf16.msra.mxu1 %v11060_v48 }
 0x3ea   :  { %3497 = vmatprep.subr.bf16.mxu0 %v11061_v33  ;;  %3538 = vmatprep.subr.bf16.mxu1 %v11062_v53 }
 0x3ed   :  { %3498 = vmatpush1.bf16.msra.mxu0 %v11063_v54  ;;  %3539 = vmatpush1.bf16.msra.mxu1 %v11064_v55 }
 0x3ee   :  { %3499 = vmatprep.subr.bf16.mxu0 %v11065_v56  ;;  %3540 = vmatprep.subr.bf16.mxu1 %v11066_v57 }
 0x3f1   :  { %3500 = vmatpush1.bf16.msra.mxu0 %v11067_v58  ;;  %3541 = vmatpush1.bf16.msra.mxu1 %v11068_v59 }
 0x3f2   :  { %3501 = vmatprep.subr.bf16.mxu0 %v11069_v60  ;;  %3542 = vmatprep.subr.bf16.mxu1 %v11070_v61 }
 0x3f5   :  { %3502 = vmatpush1.bf16.msra.mxu0 %v11071_v62  ;;  %3543 = vmatpush1.bf16.msra.mxu1 %v11072_v63  ;;  %v11101_v63 = vld [vmem:[#allocation37_spill] sm:$0xff] }
 0x3f6   :  { %3503 = vmatprep.subr.bf16.mxu0 %v11073_v1  ;;  %3544 = vmatprep.subr.bf16.mxu1 %v11074_v2  ;;  %v11102_v2 = vld [vmem:[#allocation51_spill] sm:$0xff] }
 0x3f9   :  { %3504 = vmatpush1.bf16.msra.mxu0 %v11075_v3  ;;  %3545 = vmatpush1.bf16.msra.mxu1 %v11076_v4 }
 0x3fa   :  { %3505 = vmatprep.subr.bf16.mxu0 %v11077_v5  ;;  %3546 = vmatprep.subr.bf16.mxu1 %v11078_v6  ;;  %v11103_v6 = vld [vmem:[#allocation38_spill] sm:$0xff] }
 0x3fd   :  { %3506 = vmatpush1.bf16.msra.mxu0 %v11079_v7  ;;  %3547 = vmatpush1.bf16.msra.mxu1 %v11080_v8  ;;  %v11104_v8 = vld [vmem:[#allocation52_spill] sm:$0xff] }
 0x3fe   :  { %3507 = vmatprep.subr.bf16.mxu0 %v11081_v9  ;;  %3548 = vmatprep.subr.bf16.mxu1 %v11082_v11 }
 0x401   :  { %3508 = vmatpush1.bf16.msra.mxu0 %v11083_v12  ;;  %3549 = vmatpush1.bf16.msra.mxu1 %v11084_v22 }
 0x402   :  { %3509 = vmatprep.subr.bf16.mxu0 %v11085_v20  ;;  %3550 = vmatprep.subr.bf16.mxu1 %v11086_v26 }
 0x405   :  { %3510 = vmatpush1.bf16.msra.mxu0 %v11087_v10  ;;  %3551 = vmatpush1.bf16.msra.mxu1 %v11088_v38 }
 0x406   :  { %3511 = vmatprep.subr.bf16.mxu0 %v11089_v43  ;;  %3552 = vmatprep.subr.bf16.mxu1 %v11090_v19 }
 0x409   :  { %3512 = vmatpush1.bf16.msra.mxu0 %v11091_v30  ;;  %3553 = vmatpush1.bf16.msra.mxu1 %v11092_v16 }
 0x40a   :  { %3513 = vmatprep.subr.bf16.mxu0 %v11093_v15  ;;  %3554 = vmatprep.subr.bf16.mxu1 %v11094_v14 }
 0x40d   :  { %3514 = vmatpush1.bf16.msra.mxu0 %v11095_v17  ;;  %3555 = vmatpush1.bf16.msra.mxu1 %v11096_v44 }
 0x40e   :  { %3786 = vmatprep.subr.bf16.mxu0 %v9715_v24  ;;  %3827 = vmatprep.subr.bf16.mxu1 %v9717_v25 }
 0x483   :  { %v2718_v21 = vpop.f32.mrb[20].mxu0  ;;  %v2759_v13 = vpop.f32.mrb[52].mxu1 }
 0x484   :  { %v2719_v18 = vadd.f32 %v2718_v21, %v11097_v23  ;;  %v2720_v27 = vpop.f32.mrb[21].mxu0  ;;  %v2761_v36 = vpop.f32.mrb[53].mxu1  ;;  %v2760_v40 = vadd.f32 %v2759_v13, %v11100_v37 }
 0x485   :  { %v2721_v46 = vadd.f32 %v2720_v27, %v11098_v32  ;;  %v2722_v39 = vpop.f32.mrb[22].mxu0  ;;  %v2763_v50 = vpop.f32.mrb[54].mxu1  ;;  %v2762_v45 = vadd.f32 %v2761_v36, %v11099_v49 }
 0x486   :  { %v7278_v35 = vmul.f32 -1.442695, %v2719_v18  ;;  %v2723_v34 = vpop.f32.mrb[23].mxu0  ;;  %v2764_v51 = vpop.f32.mrb[55].mxu1 }
 0x487   :  { %v7279_v31 = vmul.f32 -1.442695, %v2721_v46  ;;  %v7280_v52 = vmul.f32 -1.442695, %v2762_v45  ;;  %v9741_v51 = vld [vmem:[#allocation4] ss:$16 sps:$4 sm:$0xff]  }
 0x488   :  { %8526 = vpow2.f32 %v7278_v35 }
 0x489   :  { %8528 = vpow2.f32 %v7279_v31  ;;  %v9743_v31 = vld [vmem:[#allocation4 + $0x8] ss:$16 sps:$4 sm:$0xff]  }
 0x48a   :  { %8530 = vpow2.f32 %v7280_v52  ;;  %v9747_v52 = vld [vmem:[#allocation4 + $0x24] ss:$16 sps:$4 sm:$0xff]  }
 0x48b   :  { %8532 = vtanh.f32 %v2760_v40  ;;  %v9749_v40 = vld [vmem:[#allocation4 + $0x2c] ss:$16 sps:$4 sm:$0xff]  }
 0x492   :  { %v8527_v0 = vpop.eup %8526 }
 0x493   :  { %v8529_v47 = vpop.eup %8528  ;;  %v2772_v48 = vadd.f32 1.0, %v8527_v0  ;;  %v9757_v0 = vld [vmem:[#allocation4 + $0x28] ss:$16 sps:$4 sm:$0xff]  }
 0x494   :  { %v2773_v33 = vadd.f32 1.0, %v8529_v47  ;;  %v8531_v53 = vpop.eup %8530  ;;  %v9761_v47 = vld [vmem:[#allocation4 + $0x44] ss:$16 sps:$4 sm:$0xff]  }
 0x495   :  { %8534 = vrcp.f32 %v2772_v48  ;;  %v8533_v54 = vpop.eup %8532  ;;  %v2782_v58 = vadd.f32 1.0, %v8531_v53  ;;  %v9763_v48 = vld [vmem:[#allocation4 + $0x4c] ss:$16 sps:$4 sm:$0xff]   ;;  %v9771_v53 = vld [vmem:[#allocation4 + $0x48] ss:$16 sps:$4 sm:$0xff]  }
 0x496   :  { %8536 = vrcp.f32 %v2773_v33  ;;  %v9769_v33 = vld [vmem:[#allocation4 + $0x40] ss:$16 sps:$4 sm:$0xff]  }
 0x497   :  { %8538 = vrcp.f32 %v2782_v58  ;;  %v9787_v58 = vld [vmem:[#allocation4 + $0x84] ss:$16 sps:$4 sm:$0xff]  }
 0x49f   :  { %v8535_v55 = vpop.eup %8534 }
 0x4a0   :  { %v8537_v56 = vpop.eup %8536  ;;  %v2786_v57 = vmul.f32 %v8535_v55, %v8533_v54  ;;  %v9775_v54 = vld [vmem:[#allocation4 + $0x64] ss:$16 sps:$4 sm:$0xff]   ;;  %v9777_v55 = vld [vmem:[#allocation4 + $0x6c] ss:$16 sps:$4 sm:$0xff]  }
 0x4a1   :  { %v2785_v59 = vmul.f32 %v8537_v56, %v9604_v28  ;;  %v8539_v10 = vpop.eup %8538  ;;  %v9781_v56 = vld [vmem:[#allocation4 + $0x60] ss:$16 sps:$4 sm:$0xff]  }
 0x4a3   :  { %v9726_v60 = vadd.f32 %v2786_v57, %v2785_v59  ;;  %v3021_v61 = vpop.f32.mrb[24].mxu0  ;;  %v3062_v62 = vpop.f32.mrb[56].mxu1  ;;  %v9783_v57 = vld [vmem:[#allocation4 + $0x68] ss:$16 sps:$4 sm:$0xff]   ;;  %v9789_v59 = vld [vmem:[#allocation4 + $0x8c] ss:$16 sps:$4 sm:$0xff]  }
 0x4a4   :  { %v3069_v1 = vadd.f32 %v3021_v61, %v11101_v63  ;;  %v3071_v3 = vadd.f32 %v3062_v62, %v11102_v2  ;;  %v3023_v4 = vpop.f32.mrb[25].mxu0  ;;  %v3064_v5 = vpop.f32.mrb[57].mxu1  ;;  %v9793_v61 = vld [vmem:[#allocation4 + $0x80] ss:$16 sps:$4 sm:$0xff]   ;;  %v9795_v62 = vld [vmem:[#allocation4 + $0x88] ss:$16 sps:$4 sm:$0xff]  }
 0x4a5   :  { %v3070_v7 = vadd.f32 %v3023_v4, %v11103_v6  ;;  %v3072_v9 = vadd.f32 %v3064_v5, %v11104_v8  ;;  %v3025_v11 = vpop.f32.mrb[26].mxu0  ;;  %v3066_v12 = vpop.f32.mrb[58].mxu1  ;;  %8540 = vtanh.f32 %v9726_v60  ;;  %v9799_v63 = vld [vmem:[#allocation4 + $0xa4] ss:$16 sps:$4 sm:$0xff]   ;;  %v9805_v2 = vld [vmem:[#allocation4 + $0xa0] ss:$16 sps:$4 sm:$0xff]  }
 0x4a6   :  { %v7313_v28 = vmul.f32 -1.442695, %v3069_v1  ;;  %v3026_v22 = vpop.f32.mrb[27].mxu0  ;;  %v3067_v20 = vpop.f32.mrb[59].mxu1  ;;  %v9801_v1 = vld [vmem:[#allocation4 + $0xac] ss:$16 sps:$4 sm:$0xff]  }
 0x4a7   :  { %v7314_v26 = vmul.f32 -1.442695, %v3070_v7  ;;  %v7315_v43 = vmul.f32 -1.442695, %v3072_v9  ;;  %v9811_v4 = vld [vmem:[#allocation4 + $0xc4] ss:$16 sps:$4 sm:$0xff]  }
 0x4a8   :  { %8542 = vpow2.f32 %v7313_v28  ;;  %v9813_v5 = vld [vmem:[#allocation4 + $0xcc] ss:$16 sps:$4 sm:$0xff]   ;;  %v9817_v6 = vld [vmem:[#allocation4 + $0xc0] ss:$16 sps:$4 sm:$0xff]   ;;  %v9819_v7 = vld [vmem:[#allocation4 + $0xc8] ss:$16 sps:$4 sm:$0xff]  }
 0x4a9   :  { %8544 = vpow2.f32 %v7314_v26  ;;  %v9823_v8 = vld [vmem:[#allocation4 + $0xe4] ss:$16 sps:$4 sm:$0xff]   ;;  %v9825_v9 = vld [vmem:[#allocation4 + $0xec] ss:$16 sps:$4 sm:$0xff]   ;;  %v9829_v11 = vld [vmem:[#allocation4 + $0xe0] ss:$16 sps:$4 sm:$0xff]  }
 0x4aa   :  { %8546 = vpow2.f32 %v7315_v43  ;;  %v9831_v12 = vld [vmem:[#allocation4 + $0xe8] ss:$16 sps:$4 sm:$0xff]   ;;  %v9839_v28 = vld [vmem:[#allocation6 + $0x4] ss:$16 sps:$4 sm:$0xff]   ;;  %v9841_v22 = vld [vmem:[#allocation6 + $0xc] ss:$16 sps:$4 sm:$0xff]  }
 0x4ab   :  { %8548 = vtanh.f32 %v3071_v3  ;;  %v9807_v3 = vld [vmem:[#allocation4 + $0xa8] ss:$16 sps:$4 sm:$0xff]   ;;  %v9843_v20 = vld [vmem:[#allocation6] ss:$16 sps:$4 sm:$0xff]  }
 0x4ac   :  { %v9845_v26 = vld [vmem:[#allocation6 + $0x8] ss:$16 sps:$4 sm:$0xff]   ;;  %v9855_v43 = vld [vmem:[#allocation6 + $0x20] ss:$16 sps:$4 sm:$0xff]  }
 0x4af   :  { %v8541_v38 = vpop.eup %8540 }
 0x4b0   :  { %v9733_v19 = vmul.f32 %v8541_v38, %v8539_v10  ;;  %v9851_v10 = vld [vmem:[#allocation6 + $0x24] ss:$16 sps:$4 sm:$0xff]   ;;  %v9853_v38 = vld [vmem:[#allocation6 + $0x2c] ss:$16 sps:$4 sm:$0xff]  }
 0x4b2   :  { %11105 = vst [vmem:[#allocation49_spill] sm:$0xff] %v9733_v19  ;;  %v8543_v30 = vpop.eup %8542  ;;  %v3098_v16 = vpack.c.bf16 %v9733_v19, %v9733_v19  ;;  %v9905_v19 = vld [vmem:[#allocation6 + $0xa8] ss:$16 sps:$4 sm:$0xff]  }
 0x4b3   :  { %v8545_v15 = vpop.eup %8544  ;;  %v3079_v14 = vadd.f32 1.0, %v8543_v30  ;;  %v9857_v30 = vld [vmem:[#allocation6 + $0x28] ss:$16 sps:$4 sm:$0xff]   ;;  %11119 = vst [vmem:[#allocation26_spill] sm:$0xff] %v9905_v19 }
 0x4b4   :  { %v3080_v17 = vadd.f32 1.0, %v8545_v15  ;;  %3515 = vmatprep.mubr.bf16.mxu0 %v3098_v16  ;;  %3556 = vmatprep.mubr.bf16.mxu1 %v3098_v16  ;;  %v8547_v44 = vpop.eup %8546  ;;  %v9863_v16 = vld [vmem:[#allocation6 + $0x44] ss:$16 sps:$4 sm:$0xff]   ;;  %v9865_v15 = vld [vmem:[#allocation6 + $0x4c] ss:$16 sps:$4 sm:$0xff]  }
 0x4b5   :  { %8550 = vrcp.f32 %v3079_v14  ;;  %v8549_v21 = vpop.eup %8548  ;;  %v3089_v36 = vadd.f32 1.0, %v8547_v44  ;;  %v9867_v14 = vld [vmem:[#allocation6 + $0x40] ss:$16 sps:$4 sm:$0xff]   ;;  %v9875_v44 = vld [vmem:[#allocation6 + $0x64] ss:$16 sps:$4 sm:$0xff]  }
 0x4b6   :  { %8552 = vrcp.f32 %v3080_v17  ;;  %11106 = vst [vmem:[#allocation36_spill] sm:$0xff] %v9867_v14  ;;  %v9869_v17 = vld [vmem:[#allocation6 + $0x48] ss:$16 sps:$4 sm:$0xff]   ;;  %11108 = vst [vmem:[#allocation15_spill] sm:$0xff] %v9875_v44 }
 0x4b7   :  { %8554 = vrcp.f32 %v3089_v36  ;;  %11107 = vst [vmem:[#allocation50_spill] sm:$0xff] %v9869_v17  ;;  %v9889_v36 = vld [vmem:[#allocation6 + $0x8c] ss:$16 sps:$4 sm:$0xff]  }
 0x4b8   :  { %11113 = vst [vmem:[#allocation20_spill] sm:$0xff] %v9889_v36 }
 0x4bf   :  { %v8551_v13 = vpop.eup %8550 }
 0x4c0   :  { %v8553_v18 = vpop.eup %8552  ;;  %v3093_v27 = vmul.f32 %v8551_v13, %v8549_v21  ;;  %v9877_v21 = vld [vmem:[#allocation6 + $0x6c] ss:$16 sps:$4 sm:$0xff]   ;;  %v9879_v13 = vld [vmem:[#allocation6 + $0x60] ss:$16 sps:$4 sm:$0xff]  }
 0x4c1   :  { %v3092_v46 = vmul.f32 %v8553_v18, %v9616_v42  ;;  %v8555_v50 = vpop.eup %8554  ;;  %v9755_v42 = vld [vmem:[#allocation4 + $0x20] ss:$16 sps:$4 sm:$0xff]   ;;  %11109 = vst [vmem:[#allocation16_spill] sm:$0xff] %v9877_v21  ;;  %11110 = vst [vmem:[#allocation17_spill] sm:$0xff] %v9879_v13  ;;  %v9881_v18 = vld [vmem:[#allocation6 + $0x68] ss:$16 sps:$4 sm:$0xff]  }
 0x4c2   :  { %11111 = vst [vmem:[#allocation18_spill] sm:$0xff] %v9881_v18 }
 0x4c3   :  { %v9738_v39 = vadd.f32 %v3093_v27, %v3092_v46  ;;  %v9887_v27 = vld [vmem:[#allocation6 + $0x84] ss:$16 sps:$4 sm:$0xff]   ;;  %v9891_v46 = vld [vmem:[#allocation6 + $0x80] ss:$16 sps:$4 sm:$0xff]  }
 0x4c4   :  { %11112 = vst [vmem:[#allocation19_spill] sm:$0xff] %v9887_v27  ;;  %11114 = vst [vmem:[#allocation22_spill] sm:$0xff] %v9891_v46 }
 0x4c5   :  { %8556 = vtanh.f32 %v9738_v39 }
 0x4cf   :  { %v8557_v35 = vpop.eup %8556 }
 0x4d0   :  { %v3096_v34 = vmul.f32 %v8557_v35, %v8555_v50  ;;  %v9893_v50 = vld [vmem:[#allocation6 + $0x88] ss:$16 sps:$4 sm:$0xff]   ;;  %v9899_v35 = vld [vmem:[#allocation6 + $0xa4] ss:$16 sps:$4 sm:$0xff]  }
 0x4d1   :  { %11115 = vst [vmem:[#allocation24_spill] sm:$0xff] %v9893_v50  ;;  %11116 = vst [vmem:[#allocation21_spill] sm:$0xff] %v9899_v35 }
 0x4d2   :  { %v9745_v45 = vpack.c.bf16 %v3096_v34, %v3096_v34  ;;  %v9901_v34 = vld [vmem:[#allocation6 + $0xac] ss:$16 sps:$4 sm:$0xff]  }
 0x4d3   :  { %11117 = vst [vmem:[#allocation23_spill] sm:$0xff] %v9901_v34 }
 0x4d4   :  { %3516 = vmatmul.mubr.bf16.vlgmr.msra.gmra.mrb[28].mxu0 %v9745_v45  ;;  %3557 = vmatmul.mubr.bf16.vlgmr.msra.gmra.mrb[60].mxu1 %v9745_v45 }
 0x4d5   :  { %3787 = vmatpush1.bf16.msra.mxu0 %v9741_v51  ;;  %3828 = vmatpush1.bf16.msra.mxu1 %v9743_v31 }
 0x4d6   :  { %3788 = vmatprep.subr.bf16.mxu0 %v9747_v52  ;;  %3829 = vmatprep.subr.bf16.mxu1 %v9749_v40 }
 0x4d7   :  { %3818 = vmatprep.mubr.bf16.mxu0 %v10947_v41  ;;  %3859 = vmatprep.mubr.bf16.mxu1 %v10947_v41 }
 0x4d9   :  { %3789 = vmatpush1.bf16.msra.mxu0 %v9755_v42  ;;  %3830 = vmatpush1.bf16.msra.mxu1 %v9757_v0 }
 0x4da   :  { %3790 = vmatprep.subr.bf16.mxu0 %v9761_v47  ;;  %3831 = vmatprep.subr.bf16.mxu1 %v9763_v48 }
 0x4dd   :  { %3791 = vmatpush1.bf16.msra.mxu0 %v9769_v33  ;;  %3832 = vmatpush1.bf16.msra.mxu1 %v9771_v53 }
 0x4de   :  { %3792 = vmatprep.subr.bf16.mxu0 %v9775_v54  ;;  %3833 = vmatprep.subr.bf16.mxu1 %v9777_v55 }
 0x4e1   :  { %3793 = vmatpush1.bf16.msra.mxu0 %v9781_v56  ;;  %3834 = vmatpush1.bf16.msra.mxu1 %v9783_v57 }
 0x4e2   :  { %3794 = vmatprep.subr.bf16.mxu0 %v9787_v58  ;;  %3835 = vmatprep.subr.bf16.mxu1 %v9789_v59 }
 0x4e5   :  { %3795 = vmatpush1.bf16.msra.mxu0 %v9793_v61  ;;  %3836 = vmatpush1.bf16.msra.mxu1 %v9795_v62 }
 0x4e6   :  { %3796 = vmatprep.subr.bf16.mxu0 %v9799_v63  ;;  %3837 = vmatprep.subr.bf16.mxu1 %v9801_v1 }
 0x4e9   :  { %3797 = vmatpush1.bf16.msra.mxu0 %v9805_v2  ;;  %3838 = vmatpush1.bf16.msra.mxu1 %v9807_v3 }
 0x4ea   :  { %3798 = vmatprep.subr.bf16.mxu0 %v9811_v4  ;;  %3839 = vmatprep.subr.bf16.mxu1 %v9813_v5 }
 0x4ed   :  { %3799 = vmatpush1.bf16.msra.mxu0 %v9817_v6  ;;  %3840 = vmatpush1.bf16.msra.mxu1 %v9819_v7 }
 0x4ee   :  { %3800 = vmatprep.subr.bf16.mxu0 %v9823_v8  ;;  %3841 = vmatprep.subr.bf16.mxu1 %v9825_v9 }
 0x4f1   :  { %3801 = vmatpush1.bf16.msra.mxu0 %v9829_v11  ;;  %3842 = vmatpush1.bf16.msra.mxu1 %v9831_v12 }
 0x4f2   :  { %4282 = vmatprep.subr.bf16.mxu0 %v9839_v28  ;;  %4323 = vmatprep.subr.bf16.mxu1 %v9841_v22 }
 0x4f4   :  { %3819 = vmatmul.mubr.bf16.vlgmr.msra.gmra.mrb[32].mxu0 %v9745_v45  ;;  %3860 = vmatmul.mubr.bf16.vlgmr.msra.gmra.mrb[64].mxu1 %v9745_v45  ;;  %v9903_v45 = vld [vmem:[#allocation6 + $0xa0] ss:$16 sps:$4 sm:$0xff]  }
 0x4f5   :  { %4283 = vmatpush1.bf16.msra.mxu0 %v9843_v20  ;;  %4324 = vmatpush1.bf16.msra.mxu1 %v9845_v26  ;;  %11118 = vst [vmem:[#allocation25_spill] sm:$0xff] %v9903_v45 }
 0x4f6   :  { %4284 = vmatprep.subr.bf16.mxu0 %v9851_v10  ;;  %4325 = vmatprep.subr.bf16.mxu1 %v9853_v38 }
 0x4f9   :  { %4285 = vmatpush1.bf16.msra.mxu0 %v9855_v43  ;;  %4326 = vmatpush1.bf16.msra.mxu1 %v9857_v30 }
 0x4fa   :  { %4286 = vmatprep.subr.bf16.mxu0 %v9863_v16  ;;  %4327 = vmatprep.subr.bf16.mxu1 %v9865_v15 }
 0x4fd   :  { %4287 = vmatpush1.bf16.msra.mxu0 %v9867_v14  ;;  %4328 = vmatpush1.bf16.msra.mxu1 %v9869_v17 }
 0x4fe   :  { %4288 = vmatprep.subr.bf16.mxu0 %v9875_v44  ;;  %4329 = vmatprep.subr.bf16.mxu1 %v9877_v21 }
 0x501   :  { %4289 = vmatpush1.bf16.msra.mxu0 %v9879_v13  ;;  %4330 = vmatpush1.bf16.msra.mxu1 %v9881_v18 }
 0x502   :  { %4290 = vmatprep.subr.bf16.mxu0 %v9887_v27  ;;  %4331 = vmatprep.subr.bf16.mxu1 %v9889_v36  ;;  %v9917_v36 = vld [vmem:[#allocation6 + $0xc8] ss:$16 sps:$4 sm:$0xff]   ;;  %v9993_v27 = vld [vmem:[#allocation6 + $0x1a4] ss:$16 sps:$4 sm:$0xff]  }
 0x503   :  { %11123 = vst [vmem:[#allocation30_spill] sm:$0xff] %v9917_v36  ;;  %11148 = vst [vmem:[#allocation79_spill] sm:$0xff] %v9993_v27 }
 0x505   :  { %4291 = vmatpush1.bf16.msra.mxu0 %v9891_v46  ;;  %4332 = vmatpush1.bf16.msra.mxu1 %v9893_v50  ;;  %v9913_v46 = vld [vmem:[#allocation6 + $0xcc] ss:$16 sps:$4 sm:$0xff]   ;;  %v9915_v50 = vld [vmem:[#allocation6 + $0xc0] ss:$16 sps:$4 sm:$0xff]  }
 0x506   :  { %4292 = vmatprep.subr.bf16.mxu0 %v9899_v35  ;;  %4333 = vmatprep.subr.bf16.mxu1 %v9901_v34  ;;  %11121 = vst [vmem:[#allocation28_spill] sm:$0xff] %v9913_v46  ;;  %11122 = vst [vmem:[#allocation29_spill] sm:$0xff] %v9915_v50  ;;  %v9923_v34 = vld [vmem:[#allocation6 + $0xe4] ss:$16 sps:$4 sm:$0xff]   ;;  %v9929_v35 = vld [vmem:[#allocation6 + $0xe8] ss:$16 sps:$4 sm:$0xff]  }
 0x507   :  { %11124 = vst [vmem:[#allocation31_spill] sm:$0xff] %v9923_v34  ;;  %11127 = vst [vmem:[#allocation47_spill] sm:$0xff] %v9929_v35 }
 0x509   :  { %4293 = vmatpush1.bf16.msra.mxu0 %v9903_v45  ;;  %4334 = vmatpush1.bf16.msra.mxu1 %v9905_v19  ;;  %v9925_v45 = vld [vmem:[#allocation6 + $0xec] ss:$16 sps:$4 sm:$0xff]   ;;  %v9927_v19 = vld [vmem:[#allocation6 + $0xe0] ss:$16 sps:$4 sm:$0xff]  }
 0x50a   :  { %4294 = vmatprep.subr.bf16.mxu0 %v9911_v29  ;;  %4335 = vmatprep.subr.bf16.mxu1 %v9913_v46  ;;  %11125 = vst [vmem:[#allocation32_spill] sm:$0xff] %v9925_v45  ;;  %11126 = vst [vmem:[#allocation33_spill] sm:$0xff] %v9927_v19  ;;  %v9935_v46 = vld [vmem:[#allocation6 + $0x104] ss:$16 sps:$4 sm:$0xff]   ;;  %v9941_v29 = vld [vmem:[#allocation6 + $0x108] ss:$16 sps:$4 sm:$0xff]  }
 0x50b   :  { %11128 = vst [vmem:[#allocation34_spill] sm:$0xff] %v9935_v46  ;;  %11131 = vst [vmem:[#allocation62_spill] sm:$0xff] %v9941_v29 }
 0x50d   :  { %4295 = vmatpush1.bf16.msra.mxu0 %v9915_v50  ;;  %4336 = vmatpush1.bf16.msra.mxu1 %v9917_v36  ;;  %v9937_v50 = vld [vmem:[#allocation6 + $0x10c] ss:$16 sps:$4 sm:$0xff]   ;;  %v9939_v36 = vld [vmem:[#allocation6 + $0x100] ss:$16 sps:$4 sm:$0xff]  }
 0x50e   :  { %4296 = vmatprep.subr.bf16.mxu0 %v9923_v34  ;;  %4337 = vmatprep.subr.bf16.mxu1 %v9925_v45  ;;  %11129 = vst [vmem:[#allocation48_spill] sm:$0xff] %v9937_v50  ;;  %11130 = vst [vmem:[#allocation61_spill] sm:$0xff] %v9939_v36  ;;  %v9947_v45 = vld [vmem:[#allocation6 + $0x124] ss:$16 sps:$4 sm:$0xff]   ;;  %v9953_v34 = vld [vmem:[#allocation6 + $0x128] ss:$16 sps:$4 sm:$0xff]  }
 0x50f   :  { %11132 = vst [vmem:[#allocation63_spill] sm:$0xff] %v9947_v45  ;;  %11135 = vst [vmem:[#allocation66_spill] sm:$0xff] %v9953_v34 }
 0x511   :  { %4297 = vmatpush1.bf16.msra.mxu0 %v9927_v19  ;;  %4338 = vmatpush1.bf16.msra.mxu1 %v9929_v35  ;;  %v9949_v19 = vld [vmem:[#allocation6 + $0x12c] ss:$16 sps:$4 sm:$0xff]   ;;  %v9951_v35 = vld [vmem:[#allocation6 + $0x120] ss:$16 sps:$4 sm:$0xff]  }
 0x512   :  { %4298 = vmatprep.subr.bf16.mxu0 %v9935_v46  ;;  %4339 = vmatprep.subr.bf16.mxu1 %v9937_v50  ;;  %11133 = vst [vmem:[#allocation64_spill] sm:$0xff] %v9949_v19  ;;  %11134 = vst [vmem:[#allocation65_spill] sm:$0xff] %v9951_v35  ;;  %v9959_v50 = vld [vmem:[#allocation6 + $0x144] ss:$16 sps:$4 sm:$0xff]   ;;  %v9965_v46 = vld [vmem:[#allocation6 + $0x148] ss:$16 sps:$4 sm:$0xff]  }
 0x513   :  { %11136 = vst [vmem:[#allocation67_spill] sm:$0xff] %v9959_v50  ;;  %11139 = vst [vmem:[#allocation70_spill] sm:$0xff] %v9965_v46 }
 0x515   :  { %4299 = vmatpush1.bf16.msra.mxu0 %v9939_v36  ;;  %4340 = vmatpush1.bf16.msra.mxu1 %v9941_v29  ;;  %v9961_v36 = vld [vmem:[#allocation6 + $0x14c] ss:$16 sps:$4 sm:$0xff]   ;;  %v9963_v29 = vld [vmem:[#allocation6 + $0x140] ss:$16 sps:$4 sm:$0xff]  }
 0x516   :  { %4300 = vmatprep.subr.bf16.mxu0 %v9947_v45  ;;  %4341 = vmatprep.subr.bf16.mxu1 %v9949_v19  ;;  %11137 = vst [vmem:[#allocation68_spill] sm:$0xff] %v9961_v36  ;;  %11138 = vst [vmem:[#allocation69_spill] sm:$0xff] %v9963_v29  ;;  %v9971_v19 = vld [vmem:[#allocation6 + $0x164] ss:$16 sps:$4 sm:$0xff]   ;;  %v9977_v45 = vld [vmem:[#allocation6 + $0x168] ss:$16 sps:$4 sm:$0xff]  }
 0x517   :  { %11140 = vst [vmem:[#allocation71_spill] sm:$0xff] %v9971_v19  ;;  %11143 = vst [vmem:[#allocation74_spill] sm:$0xff] %v9977_v45 }
 0x519   :  { %4301 = vmatpush1.bf16.msra.mxu0 %v9951_v35  ;;  %4342 = vmatpush1.bf16.msra.mxu1 %v9953_v34  ;;  %v9973_v35 = vld [vmem:[#allocation6 + $0x16c] ss:$16 sps:$4 sm:$0xff]   ;;  %v9975_v34 = vld [vmem:[#allocation6 + $0x160] ss:$16 sps:$4 sm:$0xff]  }
 0x51a   :  { %4302 = vmatprep.subr.bf16.mxu0 %v9959_v50  ;;  %4343 = vmatprep.subr.bf16.mxu1 %v9961_v36  ;;  %11141 = vst [vmem:[#allocation72_spill] sm:$0xff] %v9973_v35  ;;  %11142 = vst [vmem:[#allocation73_spill] sm:$0xff] %v9975_v34  ;;  %v9983_v36 = vld [vmem:[#allocation6 + $0x184] ss:$16 sps:$4 sm:$0xff]   ;;  %v9989_v50 = vld [vmem:[#allocation6 + $0x188] ss:$16 sps:$4 sm:$0xff]  }
 0x51b   :  { %11144 = vst [vmem:[#allocation75_spill] sm:$0xff] %v9983_v36  ;;  %11147 = vst [vmem:[#allocation78_spill] sm:$0xff] %v9989_v50 }
 0x51d   :  { %4303 = vmatpush1.bf16.msra.mxu0 %v9963_v29  ;;  %4344 = vmatpush1.bf16.msra.mxu1 %v9965_v46  ;;  %v9985_v29 = vld [vmem:[#allocation6 + $0x18c] ss:$16 sps:$4 sm:$0xff]   ;;  %v9987_v46 = vld [vmem:[#allocation6 + $0x180] ss:$16 sps:$4 sm:$0xff]  }
 0x51e   :  { %4304 = vmatprep.subr.bf16.mxu0 %v9971_v19  ;;  %4345 = vmatprep.subr.bf16.mxu1 %v9973_v35  ;;  %11145 = vst [vmem:[#allocation76_spill] sm:$0xff] %v9985_v29  ;;  %11146 = vst [vmem:[#allocation77_spill] sm:$0xff] %v9987_v46  ;;  %v9995_v19 = vld [vmem:[#allocation6 + $0x1ac] ss:$16 sps:$4 sm:$0xff]   ;;  %v10005_v35 = vld [vmem:[#allocation6 + $0x1c4] ss:$16 sps:$4 sm:$0xff]  }
 0x51f   :  { %11149 = vst [vmem:[#allocation80_spill] sm:$0xff] %v9995_v19  ;;  %11152 = vst [vmem:[#allocation83_spill] sm:$0xff] %v10005_v35 }
 0x521   :  { %4305 = vmatpush1.bf16.msra.mxu0 %v9975_v34  ;;  %4346 = vmatpush1.bf16.msra.mxu1 %v9977_v45  ;;  %v9999_v45 = vld [vmem:[#allocation6 + $0x1a0] ss:$16 sps:$4 sm:$0xff]   ;;  %v10001_v34 = vld [vmem:[#allocation6 + $0x1a8] ss:$16 sps:$4 sm:$0xff]  }
 0x522   :  { %4306 = vmatprep.subr.bf16.mxu0 %v9983_v36  ;;  %4347 = vmatprep.subr.bf16.mxu1 %v9985_v29  ;;  %11150 = vst [vmem:[#allocation81_spill] sm:$0xff] %v9999_v45  ;;  %11151 = vst [vmem:[#allocation82_spill] sm:$0xff] %v10001_v34  ;;  %v10007_v36 = vld [vmem:[#allocation6 + $0x1cc] ss:$16 sps:$4 sm:$0xff]   ;;  %v10011_v29 = vld [vmem:[#allocation6 + $0x1c0] ss:$16 sps:$4 sm:$0xff]  }
 0x523   :  { %11153 = vst [vmem:[#allocation84_spill] sm:$0xff] %v10007_v36  ;;  %11154 = vst [vmem:[#allocation85_spill] sm:$0xff] %v10011_v29 }
 0x525   :  { %4307 = vmatpush1.bf16.msra.mxu0 %v9987_v46  ;;  %4348 = vmatpush1.bf16.msra.mxu1 %v9989_v50  ;;  %v10013_v46 = vld [vmem:[#allocation6 + $0x1c8] ss:$16 sps:$4 sm:$0xff]   ;;  %v10017_v50 = vld [vmem:[#allocation6 + $0x1e4] ss:$16 sps:$4 sm:$0xff]  }
 0x526   :  { %4308 = vmatprep.subr.bf16.mxu0 %v9993_v27  ;;  %4349 = vmatprep.subr.bf16.mxu1 %v9995_v19  ;;  %11155 = vst [vmem:[#allocation86_spill] sm:$0xff] %v10013_v46  ;;  %11156 = vst [vmem:[#allocation87_spill] sm:$0xff] %v10017_v50  ;;  %v10019_v27 = vld [vmem:[#allocation6 + $0x1ec] ss:$16 sps:$4 sm:$0xff]   ;;  %v10023_v19 = vld [vmem:[#allocation6 + $0x1e0] ss:$16 sps:$4 sm:$0xff]  }
 0x527   :  { %11157 = vst [vmem:[#allocation88_spill] sm:$0xff] %v10019_v27  ;;  %11158 = vst [vmem:[#allocation89_spill] sm:$0xff] %v10023_v19 }
 0x529   :  { %4309 = vmatpush1.bf16.msra.mxu0 %v9999_v45  ;;  %4350 = vmatpush1.bf16.msra.mxu1 %v10001_v34  ;;  %v10025_v45 = vld [vmem:[#allocation6 + $0x1e8] ss:$16 sps:$4 sm:$0xff]  }
 0x52a   :  { %4310 = vmatprep.subr.bf16.mxu0 %v10005_v35  ;;  %4351 = vmatprep.subr.bf16.mxu1 %v10007_v36  ;;  %11159 = vst [vmem:[#allocation90_spill] sm:$0xff] %v10025_v45 }
 0x52d   :  { %4311 = vmatpush1.bf16.msra.mxu0 %v10011_v29  ;;  %4352 = vmatpush1.bf16.msra.mxu1 %v10013_v46 }
 0x52e   :  { %4312 = vmatprep.subr.bf16.mxu0 %v10017_v50  ;;  %4353 = vmatprep.subr.bf16.mxu1 %v10019_v27 }
 0x531   :  { %4313 = vmatpush1.bf16.msra.mxu0 %v10023_v19  ;;  %4354 = vmatpush1.bf16.msra.mxu1 %v10025_v45 }
 0x532   :  { %4585 = vmatprep.subr.bf16.mxu0 %v9715_v24  ;;  %4626 = vmatprep.subr.bf16.mxu1 %v9717_v25 }
 0x5a7   :  { %v3517_v36 = vpop.f32.mrb[28].mxu0  ;;  %v3558_v29 = vpop.f32.mrb[60].mxu1 }
 0x5a8   :  { %v3518_v46 = vadd.f32 %v3517_v36, %v11097_v23  ;;  %v3519_v35 = vpop.f32.mrb[29].mxu0  ;;  %v3560_v34 = vpop.f32.mrb[61].mxu1  ;;  %v3559_v25 = vadd.f32 %v3558_v29, %v11100_v37  ;;  %v11163_v37 = vld [vmem:[#allocation54_spill] sm:$0xff] }
 0x5a9   :  { %v3520_v18 = vadd.f32 %v3519_v35, %v11098_v32  ;;  %v3521_v13 = vpop.f32.mrb[30].mxu0  ;;  %v3562_v50 = vpop.f32.mrb[62].mxu1  ;;  %v3561_v24 = vadd.f32 %v3560_v34, %v11099_v49  ;;  %v11160_v34 = vld [vmem:[#allocation39_spill] sm:$0xff] }
 0x5aa   :  { %v7380_v21 = vmul.f32 -1.442695, %v3518_v46  ;;  %v3522_v27 = vpop.f32.mrb[31].mxu0  ;;  %v3563_v44 = vpop.f32.mrb[63].mxu1 }
 0x5ab   :  { %v7381_v19 = vmul.f32 -1.442695, %v3520_v18  ;;  %v7382_v45 = vmul.f32 -1.442695, %v3561_v24 }
 0x5ac   :  { %8558 = vpow2.f32 %v7380_v21 }
 0x5ad   :  { %8560 = vpow2.f32 %v7381_v19 }
 0x5ae   :  { %8562 = vpow2.f32 %v7382_v45  ;;  %v11161_v45 = vld [vmem:[#allocation53_spill] sm:$0xff] }
 0x5af   :  { %8564 = vtanh.f32 %v3559_v25 }
 0x5b6   :  { %v8559_v17 = vpop.eup %8558 }
 0x5b7   :  { %v8561_v14 = vpop.eup %8560  ;;  %v3571_v36 = vadd.f32 1.0, %v8559_v17 }
 0x5b8   :  { %v3572_v23 = vadd.f32 1.0, %v8561_v14  ;;  %v8563_v13 = vpop.eup %8562 }
 0x5b9   :  { %8566 = vrcp.f32 %v3571_v36  ;;  %v8565_v46 = vpop.eup %8564  ;;  %v3581_v21 = vadd.f32 1.0, %v8563_v13 }
 0x5ba   :  { %8568 = vrcp.f32 %v3572_v23  ;;  %v11162_v23 = vld [vmem:[#allocation40_spill] sm:$0xff] }
 0x5bb   :  { %8570 = vrcp.f32 %v3581_v21 }
 0x5c3   :  { %v8567_v27 = vpop.eup %8566 }
 0x5c4   :  { %v8569_v44 = vpop.eup %8568  ;;  %v3585_v18 = vmul.f32 %v8567_v27, %v8565_v46 }
 0x5c5   :  { %v3584_v19 = vmul.f32 %v8569_v44, %v9726_v60 }
 0x5c7   :  { %v10038_v50 = vadd.f32 %v3585_v18, %v3584_v19  ;;  %v3820_v35 = vpop.f32.mrb[32].mxu0  ;;  %v3861_v29 = vpop.f32.mrb[64].mxu1 }
 0x5c8   :  { %v3868_v17 = vadd.f32 %v3820_v35, %v11160_v34  ;;  %v3870_v24 = vadd.f32 %v3861_v29, %v11161_v45  ;;  %v3822_v14 = vpop.f32.mrb[33].mxu0  ;;  %v3863_v25 = vpop.f32.mrb[65].mxu1 }
 0x5c9   :  { %v3869_v36 = vadd.f32 %v3822_v14, %v11162_v23  ;;  %v3871_v49 = vadd.f32 %v3863_v25, %v11163_v37  ;;  %v3824_v32 = vpop.f32.mrb[34].mxu0  ;;  %v3865_v46 = vpop.f32.mrb[66].mxu1  ;;  %8572 = vtanh.f32 %v10038_v50 }
 0x5ca   :  { %v7415_v60 = vmul.f32 -1.442695, %v3868_v17  ;;  %v3825_v13 = vpop.f32.mrb[35].mxu0  ;;  %v3866_v27 = vpop.f32.mrb[67].mxu1 }
 0x5cb   :  { %v7416_v44 = vmul.f32 -1.442695, %v3869_v36  ;;  %v8571_v18 = vpop.eup %8570  ;;  %v7417_v19 = vmul.f32 -1.442695, %v3871_v49 }
 0x5cc   :  { %8574 = vpow2.f32 %v7415_v60 }
 0x5cd   :  { %8576 = vpow2.f32 %v7416_v44 }
 0x5ce   :  { %8578 = vpow2.f32 %v7417_v19  ;;  %v11208_v19 = vld [vmem:[#allocation80_spill] sm:$0xff] }
 0x5cf   :  { %8580 = vtanh.f32 %v3870_v24 }
 0x5d3   :  { %v8573_v21 = vpop.eup %8572 }
 0x5d4   :  { %v10045_v35 = vmul.f32 %v8573_v21, %v8571_v18  ;;  %v11206_v18 = vld [vmem:[#allocation78_spill] sm:$0xff]  ;;  %v11207_v21 = vld [vmem:[#allocation79_spill] sm:$0xff] }
 0x5d6   :  { %11164 = vst [vmem:[#allocation91_spill] sm:$0xff] %v10045_v35  ;;  %v8575_v29 = vpop.eup %8574  ;;  %v3897_v34 = vpack.c.bf16 %v10045_v35, %v10045_v35  ;;  %v10345_v35 = vld [vmem:[#allocation6 + $0xc4] ss:$16 sps:$4 sm:$0xff]  }
 0x5d7   :  { %v8577_v37 = vpop.eup %8576  ;;  %v3878_v32 = vadd.f32 1.0, %v8575_v29  ;;  %v11209_v29 = vld [vmem:[#allocation81_spill] sm:$0xff] }
 0x5d8   :  { %v3879_v45 = vadd.f32 1.0, %v8577_v37  ;;  %4314 = vmatprep.mubr.bf16.mxu0 %v3897_v34  ;;  %4355 = vmatprep.mubr.bf16.mxu1 %v3897_v34  ;;  %v8579_v17 = vpop.eup %8578  ;;  %v11210_v34 = vld [vmem:[#allocation82_spill] sm:$0xff]  ;;  %v11211_v37 = vld [vmem:[#allocation83_spill] sm:$0xff] }
 0x5d9   :  { %8582 = vrcp.f32 %v3878_v32  ;;  %v8581_v14 = vpop.eup %8580  ;;  %v3888_v36 = vadd.f32 1.0, %v8579_v17  ;;  %v11212_v32 = vld [vmem:[#allocation84_spill] sm:$0xff]  ;;  %v11214_v17 = vld [vmem:[#allocation86_spill] sm:$0xff] }
 0x5da   :  { %8584 = vrcp.f32 %v3879_v45  ;;  %v11213_v45 = vld [vmem:[#allocation85_spill] sm:$0xff] }
 0x5db   :  { %8586 = vrcp.f32 %v3888_v36  ;;  %v10149_v36 = vld [vmem:[#allocation4 + $0x4] ss:$16 sps:$4 sm:$0xff]  }
 0x5e3   :  { %v8583_v25 = vpop.eup %8582 }
 0x5e4   :  { %v8585_v23 = vpop.eup %8584  ;;  %v3892_v49 = vmul.f32 %v8583_v25, %v8581_v14  ;;  %v11215_v14 = vld [vmem:[#allocation87_spill] sm:$0xff]  ;;  %v11216_v25 = vld [vmem:[#allocation88_spill] sm:$0xff] }
 0x5e5   :  { %v3891_v46 = vmul.f32 %v8585_v23, %v9738_v39  ;;  %v8587_v13 = vpop.eup %8586  ;;  %v11165_v39 = vld [vmem:[#allocation36_spill] sm:$0xff]  ;;  %v11217_v23 = vld [vmem:[#allocation89_spill] sm:$0xff] }
 0x5e7   :  { %v10050_v60 = vadd.f32 %v3892_v49, %v3891_v46  ;;  %v11218_v49 = vld [vmem:[#allocation90_spill] sm:$0xff]  ;;  %v10151_v46 = vld [vmem:[#allocation4 + $0xc] ss:$16 sps:$4 sm:$0xff]  }
 0x5e9   :  { %8588 = vtanh.f32 %v10050_v60 }
 0x5f3   :  { %v8589_v24 = vpop.eup %8588 }
 0x5f4   :  { %v3895_v27 = vmul.f32 %v8589_v24, %v8587_v13 }
 0x5f6   :  { %v3896_v44 = vpack.c.bf16 %v3895_v27, %v3895_v27  ;;  %v11219_v27 = vld [vmem:[#allocation10_spill] sm:$0xff] }
 0x5f8   :  { %4315 = vmatmul.mubr.bf16.vlgmr.msra.gmra.mrb[36].mxu0 %v3896_v44  ;;  %4356 = vmatmul.mubr.bf16.vlgmr.msra.gmra.mrb[68].mxu1 %v3896_v44 }
 0x5f9   :  { %4586 = vmatpush1.bf16.msra.mxu0 %v9741_v51  ;;  %4627 = vmatpush1.bf16.msra.mxu1 %v9743_v31  ;;  %v11166_v51 = vld [vmem:[#allocation50_spill] sm:$0xff]  ;;  %v11167_v31 = vld [vmem:[#allocation15_spill] sm:$0xff] }
 0x5fa   :  { %4587 = vmatprep.subr.bf16.mxu0 %v9747_v52  ;;  %4628 = vmatprep.subr.bf16.mxu1 %v9749_v40  ;;  %v11168_v52 = vld [vmem:[#allocation16_spill] sm:$0xff]  ;;  %v11169_v40 = vld [vmem:[#allocation17_spill] sm:$0xff] }
 0x5fb   :  { %4617 = vmatprep.mubr.bf16.mxu0 %v10947_v41  ;;  %4658 = vmatprep.mubr.bf16.mxu1 %v10947_v41 }
 0x5fd   :  { %4588 = vmatpush1.bf16.msra.mxu0 %v9755_v42  ;;  %4629 = vmatpush1.bf16.msra.mxu1 %v9757_v0  ;;  %v11170_v42 = vld [vmem:[#allocation18_spill] sm:$0xff]  ;;  %v11171_v0 = vld [vmem:[#allocation19_spill] sm:$0xff] }
 0x5fe   :  { %4589 = vmatprep.subr.bf16.mxu0 %v9761_v47  ;;  %4630 = vmatprep.subr.bf16.mxu1 %v9763_v48  ;;  %v11172_v47 = vld [vmem:[#allocation20_spill] sm:$0xff]  ;;  %v11173_v48 = vld [vmem:[#allocation22_spill] sm:$0xff]  ;;  %11242 = vst [vmem:[#allocation19_spill] sm:$0xff] %v10345_v35 }
 0x601   :  { %4590 = vmatpush1.bf16.msra.mxu0 %v9769_v33  ;;  %4631 = vmatpush1.bf16.msra.mxu1 %v9771_v53  ;;  %v11174_v33 = vld [vmem:[#allocation24_spill] sm:$0xff]  ;;  %v11175_v53 = vld [vmem:[#allocation21_spill] sm:$0xff] }
 0x602   :  { %4591 = vmatprep.subr.bf16.mxu0 %v9775_v54  ;;  %4632 = vmatprep.subr.bf16.mxu1 %v9777_v55  ;;  %v11176_v54 = vld [vmem:[#allocation23_spill] sm:$0xff]  ;;  %v11177_v55 = vld [vmem:[#allocation25_spill] sm:$0xff] }
 0x605   :  { %4592 = vmatpush1.bf16.msra.mxu0 %v9781_v56  ;;  %4633 = vmatpush1.bf16.msra.mxu1 %v9783_v57  ;;  %v11178_v56 = vld [vmem:[#allocation26_spill] sm:$0xff]  ;;  %v11179_v57 = vld [vmem:[#allocation27_spill] sm:$0xff] }
 0x606   :  { %4593 = vmatprep.subr.bf16.mxu0 %v9787_v58  ;;  %4634 = vmatprep.subr.bf16.mxu1 %v9789_v59  ;;  %v11180_v58 = vld [vmem:[#allocation28_spill] sm:$0xff]  ;;  %v11181_v59 = vld [vmem:[#allocation29_spill] sm:$0xff] }
 0x609   :  { %4594 = vmatpush1.bf16.msra.mxu0 %v9793_v61  ;;  %4635 = vmatpush1.bf16.msra.mxu1 %v9795_v62  ;;  %v11182_v61 = vld [vmem:[#allocation30_spill] sm:$0xff]  ;;  %v11183_v62 = vld [vmem:[#allocation31_spill] sm:$0xff] }
 0x60a   :  { %4595 = vmatprep.subr.bf16.mxu0 %v9799_v63  ;;  %4636 = vmatprep.subr.bf16.mxu1 %v9801_v1  ;;  %v11184_v63 = vld [vmem:[#allocation32_spill] sm:$0xff]  ;;  %v11185_v1 = vld [vmem:[#allocation33_spill] sm:$0xff] }
 0x60d   :  { %4596 = vmatpush1.bf16.msra.mxu0 %v9805_v2  ;;  %4637 = vmatpush1.bf16.msra.mxu1 %v9807_v3  ;;  %v11186_v2 = vld [vmem:[#allocation47_spill] sm:$0xff]  ;;  %v11187_v3 = vld [vmem:[#allocation34_spill] sm:$0xff] }
 0x60e   :  { %4597 = vmatprep.subr.bf16.mxu0 %v9811_v4  ;;  %4638 = vmatprep.subr.bf16.mxu1 %v9813_v5  ;;  %v11188_v4 = vld [vmem:[#allocation48_spill] sm:$0xff]  ;;  %v11189_v5 = vld [vmem:[#allocation61_spill] sm:$0xff] }
 0x611   :  { %4598 = vmatpush1.bf16.msra.mxu0 %v9817_v6  ;;  %4639 = vmatpush1.bf16.msra.mxu1 %v9819_v7  ;;  %v11190_v6 = vld [vmem:[#allocation62_spill] sm:$0xff]  ;;  %v11191_v7 = vld [vmem:[#allocation63_spill] sm:$0xff] }
 0x612   :  { %4599 = vmatprep.subr.bf16.mxu0 %v9823_v8  ;;  %4640 = vmatprep.subr.bf16.mxu1 %v9825_v9  ;;  %v11192_v8 = vld [vmem:[#allocation64_spill] sm:$0xff]  ;;  %v11193_v9 = vld [vmem:[#allocation65_spill] sm:$0xff] }
 0x615   :  { %4600 = vmatpush1.bf16.msra.mxu0 %v9829_v11  ;;  %4641 = vmatpush1.bf16.msra.mxu1 %v9831_v12  ;;  %v11194_v11 = vld [vmem:[#allocation66_spill] sm:$0xff]  ;;  %v11195_v12 = vld [vmem:[#allocation67_spill] sm:$0xff] }
 0x616   :  { %5081 = vmatprep.subr.bf16.mxu0 %v9839_v28  ;;  %5122 = vmatprep.subr.bf16.mxu1 %v9841_v22  ;;  %v11196_v28 = vld [vmem:[#allocation68_spill] sm:$0xff]  ;;  %v11197_v22 = vld [vmem:[#allocation69_spill] sm:$0xff] }
 0x618   :  { %4618 = vmatmul.mubr.bf16.vlgmr.msra.gmra.mrb[40].mxu0 %v3896_v44  ;;  %4659 = vmatmul.mubr.bf16.vlgmr.msra.gmra.mrb[72].mxu1 %v3896_v44 }
 0x619   :  { %5082 = vmatpush1.bf16.msra.mxu0 %v9843_v20  ;;  %5123 = vmatpush1.bf16.msra.mxu1 %v9845_v26  ;;  %v11198_v20 = vld [vmem:[#allocation70_spill] sm:$0xff]  ;;  %v11199_v26 = vld [vmem:[#allocation71_spill] sm:$0xff] }
 0x61a   :  { %5083 = vmatprep.subr.bf16.mxu0 %v9851_v10  ;;  %5124 = vmatprep.subr.bf16.mxu1 %v9853_v38  ;;  %v11200_v10 = vld [vmem:[#allocation72_spill] sm:$0xff]  ;;  %v11201_v38 = vld [vmem:[#allocation73_spill] sm:$0xff] }
 0x61d   :  { %5084 = vmatpush1.bf16.msra.mxu0 %v9855_v43  ;;  %5125 = vmatpush1.bf16.msra.mxu1 %v9857_v30  ;;  %v11202_v43 = vld [vmem:[#allocation74_spill] sm:$0xff]  ;;  %v11203_v30 = vld [vmem:[#allocation75_spill] sm:$0xff] }
 0x61e   :  { %5085 = vmatprep.subr.bf16.mxu0 %v9863_v16  ;;  %5126 = vmatprep.subr.bf16.mxu1 %v9865_v15  ;;  %v11204_v16 = vld [vmem:[#allocation76_spill] sm:$0xff]  ;;  %v11205_v15 = vld [vmem:[#allocation77_spill] sm:$0xff] }
 0x621   :  { %5086 = vmatpush1.bf16.msra.mxu0 %v11165_v39  ;;  %5127 = vmatpush1.bf16.msra.mxu1 %v11166_v51 }
 0x622   :  { %5087 = vmatprep.subr.bf16.mxu0 %v11167_v31  ;;  %5128 = vmatprep.subr.bf16.mxu1 %v11168_v52  ;;  %v11220_v31 = vld [vmem:[#allocation11_spill] sm:$0xff] }
 0x625   :  { %5088 = vmatpush1.bf16.msra.mxu0 %v11169_v40  ;;  %5129 = vmatpush1.bf16.msra.mxu1 %v11170_v42 }
 0x626   :  { %5089 = vmatprep.subr.bf16.mxu0 %v11171_v0  ;;  %5130 = vmatprep.subr.bf16.mxu1 %v11172_v47 }
 0x629   :  { %5090 = vmatpush1.bf16.msra.mxu0 %v11173_v48  ;;  %5131 = vmatpush1.bf16.msra.mxu1 %v11174_v33 }
 0x62a   :  { %5091 = vmatprep.subr.bf16.mxu0 %v11175_v53  ;;  %5132 = vmatprep.subr.bf16.mxu1 %v11176_v54  ;;  %v11221_v53 = vld [vmem:[#allocation12_spill] sm:$0xff] }
 0x62d   :  { %5092 = vmatpush1.bf16.msra.mxu0 %v11177_v55  ;;  %5133 = vmatpush1.bf16.msra.mxu1 %v11178_v56  ;;  %v11222_v56 = vld [vmem:[#allocation13_spill] sm:$0xff] }
 0x62e   :  { %5093 = vmatprep.subr.bf16.mxu0 %v11179_v57  ;;  %5134 = vmatprep.subr.bf16.mxu1 %v11180_v58 }
 0x631   :  { %5094 = vmatpush1.bf16.msra.mxu0 %v11181_v59  ;;  %5135 = vmatpush1.bf16.msra.mxu1 %v11182_v61 }
 0x632   :  { %5095 = vmatprep.subr.bf16.mxu0 %v11183_v62  ;;  %5136 = vmatprep.subr.bf16.mxu1 %v11184_v63 }
 0x635   :  { %5096 = vmatpush1.bf16.msra.mxu0 %v11185_v1  ;;  %5137 = vmatpush1.bf16.msra.mxu1 %v11186_v2 }
 0x636   :  { %5097 = vmatprep.subr.bf16.mxu0 %v11187_v3  ;;  %5138 = vmatprep.subr.bf16.mxu1 %v11188_v4 }
 0x639   :  { %5098 = vmatpush1.bf16.msra.mxu0 %v11189_v5  ;;  %5139 = vmatpush1.bf16.msra.mxu1 %v11190_v6 }
 0x63a   :  { %5099 = vmatprep.subr.bf16.mxu0 %v11191_v7  ;;  %5140 = vmatprep.subr.bf16.mxu1 %v11192_v8 }
 0x63d   :  { %5100 = vmatpush1.bf16.msra.mxu0 %v11193_v9  ;;  %5141 = vmatpush1.bf16.msra.mxu1 %v11194_v11  ;;  %v11223_v11 = vld [vmem:[#allocation41_spill] sm:$0xff] }
 0x63e   :  { %5101 = vmatprep.subr.bf16.mxu0 %v11195_v12  ;;  %5142 = vmatprep.subr.bf16.mxu1 %v11196_v28  ;;  %v11224_v28 = vld [vmem:[#allocation55_spill] sm:$0xff] }
 0x641   :  { %5102 = vmatpush1.bf16.msra.mxu0 %v11197_v22  ;;  %5143 = vmatpush1.bf16.msra.mxu1 %v11198_v20 }
 0x642   :  { %5103 = vmatprep.subr.bf16.mxu0 %v11199_v26  ;;  %5144 = vmatprep.subr.bf16.mxu1 %v11200_v10  ;;  %v11225_v10 = vld [vmem:[#allocation42_spill] sm:$0xff] }
 0x645   :  { %5104 = vmatpush1.bf16.msra.mxu0 %v11201_v38  ;;  %5145 = vmatpush1.bf16.msra.mxu1 %v11202_v43  ;;  %v11226_v43 = vld [vmem:[#allocation56_spill] sm:$0xff] }
 0x646   :  { %5105 = vmatprep.subr.bf16.mxu0 %v11203_v30  ;;  %5146 = vmatprep.subr.bf16.mxu1 %v11204_v16 }
 0x649   :  { %5106 = vmatpush1.bf16.msra.mxu0 %v11205_v15  ;;  %5147 = vmatpush1.bf16.msra.mxu1 %v11206_v18 }
 0x64a   :  { %5107 = vmatprep.subr.bf16.mxu0 %v11207_v21  ;;  %5148 = vmatprep.subr.bf16.mxu1 %v11208_v19 }
 0x64d   :  { %5108 = vmatpush1.bf16.msra.mxu0 %v11209_v29  ;;  %5149 = vmatpush1.bf16.msra.mxu1 %v11210_v34 }
 0x64e   :  { %5109 = vmatprep.subr.bf16.mxu0 %v11211_v37  ;;  %5150 = vmatprep.subr.bf16.mxu1 %v11212_v32 }
 0x651   :  { %5110 = vmatpush1.bf16.msra.mxu0 %v11213_v45  ;;  %5151 = vmatpush1.bf16.msra.mxu1 %v11214_v17 }
 0x652   :  { %5111 = vmatprep.subr.bf16.mxu0 %v11215_v14  ;;  %5152 = vmatprep.subr.bf16.mxu1 %v11216_v25 }
 0x655   :  { %5112 = vmatpush1.bf16.msra.mxu0 %v11217_v23  ;;  %5153 = vmatpush1.bf16.msra.mxu1 %v11218_v49 }
 0x656   :  { %5384 = vmatprep.subr.bf16.mxu0 %v10149_v36  ;;  %5425 = vmatprep.subr.bf16.mxu1 %v10151_v46 }
 0x6cb   :  { %v4316_v13 = vpop.f32.mrb[36].mxu0  ;;  %v4357_v24 = vpop.f32.mrb[68].mxu1 }
 0x6cc   :  { %v4317_v44 = vadd.f32 %v4316_v13, %v11219_v27  ;;  %v4318_v39 = vpop.f32.mrb[37].mxu0  ;;  %v4359_v51 = vpop.f32.mrb[69].mxu1  ;;  %v4358_v57 = vadd.f32 %v4357_v24, %v11222_v56 }
 0x6cd   :  { %v4319_v52 = vadd.f32 %v4318_v39, %v11220_v31  ;;  %v4320_v40 = vpop.f32.mrb[38].mxu0  ;;  %v4361_v42 = vpop.f32.mrb[70].mxu1  ;;  %v4360_v54 = vadd.f32 %v4359_v51, %v11221_v53 }
 0x6ce   :  { %v7482_v0 = vmul.f32 -1.442695, %v4317_v44  ;;  %v4321_v47 = vpop.f32.mrb[39].mxu0  ;;  %v4362_v48 = vpop.f32.mrb[71].mxu1 }
 0x6cf   :  { %v7483_v33 = vmul.f32 -1.442695, %v4319_v52  ;;  %v7484_v55 = vmul.f32 -1.442695, %v4360_v54  ;;  %v10175_v48 = vld [vmem:[#allocation4] ss:$16 sps:$4 sm:$0xff]  }
 0x6d0   :  { %8590 = vpow2.f32 %v7482_v0 }
 0x6d1   :  { %8592 = vpow2.f32 %v7483_v33  ;;  %v10177_v33 = vld [vmem:[#allocation4 + $0x8] ss:$16 sps:$4 sm:$0xff]  }
 0x6d2   :  { %8594 = vpow2.f32 %v7484_v55  ;;  %v10181_v55 = vld [vmem:[#allocation4 + $0x24] ss:$16 sps:$4 sm:$0xff]  }
 0x6d3   :  { %8596 = vtanh.f32 %v4358_v57  ;;  %v10183_v57 = vld [vmem:[#allocation4 + $0x2c] ss:$16 sps:$4 sm:$0xff]  }
 0x6da   :  { %v8591_v58 = vpop.eup %8590 }
 0x6db   :  { %v8593_v59 = vpop.eup %8592  ;;  %v4370_v61 = vadd.f32 1.0, %v8591_v58  ;;  %v10191_v58 = vld [vmem:[#allocation4 + $0x28] ss:$16 sps:$4 sm:$0xff]  }
 0x6dc   :  { %v4371_v62 = vadd.f32 1.0, %v8593_v59  ;;  %v8595_v63 = vpop.eup %8594  ;;  %v10195_v59 = vld [vmem:[#allocation4 + $0x44] ss:$16 sps:$4 sm:$0xff]  }
 0x6dd   :  { %8598 = vrcp.f32 %v4370_v61  ;;  %v8597_v1 = vpop.eup %8596  ;;  %v4380_v5 = vadd.f32 1.0, %v8595_v63  ;;  %v10197_v61 = vld [vmem:[#allocation4 + $0x4c] ss:$16 sps:$4 sm:$0xff]   ;;  %v10205_v63 = vld [vmem:[#allocation4 + $0x48] ss:$16 sps:$4 sm:$0xff]  }
 0x6de   :  { %8600 = vrcp.f32 %v4371_v62  ;;  %v10203_v62 = vld [vmem:[#allocation4 + $0x40] ss:$16 sps:$4 sm:$0xff]  }
 0x6df   :  { %8602 = vrcp.f32 %v4380_v5  ;;  %v10221_v5 = vld [vmem:[#allocation4 + $0x84] ss:$16 sps:$4 sm:$0xff]  }
 0x6e7   :  { %v8599_v2 = vpop.eup %8598 }
 0x6e8   :  { %v8601_v3 = vpop.eup %8600  ;;  %v4384_v4 = vmul.f32 %v8599_v2, %v8597_v1  ;;  %v10209_v1 = vld [vmem:[#allocation4 + $0x64] ss:$16 sps:$4 sm:$0xff]   ;;  %v10211_v2 = vld [vmem:[#allocation4 + $0x6c] ss:$16 sps:$4 sm:$0xff]  }
 0x6e9   :  { %v4383_v6 = vmul.f32 %v8601_v3, %v10038_v50  ;;  %v8603_v29 = vpop.eup %8602  ;;  %v10215_v3 = vld [vmem:[#allocation4 + $0x60] ss:$16 sps:$4 sm:$0xff]  }
 0x6eb   :  { %v10160_v7 = vadd.f32 %v4384_v4, %v4383_v6  ;;  %v4619_v8 = vpop.f32.mrb[40].mxu0  ;;  %v4660_v9 = vpop.f32.mrb[72].mxu1  ;;  %v10217_v4 = vld [vmem:[#allocation4 + $0x68] ss:$16 sps:$4 sm:$0xff]   ;;  %v10223_v6 = vld [vmem:[#allocation4 + $0x8c] ss:$16 sps:$4 sm:$0xff]  }
 0x6ec   :  { %v4667_v12 = vadd.f32 %v4619_v8, %v11223_v11  ;;  %v4669_v22 = vadd.f32 %v4660_v9, %v11224_v28  ;;  %v4621_v20 = vpop.f32.mrb[41].mxu0  ;;  %v4662_v26 = vpop.f32.mrb[73].mxu1  ;;  %v10227_v8 = vld [vmem:[#allocation4 + $0x80] ss:$16 sps:$4 sm:$0xff]   ;;  %v10229_v9 = vld [vmem:[#allocation4 + $0x88] ss:$16 sps:$4 sm:$0xff]  }
 0x6ed   :  { %v4668_v38 = vadd.f32 %v4621_v20, %v11225_v10  ;;  %v4670_v30 = vadd.f32 %v4662_v26, %v11226_v43  ;;  %v4623_v16 = vpop.f32.mrb[42].mxu0  ;;  %v4664_v15 = vpop.f32.mrb[74].mxu1  ;;  %8604 = vtanh.f32 %v10160_v7  ;;  %v10233_v11 = vld [vmem:[#allocation4 + $0xa4] ss:$16 sps:$4 sm:$0xff]   ;;  %v10239_v28 = vld [vmem:[#allocation4 + $0xa0] ss:$16 sps:$4 sm:$0xff]  }
 0x6ee   :  { %v7517_v50 = vmul.f32 -1.442695, %v4667_v12  ;;  %v4624_v18 = vpop.f32.mrb[43].mxu0  ;;  %v4665_v21 = vpop.f32.mrb[75].mxu1  ;;  %v10235_v12 = vld [vmem:[#allocation4 + $0xac] ss:$16 sps:$4 sm:$0xff]  }
 0x6ef   :  { %v7518_v19 = vmul.f32 -1.442695, %v4668_v38  ;;  %v7519_v37 = vmul.f32 -1.442695, %v4670_v30  ;;  %v10245_v20 = vld [vmem:[#allocation4 + $0xc4] ss:$16 sps:$4 sm:$0xff]  }
 0x6f0   :  { %8606 = vpow2.f32 %v7517_v50  ;;  %v10247_v26 = vld [vmem:[#allocation4 + $0xcc] ss:$16 sps:$4 sm:$0xff]   ;;  %v10251_v10 = vld [vmem:[#allocation4 + $0xc0] ss:$16 sps:$4 sm:$0xff]   ;;  %v10253_v38 = vld [vmem:[#allocation4 + $0xc8] ss:$16 sps:$4 sm:$0xff]  }
 0x6f1   :  { %8608 = vpow2.f32 %v7518_v19  ;;  %v10257_v43 = vld [vmem:[#allocation4 + $0xe4] ss:$16 sps:$4 sm:$0xff]   ;;  %v10259_v30 = vld [vmem:[#allocation4 + $0xec] ss:$16 sps:$4 sm:$0xff]   ;;  %v10263_v16 = vld [vmem:[#allocation4 + $0xe0] ss:$16 sps:$4 sm:$0xff]  }
 0x6f2   :  { %8610 = vpow2.f32 %v7519_v37  ;;  %v10265_v15 = vld [vmem:[#allocation4 + $0xe8] ss:$16 sps:$4 sm:$0xff]   ;;  %v10273_v50 = vld [vmem:[#allocation6 + $0x4] ss:$16 sps:$4 sm:$0xff]   ;;  %v10275_v18 = vld [vmem:[#allocation6 + $0xc] ss:$16 sps:$4 sm:$0xff]  }
 0x6f3   :  { %8612 = vtanh.f32 %v4669_v22  ;;  %v10241_v22 = vld [vmem:[#allocation4 + $0xa8] ss:$16 sps:$4 sm:$0xff]   ;;  %v10277_v21 = vld [vmem:[#allocation6] ss:$16 sps:$4 sm:$0xff]  }
 0x6f4   :  { %v10279_v19 = vld [vmem:[#allocation6 + $0x8] ss:$16 sps:$4 sm:$0xff]   ;;  %v10289_v37 = vld [vmem:[#allocation6 + $0x20] ss:$16 sps:$4 sm:$0xff]  }
 0x6f7   :  { %v8605_v34 = vpop.eup %8604 }
 0x6f8   :  { %v10167_v32 = vmul.f32 %v8605_v34, %v8603_v29  ;;  %v10285_v29 = vld [vmem:[#allocation6 + $0x24] ss:$16 sps:$4 sm:$0xff]   ;;  %v10287_v34 = vld [vmem:[#allocation6 + $0x2c] ss:$16 sps:$4 sm:$0xff]  }
 0x6fa   :  { %11227 = vst [vmem:[#allocation92_spill] sm:$0xff] %v10167_v32  ;;  %v8607_v45 = vpop.eup %8606  ;;  %v4696_v17 = vpack.c.bf16 %v10167_v32, %v10167_v32  ;;  %v10339_v32 = vld [vmem:[#allocation6 + $0xa8] ss:$16 sps:$4 sm:$0xff]  }
 0x6fb   :  { %v8609_v14 = vpop.eup %8608  ;;  %v4677_v25 = vadd.f32 1.0, %v8607_v45  ;;  %v10291_v45 = vld [vmem:[#allocation6 + $0x28] ss:$16 sps:$4 sm:$0xff]   ;;  %11241 = vst [vmem:[#allocation18_spill] sm:$0xff] %v10339_v32 }
 0x6fc   :  { %v4678_v23 = vadd.f32 1.0, %v8609_v14  ;;  %5113 = vmatprep.mubr.bf16.mxu0 %v4696_v17  ;;  %5154 = vmatprep.mubr.bf16.mxu1 %v4696_v17  ;;  %v8611_v49 = vpop.eup %8610  ;;  %v10297_v17 = vld [vmem:[#allocation6 + $0x44] ss:$16 sps:$4 sm:$0xff]   ;;  %v10299_v14 = vld [vmem:[#allocation6 + $0x4c] ss:$16 sps:$4 sm:$0xff]  }
 0x6fd   :  { %8614 = vrcp.f32 %v4677_v25  ;;  %v8613_v13 = vpop.eup %8612  ;;  %v4687_v51 = vadd.f32 1.0, %v8611_v49  ;;  %v10301_v25 = vld [vmem:[#allocation6 + $0x40] ss:$16 sps:$4 sm:$0xff]   ;;  %v10309_v49 = vld [vmem:[#allocation6 + $0x64] ss:$16 sps:$4 sm:$0xff]  }
 0x6fe   :  { %8616 = vrcp.f32 %v4678_v23  ;;  %11228 = vst [vmem:[#allocation37_spill] sm:$0xff] %v10301_v25  ;;  %v10303_v23 = vld [vmem:[#allocation6 + $0x48] ss:$16 sps:$4 sm:$0xff]   ;;  %11230 = vst [vmem:[#allocation38_spill] sm:$0xff] %v10309_v49 }
 0x6ff   :  { %8618 = vrcp.f32 %v4687_v51  ;;  %11229 = vst [vmem:[#allocation51_spill] sm:$0xff] %v10303_v23  ;;  %v10323_v51 = vld [vmem:[#allocation6 + $0x8c] ss:$16 sps:$4 sm:$0xff]  }
 0x700   :  { %11235 = vst [vmem:[#allocation54_spill] sm:$0xff] %v10323_v51 }
 0x707   :  { %v8615_v24 = vpop.eup %8614 }
 0x708   :  { %v8617_v44 = vpop.eup %8616  ;;  %v4691_v39 = vmul.f32 %v8615_v24, %v8613_v13  ;;  %v10311_v13 = vld [vmem:[#allocation6 + $0x6c] ss:$16 sps:$4 sm:$0xff]   ;;  %v10313_v24 = vld [vmem:[#allocation6 + $0x60] ss:$16 sps:$4 sm:$0xff]  }
 0x709   :  { %v4690_v52 = vmul.f32 %v8617_v44, %v10050_v60  ;;  %v8619_v42 = vpop.eup %8618  ;;  %v10189_v60 = vld [vmem:[#allocation4 + $0x20] ss:$16 sps:$4 sm:$0xff]   ;;  %11231 = vst [vmem:[#allocation52_spill] sm:$0xff] %v10311_v13  ;;  %11232 = vst [vmem:[#allocation39_spill] sm:$0xff] %v10313_v24  ;;  %v10315_v44 = vld [vmem:[#allocation6 + $0x68] ss:$16 sps:$4 sm:$0xff]  }
 0x70a   :  { %11233 = vst [vmem:[#allocation53_spill] sm:$0xff] %v10315_v44 }
 0x70b   :  { %v10172_v40 = vadd.f32 %v4691_v39, %v4690_v52  ;;  %v10321_v39 = vld [vmem:[#allocation6 + $0x84] ss:$16 sps:$4 sm:$0xff]   ;;  %v10325_v52 = vld [vmem:[#allocation6 + $0x80] ss:$16 sps:$4 sm:$0xff]  }
 0x70c   :  { %11234 = vst [vmem:[#allocation40_spill] sm:$0xff] %v10321_v39  ;;  %11236 = vst [vmem:[#allocation36_spill] sm:$0xff] %v10325_v52 }
 0x70d   :  { %8620 = vtanh.f32 %v10172_v40 }
 0x717   :  { %v8621_v0 = vpop.eup %8620 }
 0x718   :  { %v4694_v47 = vmul.f32 %v8621_v0, %v8619_v42  ;;  %v10327_v42 = vld [vmem:[#allocation6 + $0x88] ss:$16 sps:$4 sm:$0xff]   ;;  %v10333_v0 = vld [vmem:[#allocation6 + $0xa4] ss:$16 sps:$4 sm:$0xff]  }
 0x719   :  { %11237 = vst [vmem:[#allocation50_spill] sm:$0xff] %v10327_v42  ;;  %11238 = vst [vmem:[#allocation15_spill] sm:$0xff] %v10333_v0 }
 0x71a   :  { %v10179_v54 = vpack.c.bf16 %v4694_v47, %v4694_v47  ;;  %v10335_v47 = vld [vmem:[#allocation6 + $0xac] ss:$16 sps:$4 sm:$0xff]  }
 0x71b   :  { %11239 = vst [vmem:[#allocation16_spill] sm:$0xff] %v10335_v47 }
 0x71c   :  { %5114 = vmatmul.mubr.bf16.vlgmr.msra.gmra.mrb[44].mxu0 %v10179_v54  ;;  %5155 = vmatmul.mubr.bf16.vlgmr.msra.gmra.mrb[76].mxu1 %v10179_v54 }
 0x71d   :  { %5385 = vmatpush1.bf16.msra.mxu0 %v10175_v48  ;;  %5426 = vmatpush1.bf16.msra.mxu1 %v10177_v33 }
 0x71e   :  { %5386 = vmatprep.subr.bf16.mxu0 %v10181_v55  ;;  %5427 = vmatprep.subr.bf16.mxu1 %v10183_v57 }
 0x71f   :  { %5416 = vmatprep.mubr.bf16.mxu0 %v10947_v41  ;;  %5457 = vmatprep.mubr.bf16.mxu1 %v10947_v41 }
 0x721   :  { %5387 = vmatpush1.bf16.msra.mxu0 %v10189_v60  ;;  %5428 = vmatpush1.bf16.msra.mxu1 %v10191_v58 }
 0x722   :  { %5388 = vmatprep.subr.bf16.mxu0 %v10195_v59  ;;  %5429 = vmatprep.subr.bf16.mxu1 %v10197_v61 }
 0x725   :  { %5389 = vmatpush1.bf16.msra.mxu0 %v10203_v62  ;;  %5430 = vmatpush1.bf16.msra.mxu1 %v10205_v63 }
 0x726   :  { %5390 = vmatprep.subr.bf16.mxu0 %v10209_v1  ;;  %5431 = vmatprep.subr.bf16.mxu1 %v10211_v2 }
 0x729   :  { %5391 = vmatpush1.bf16.msra.mxu0 %v10215_v3  ;;  %5432 = vmatpush1.bf16.msra.mxu1 %v10217_v4 }
 0x72a   :  { %5392 = vmatprep.subr.bf16.mxu0 %v10221_v5  ;;  %5433 = vmatprep.subr.bf16.mxu1 %v10223_v6 }
 0x72d   :  { %5393 = vmatpush1.bf16.msra.mxu0 %v10227_v8  ;;  %5434 = vmatpush1.bf16.msra.mxu1 %v10229_v9 }
 0x72e   :  { %5394 = vmatprep.subr.bf16.mxu0 %v10233_v11  ;;  %5435 = vmatprep.subr.bf16.mxu1 %v10235_v12 }
 0x731   :  { %5395 = vmatpush1.bf16.msra.mxu0 %v10239_v28  ;;  %5436 = vmatpush1.bf16.msra.mxu1 %v10241_v22 }
 0x732   :  { %5396 = vmatprep.subr.bf16.mxu0 %v10245_v20  ;;  %5437 = vmatprep.subr.bf16.mxu1 %v10247_v26 }
 0x735   :  { %5397 = vmatpush1.bf16.msra.mxu0 %v10251_v10  ;;  %5438 = vmatpush1.bf16.msra.mxu1 %v10253_v38 }
 0x736   :  { %5398 = vmatprep.subr.bf16.mxu0 %v10257_v43  ;;  %5439 = vmatprep.subr.bf16.mxu1 %v10259_v30 }
 0x739   :  { %5399 = vmatpush1.bf16.msra.mxu0 %v10263_v16  ;;  %5440 = vmatpush1.bf16.msra.mxu1 %v10265_v15 }
 0x73a   :  { %5880 = vmatprep.subr.bf16.mxu0 %v10273_v50  ;;  %5921 = vmatprep.subr.bf16.mxu1 %v10275_v18 }
 0x73c   :  { %5417 = vmatmul.mubr.bf16.vlgmr.msra.gmra.mrb[48].mxu0 %v10179_v54  ;;  %5458 = vmatmul.mubr.bf16.vlgmr.msra.gmra.mrb[80].mxu1 %v10179_v54  ;;  %v10337_v54 = vld [vmem:[#allocation6 + $0xa0] ss:$16 sps:$4 sm:$0xff]  }
 0x73d   :  { %5881 = vmatpush1.bf16.msra.mxu0 %v10277_v21  ;;  %5922 = vmatpush1.bf16.msra.mxu1 %v10279_v19  ;;  %11240 = vst [vmem:[#allocation17_spill] sm:$0xff] %v10337_v54 }
 0x73e   :  { %5882 = vmatprep.subr.bf16.mxu0 %v10285_v29  ;;  %5923 = vmatprep.subr.bf16.mxu1 %v10287_v34 }
 0x741   :  { %5883 = vmatpush1.bf16.msra.mxu0 %v10289_v37  ;;  %5924 = vmatpush1.bf16.msra.mxu1 %v10291_v45 }
 0x742   :  { %5884 = vmatprep.subr.bf16.mxu0 %v10297_v17  ;;  %5925 = vmatprep.subr.bf16.mxu1 %v10299_v14 }
 0x745   :  { %5885 = vmatpush1.bf16.msra.mxu0 %v10301_v25  ;;  %5926 = vmatpush1.bf16.msra.mxu1 %v10303_v23 }
 0x746   :  { %5886 = vmatprep.subr.bf16.mxu0 %v10309_v49  ;;  %5927 = vmatprep.subr.bf16.mxu1 %v10311_v13 }
 0x749   :  { %5887 = vmatpush1.bf16.msra.mxu0 %v10313_v24  ;;  %5928 = vmatpush1.bf16.msra.mxu1 %v10315_v44 }
 0x74a   :  { %5888 = vmatprep.subr.bf16.mxu0 %v10321_v39  ;;  %5929 = vmatprep.subr.bf16.mxu1 %v10323_v51  ;;  %v10351_v51 = vld [vmem:[#allocation6 + $0xc8] ss:$16 sps:$4 sm:$0xff]   ;;  %v10427_v39 = vld [vmem:[#allocation6 + $0x1a4] ss:$16 sps:$4 sm:$0xff]  }
 0x74b   :  { %11245 = vst [vmem:[#allocation24_spill] sm:$0xff] %v10351_v51  ;;  %11270 = vst [vmem:[#allocation71_spill] sm:$0xff] %v10427_v39 }
 0x74d   :  { %5889 = vmatpush1.bf16.msra.mxu0 %v10325_v52  ;;  %5930 = vmatpush1.bf16.msra.mxu1 %v10327_v42  ;;  %v10347_v52 = vld [vmem:[#allocation6 + $0xcc] ss:$16 sps:$4 sm:$0xff]   ;;  %v10349_v42 = vld [vmem:[#allocation6 + $0xc0] ss:$16 sps:$4 sm:$0xff]  }
 0x74e   :  { %5890 = vmatprep.subr.bf16.mxu0 %v10333_v0  ;;  %5931 = vmatprep.subr.bf16.mxu1 %v10335_v47  ;;  %11243 = vst [vmem:[#allocation20_spill] sm:$0xff] %v10347_v52  ;;  %11244 = vst [vmem:[#allocation22_spill] sm:$0xff] %v10349_v42  ;;  %v10357_v47 = vld [vmem:[#allocation6 + $0xe4] ss:$16 sps:$4 sm:$0xff]   ;;  %v10363_v0 = vld [vmem:[#allocation6 + $0xe8] ss:$16 sps:$4 sm:$0xff]  }
 0x74f   :  { %11246 = vst [vmem:[#allocation21_spill] sm:$0xff] %v10357_v47  ;;  %11249 = vst [vmem:[#allocation26_spill] sm:$0xff] %v10363_v0 }
 0x751   :  { %5891 = vmatpush1.bf16.msra.mxu0 %v10337_v54  ;;  %5932 = vmatpush1.bf16.msra.mxu1 %v10339_v32  ;;  %v10359_v54 = vld [vmem:[#allocation6 + $0xec] ss:$16 sps:$4 sm:$0xff]   ;;  %v10361_v32 = vld [vmem:[#allocation6 + $0xe0] ss:$16 sps:$4 sm:$0xff]  }
 0x752   :  { %5892 = vmatprep.subr.bf16.mxu0 %v10345_v35  ;;  %5933 = vmatprep.subr.bf16.mxu1 %v10347_v52  ;;  %11247 = vst [vmem:[#allocation23_spill] sm:$0xff] %v10359_v54  ;;  %11248 = vst [vmem:[#allocation25_spill] sm:$0xff] %v10361_v32  ;;  %v10369_v52 = vld [vmem:[#allocation6 + $0x104] ss:$16 sps:$4 sm:$0xff]   ;;  %v10375_v35 = vld [vmem:[#allocation6 + $0x108] ss:$16 sps:$4 sm:$0xff]  }
 0x753   :  { %11250 = vst [vmem:[#allocation27_spill] sm:$0xff] %v10369_v52  ;;  %11253 = vst [vmem:[#allocation30_spill] sm:$0xff] %v10375_v35 }
 0x755   :  { %5893 = vmatpush1.bf16.msra.mxu0 %v10349_v42  ;;  %5934 = vmatpush1.bf16.msra.mxu1 %v10351_v51  ;;  %v10371_v42 = vld [vmem:[#allocation6 + $0x10c] ss:$16 sps:$4 sm:$0xff]   ;;  %v10373_v51 = vld [vmem:[#allocation6 + $0x100] ss:$16 sps:$4 sm:$0xff]  }
 0x756   :  { %5894 = vmatprep.subr.bf16.mxu0 %v10357_v47  ;;  %5935 = vmatprep.subr.bf16.mxu1 %v10359_v54  ;;  %11251 = vst [vmem:[#allocation28_spill] sm:$0xff] %v10371_v42  ;;  %11252 = vst [vmem:[#allocation29_spill] sm:$0xff] %v10373_v51  ;;  %v10381_v54 = vld [vmem:[#allocation6 + $0x124] ss:$16 sps:$4 sm:$0xff]   ;;  %v10387_v47 = vld [vmem:[#allocation6 + $0x128] ss:$16 sps:$4 sm:$0xff]  }
 0x757   :  { %11254 = vst [vmem:[#allocation31_spill] sm:$0xff] %v10381_v54  ;;  %11257 = vst [vmem:[#allocation47_spill] sm:$0xff] %v10387_v47 }
 0x759   :  { %5895 = vmatpush1.bf16.msra.mxu0 %v10361_v32  ;;  %5936 = vmatpush1.bf16.msra.mxu1 %v10363_v0  ;;  %v10383_v32 = vld [vmem:[#allocation6 + $0x12c] ss:$16 sps:$4 sm:$0xff]   ;;  %v10385_v0 = vld [vmem:[#allocation6 + $0x120] ss:$16 sps:$4 sm:$0xff]  }
 0x75a   :  { %5896 = vmatprep.subr.bf16.mxu0 %v10369_v52  ;;  %5937 = vmatprep.subr.bf16.mxu1 %v10371_v42  ;;  %11255 = vst [vmem:[#allocation32_spill] sm:$0xff] %v10383_v32  ;;  %11256 = vst [vmem:[#allocation33_spill] sm:$0xff] %v10385_v0  ;;  %v10393_v42 = vld [vmem:[#allocation6 + $0x144] ss:$16 sps:$4 sm:$0xff]   ;;  %v10399_v52 = vld [vmem:[#allocation6 + $0x148] ss:$16 sps:$4 sm:$0xff]  }
 0x75b   :  { %11258 = vst [vmem:[#allocation34_spill] sm:$0xff] %v10393_v42  ;;  %11261 = vst [vmem:[#allocation62_spill] sm:$0xff] %v10399_v52 }
 0x75d   :  { %5897 = vmatpush1.bf16.msra.mxu0 %v10373_v51  ;;  %5938 = vmatpush1.bf16.msra.mxu1 %v10375_v35  ;;  %v10395_v51 = vld [vmem:[#allocation6 + $0x14c] ss:$16 sps:$4 sm:$0xff]   ;;  %v10397_v35 = vld [vmem:[#allocation6 + $0x140] ss:$16 sps:$4 sm:$0xff]  }
 0x75e   :  { %5898 = vmatprep.subr.bf16.mxu0 %v10381_v54  ;;  %5939 = vmatprep.subr.bf16.mxu1 %v10383_v32  ;;  %11259 = vst [vmem:[#allocation48_spill] sm:$0xff] %v10395_v51  ;;  %11260 = vst [vmem:[#allocation61_spill] sm:$0xff] %v10397_v35  ;;  %v10405_v32 = vld [vmem:[#allocation6 + $0x164] ss:$16 sps:$4 sm:$0xff]   ;;  %v10411_v54 = vld [vmem:[#allocation6 + $0x168] ss:$16 sps:$4 sm:$0xff]  }
 0x75f   :  { %11262 = vst [vmem:[#allocation63_spill] sm:$0xff] %v10405_v32  ;;  %11265 = vst [vmem:[#allocation66_spill] sm:$0xff] %v10411_v54 }
 0x761   :  { %5899 = vmatpush1.bf16.msra.mxu0 %v10385_v0  ;;  %5940 = vmatpush1.bf16.msra.mxu1 %v10387_v47  ;;  %v10407_v0 = vld [vmem:[#allocation6 + $0x16c] ss:$16 sps:$4 sm:$0xff]   ;;  %v10409_v47 = vld [vmem:[#allocation6 + $0x160] ss:$16 sps:$4 sm:$0xff]  }
 0x762   :  { %5900 = vmatprep.subr.bf16.mxu0 %v10393_v42  ;;  %5941 = vmatprep.subr.bf16.mxu1 %v10395_v51  ;;  %11263 = vst [vmem:[#allocation64_spill] sm:$0xff] %v10407_v0  ;;  %11264 = vst [vmem:[#allocation65_spill] sm:$0xff] %v10409_v47  ;;  %v10417_v51 = vld [vmem:[#allocation6 + $0x184] ss:$16 sps:$4 sm:$0xff]   ;;  %v10423_v42 = vld [vmem:[#allocation6 + $0x188] ss:$16 sps:$4 sm:$0xff]  }
 0x763   :  { %11266 = vst [vmem:[#allocation67_spill] sm:$0xff] %v10417_v51  ;;  %11269 = vst [vmem:[#allocation70_spill] sm:$0xff] %v10423_v42 }
 0x765   :  { %5901 = vmatpush1.bf16.msra.mxu0 %v10397_v35  ;;  %5942 = vmatpush1.bf16.msra.mxu1 %v10399_v52  ;;  %v10419_v35 = vld [vmem:[#allocation6 + $0x18c] ss:$16 sps:$4 sm:$0xff]   ;;  %v10421_v52 = vld [vmem:[#allocation6 + $0x180] ss:$16 sps:$4 sm:$0xff]  }
 0x766   :  { %5902 = vmatprep.subr.bf16.mxu0 %v10405_v32  ;;  %5943 = vmatprep.subr.bf16.mxu1 %v10407_v0  ;;  %11267 = vst [vmem:[#allocation68_spill] sm:$0xff] %v10419_v35  ;;  %11268 = vst [vmem:[#allocation69_spill] sm:$0xff] %v10421_v52  ;;  %v10429_v32 = vld [vmem:[#allocation6 + $0x1ac] ss:$16 sps:$4 sm:$0xff]   ;;  %v10439_v0 = vld [vmem:[#allocation6 + $0x1c4] ss:$16 sps:$4 sm:$0xff]  }
 0x767   :  { %11271 = vst [vmem:[#allocation72_spill] sm:$0xff] %v10429_v32  ;;  %11274 = vst [vmem:[#allocation75_spill] sm:$0xff] %v10439_v0 }
 0x769   :  { %5903 = vmatpush1.bf16.msra.mxu0 %v10409_v47  ;;  %5944 = vmatpush1.bf16.msra.mxu1 %v10411_v54  ;;  %v10433_v54 = vld [vmem:[#allocation6 + $0x1a0] ss:$16 sps:$4 sm:$0xff]   ;;  %v10435_v47 = vld [vmem:[#allocation6 + $0x1a8] ss:$16 sps:$4 sm:$0xff]  }
 0x76a   :  { %5904 = vmatprep.subr.bf16.mxu0 %v10417_v51  ;;  %5945 = vmatprep.subr.bf16.mxu1 %v10419_v35  ;;  %11272 = vst [vmem:[#allocation73_spill] sm:$0xff] %v10433_v54  ;;  %11273 = vst [vmem:[#allocation74_spill] sm:$0xff] %v10435_v47  ;;  %v10441_v51 = vld [vmem:[#allocation6 + $0x1cc] ss:$16 sps:$4 sm:$0xff]   ;;  %v10445_v35 = vld [vmem:[#allocation6 + $0x1c0] ss:$16 sps:$4 sm:$0xff]  }
 0x76b   :  { %11275 = vst [vmem:[#allocation76_spill] sm:$0xff] %v10441_v51  ;;  %11276 = vst [vmem:[#allocation77_spill] sm:$0xff] %v10445_v35 }
 0x76d   :  { %5905 = vmatpush1.bf16.msra.mxu0 %v10421_v52  ;;  %5946 = vmatpush1.bf16.msra.mxu1 %v10423_v42  ;;  %v10447_v52 = vld [vmem:[#allocation6 + $0x1c8] ss:$16 sps:$4 sm:$0xff]   ;;  %v10451_v42 = vld [vmem:[#allocation6 + $0x1e4] ss:$16 sps:$4 sm:$0xff]  }
 0x76e   :  { %5906 = vmatprep.subr.bf16.mxu0 %v10427_v39  ;;  %5947 = vmatprep.subr.bf16.mxu1 %v10429_v32  ;;  %11277 = vst [vmem:[#allocation78_spill] sm:$0xff] %v10447_v52  ;;  %11278 = vst [vmem:[#allocation79_spill] sm:$0xff] %v10451_v42  ;;  %v10453_v39 = vld [vmem:[#allocation6 + $0x1ec] ss:$16 sps:$4 sm:$0xff]   ;;  %v10457_v32 = vld [vmem:[#allocation6 + $0x1e0] ss:$16 sps:$4 sm:$0xff]  }
 0x76f   :  { %11279 = vst [vmem:[#allocation80_spill] sm:$0xff] %v10453_v39  ;;  %11280 = vst [vmem:[#allocation81_spill] sm:$0xff] %v10457_v32 }
 0x771   :  { %5907 = vmatpush1.bf16.msra.mxu0 %v10433_v54  ;;  %5948 = vmatpush1.bf16.msra.mxu1 %v10435_v47  ;;  %v10459_v54 = vld [vmem:[#allocation6 + $0x1e8] ss:$16 sps:$4 sm:$0xff]  }
 0x772   :  { %5908 = vmatprep.subr.bf16.mxu0 %v10439_v0  ;;  %5949 = vmatprep.subr.bf16.mxu1 %v10441_v51  ;;  %11281 = vst [vmem:[#allocation82_spill] sm:$0xff] %v10459_v54 }
 0x775   :  { %5909 = vmatpush1.bf16.msra.mxu0 %v10445_v35  ;;  %5950 = vmatpush1.bf16.msra.mxu1 %v10447_v52 }
 0x776   :  { %5910 = vmatprep.subr.bf16.mxu0 %v10451_v42  ;;  %5951 = vmatprep.subr.bf16.mxu1 %v10453_v39 }
 0x779   :  { %5911 = vmatpush1.bf16.msra.mxu0 %v10457_v32  ;;  %5952 = vmatpush1.bf16.msra.mxu1 %v10459_v54 }
 0x77a   :  { %6183 = vmatprep.subr.bf16.mxu0 %v10149_v36  ;;  %6224 = vmatprep.subr.bf16.mxu1 %v10151_v46 }
 0x7ef   :  { %v5115_v51 = vpop.f32.mrb[44].mxu0  ;;  %v5156_v35 = vpop.f32.mrb[76].mxu1 }
 0x7f0   :  { %v5116_v52 = vadd.f32 %v5115_v51, %v11219_v27  ;;  %v5117_v0 = vpop.f32.mrb[45].mxu0  ;;  %v5158_v47 = vpop.f32.mrb[77].mxu1  ;;  %v5157_v46 = vadd.f32 %v5156_v35, %v11222_v56  ;;  %v11285_v56 = vld [vmem:[#allocation58_spill] sm:$0xff] }
 0x7f1   :  { %v5118_v44 = vadd.f32 %v5117_v0, %v11220_v31  ;;  %v5119_v24 = vpop.f32.mrb[46].mxu0  ;;  %v5160_v42 = vpop.f32.mrb[78].mxu1  ;;  %v5159_v36 = vadd.f32 %v5158_v47, %v11221_v53  ;;  %v11282_v47 = vld [vmem:[#allocation43_spill] sm:$0xff] }
 0x7f2   :  { %v7584_v13 = vmul.f32 -1.442695, %v5116_v52  ;;  %v5120_v39 = vpop.f32.mrb[47].mxu0  ;;  %v5161_v49 = vpop.f32.mrb[79].mxu1 }
 0x7f3   :  { %v7585_v32 = vmul.f32 -1.442695, %v5118_v44  ;;  %v7586_v54 = vmul.f32 -1.442695, %v5159_v36 }
 0x7f4   :  { %8622 = vpow2.f32 %v7584_v13 }
 0x7f5   :  { %8624 = vpow2.f32 %v7585_v32 }
 0x7f6   :  { %8626 = vpow2.f32 %v7586_v54  ;;  %v11283_v54 = vld [vmem:[#allocation57_spill] sm:$0xff] }
 0x7f7   :  { %8628 = vtanh.f32 %v5157_v46 }
 0x7fe   :  { %v8623_v23 = vpop.eup %8622 }
 0x7ff   :  { %v8625_v25 = vpop.eup %8624  ;;  %v5169_v51 = vadd.f32 1.0, %v8623_v23 }
 0x800   :  { %v5170_v27 = vadd.f32 1.0, %v8625_v25  ;;  %v8627_v24 = vpop.eup %8626 }
 0x801   :  { %8630 = vrcp.f32 %v5169_v51  ;;  %v8629_v52 = vpop.eup %8628  ;;  %v5179_v13 = vadd.f32 1.0, %v8627_v24 }
 0x802   :  { %8632 = vrcp.f32 %v5170_v27  ;;  %v11284_v27 = vld [vmem:[#allocation44_spill] sm:$0xff] }
 0x803   :  { %8634 = vrcp.f32 %v5179_v13 }
 0x80b   :  { %v8631_v39 = vpop.eup %8630 }
 0x80c   :  { %v8633_v49 = vpop.eup %8632  ;;  %v5183_v44 = vmul.f32 %v8631_v39, %v8629_v52 }
 0x80d   :  { %v5182_v32 = vmul.f32 %v8633_v49, %v10160_v7 }
 0x80f   :  { %v10472_v42 = vadd.f32 %v5183_v44, %v5182_v32  ;;  %v5418_v0 = vpop.f32.mrb[48].mxu0  ;;  %v5459_v35 = vpop.f32.mrb[80].mxu1 }
 0x810   :  { %v5466_v23 = vadd.f32 %v5418_v0, %v11282_v47  ;;  %v5468_v36 = vadd.f32 %v5459_v35, %v11283_v54  ;;  %v5420_v25 = vpop.f32.mrb[49].mxu0  ;;  %v5461_v46 = vpop.f32.mrb[81].mxu1 }
 0x811   :  { %v5467_v51 = vadd.f32 %v5420_v25, %v11284_v27  ;;  %v5469_v53 = vadd.f32 %v5461_v46, %v11285_v56  ;;  %v5422_v31 = vpop.f32.mrb[50].mxu0  ;;  %v5463_v52 = vpop.f32.mrb[82].mxu1  ;;  %8636 = vtanh.f32 %v10472_v42 }
 0x812   :  { %v7619_v7 = vmul.f32 -1.442695, %v5466_v23  ;;  %v5423_v24 = vpop.f32.mrb[51].mxu0  ;;  %v5464_v39 = vpop.f32.mrb[83].mxu1 }
 0x813   :  { %v7620_v49 = vmul.f32 -1.442695, %v5467_v51  ;;  %v8635_v44 = vpop.eup %8634  ;;  %v7621_v32 = vmul.f32 -1.442695, %v5469_v53 }
 0x814   :  { %8638 = vpow2.f32 %v7619_v7 }
 0x815   :  { %8640 = vpow2.f32 %v7620_v49 }
 0x816   :  { %8642 = vpow2.f32 %v7621_v32  ;;  %v11330_v32 = vld [vmem:[#allocation73_spill] sm:$0xff] }
 0x817   :  { %8644 = vtanh.f32 %v5468_v36 }
 0x81b   :  { %v8637_v13 = vpop.eup %8636 }
 0x81c   :  { %v10479_v0 = vmul.f32 %v8637_v13, %v8635_v44  ;;  %v11328_v44 = vld [vmem:[#allocation71_spill] sm:$0xff]  ;;  %v11329_v13 = vld [vmem:[#allocation72_spill] sm:$0xff] }
 0x81e   :  { %v8639_v35 = vpop.eup %8638  ;;  %v5495_v47 = vpack.c.bf16 %v10479_v0, %v10479_v0 }
 0x81f   :  { %v8641_v56 = vpop.eup %8640  ;;  %v5476_v31 = vadd.f32 1.0, %v8639_v35  ;;  %v11331_v35 = vld [vmem:[#allocation74_spill] sm:$0xff] }
 0x820   :  { %v5477_v54 = vadd.f32 1.0, %v8641_v56  ;;  %5912 = vmatprep.mubr.bf16.mxu0 %v5495_v47  ;;  %5953 = vmatprep.mubr.bf16.mxu1 %v5495_v47  ;;  %v8643_v23 = vpop.eup %8642  ;;  %v11332_v47 = vld [vmem:[#allocation75_spill] sm:$0xff]  ;;  %v11333_v56 = vld [vmem:[#allocation76_spill] sm:$0xff] }
 0x821   :  { %8646 = vrcp.f32 %v5476_v31  ;;  %v8645_v25 = vpop.eup %8644  ;;  %v5486_v51 = vadd.f32 1.0, %v8643_v23  ;;  %v11334_v31 = vld [vmem:[#allocation77_spill] sm:$0xff]  ;;  %v11336_v23 = vld [vmem:[#allocation79_spill] sm:$0xff] }
 0x822   :  { %8648 = vrcp.f32 %v5477_v54  ;;  %v11335_v54 = vld [vmem:[#allocation78_spill] sm:$0xff] }
 0x823   :  { %8650 = vrcp.f32 %v5486_v51 }
 0x82b   :  { %v8647_v46 = vpop.eup %8646 }
 0x82c   :  { %v8649_v27 = vpop.eup %8648  ;;  %v5490_v53 = vmul.f32 %v8647_v46, %v8645_v25  ;;  %v11337_v25 = vld [vmem:[#allocation80_spill] sm:$0xff]  ;;  %v11338_v46 = vld [vmem:[#allocation81_spill] sm:$0xff] }
 0x82d   :  { %v5489_v52 = vmul.f32 %v8649_v27, %v10172_v40  ;;  %v8651_v24 = vpop.eup %8650  ;;  %v11287_v40 = vld [vmem:[#allocation51_spill] sm:$0xff]  ;;  %v11339_v27 = vld [vmem:[#allocation82_spill] sm:$0xff] }
 0x82f   :  { %v10484_v7 = vadd.f32 %v5490_v53, %v5489_v52  ;;  %v10586_v53 = vld [vmem:[%s10681_s6] sm:$0xff]  }
 0x831   :  { %8652 = vtanh.f32 %v10484_v7 }
 0x83b   :  { %v8653_v36 = vpop.eup %8652 }
 0x83c   :  { %v5493_v39 = vmul.f32 %v8653_v36, %v8651_v24  ;;  %v11340_v24 = vld [vmem:[#allocation10_spill] sm:$0xff] }
 0x83e   :  { %v5494_v49 = vpack.c.bf16 %v5493_v39, %v5493_v39 }
 0x840   :  { %5913 = vmatmul.mubr.bf16.vlgmr.msra.gmra.mrb[52].mxu0 %v5494_v49  ;;  %5954 = vmatmul.mubr.bf16.vlgmr.msra.gmra.mrb[84].mxu1 %v5494_v49 }
 0x841   :  { %6184 = vmatpush1.bf16.msra.mxu0 %v10175_v48  ;;  %6225 = vmatpush1.bf16.msra.mxu1 %v10177_v33  ;;  %v11288_v48 = vld [vmem:[#allocation38_spill] sm:$0xff]  ;;  %v11289_v33 = vld [vmem:[#allocation52_spill] sm:$0xff] }
 0x842   :  { %6185 = vmatprep.subr.bf16.mxu0 %v10181_v55  ;;  %6226 = vmatprep.subr.bf16.mxu1 %v10183_v57  ;;  %v11290_v55 = vld [vmem:[#allocation39_spill] sm:$0xff]  ;;  %v11291_v57 = vld [vmem:[#allocation53_spill] sm:$0xff] }
 0x843   :  { %6215 = vmatprep.mubr.bf16.mxu0 %v10947_v41  ;;  %6256 = vmatprep.mubr.bf16.mxu1 %v10947_v41  ;;  %v11286_v41 = vld [vmem:[#allocation37_spill] sm:$0xff] }
 0x845   :  { %6186 = vmatpush1.bf16.msra.mxu0 %v10189_v60  ;;  %6227 = vmatpush1.bf16.msra.mxu1 %v10191_v58  ;;  %v11292_v60 = vld [vmem:[#allocation40_spill] sm:$0xff]  ;;  %v11293_v58 = vld [vmem:[#allocation54_spill] sm:$0xff] }
 0x846   :  { %6187 = vmatprep.subr.bf16.mxu0 %v10195_v59  ;;  %6228 = vmatprep.subr.bf16.mxu1 %v10197_v61  ;;  %v11294_v59 = vld [vmem:[#allocation36_spill] sm:$0xff]  ;;  %v11295_v61 = vld [vmem:[#allocation50_spill] sm:$0xff] }
 0x849   :  { %6188 = vmatpush1.bf16.msra.mxu0 %v10203_v62  ;;  %6229 = vmatpush1.bf16.msra.mxu1 %v10205_v63  ;;  %v11296_v62 = vld [vmem:[#allocation15_spill] sm:$0xff]  ;;  %v11297_v63 = vld [vmem:[#allocation16_spill] sm:$0xff] }
 0x84a   :  { %6189 = vmatprep.subr.bf16.mxu0 %v10209_v1  ;;  %6230 = vmatprep.subr.bf16.mxu1 %v10211_v2  ;;  %v11298_v1 = vld [vmem:[#allocation17_spill] sm:$0xff]  ;;  %v11299_v2 = vld [vmem:[#allocation18_spill] sm:$0xff] }
 0x84d   :  { %6190 = vmatpush1.bf16.msra.mxu0 %v10215_v3  ;;  %6231 = vmatpush1.bf16.msra.mxu1 %v10217_v4  ;;  %v11300_v3 = vld [vmem:[#allocation19_spill] sm:$0xff]  ;;  %v11301_v4 = vld [vmem:[#allocation20_spill] sm:$0xff] }
 0x84e   :  { %6191 = vmatprep.subr.bf16.mxu0 %v10221_v5  ;;  %6232 = vmatprep.subr.bf16.mxu1 %v10223_v6  ;;  %v11302_v5 = vld [vmem:[#allocation22_spill] sm:$0xff]  ;;  %v11303_v6 = vld [vmem:[#allocation24_spill] sm:$0xff] }
 0x851   :  { %6192 = vmatpush1.bf16.msra.mxu0 %v10227_v8  ;;  %6233 = vmatpush1.bf16.msra.mxu1 %v10229_v9  ;;  %v11304_v8 = vld [vmem:[#allocation21_spill] sm:$0xff]  ;;  %v11305_v9 = vld [vmem:[#allocation23_spill] sm:$0xff] }
 0x852   :  { %6193 = vmatprep.subr.bf16.mxu0 %v10233_v11  ;;  %6234 = vmatprep.subr.bf16.mxu1 %v10235_v12  ;;  %v11306_v11 = vld [vmem:[#allocation25_spill] sm:$0xff]  ;;  %v11307_v12 = vld [vmem:[#allocation26_spill] sm:$0xff] }
 0x855   :  { %6194 = vmatpush1.bf16.msra.mxu0 %v10239_v28  ;;  %6235 = vmatpush1.bf16.msra.mxu1 %v10241_v22  ;;  %v11308_v28 = vld [vmem:[#allocation27_spill] sm:$0xff]  ;;  %v11309_v22 = vld [vmem:[#allocation28_spill] sm:$0xff] }
 0x856   :  { %6195 = vmatprep.subr.bf16.mxu0 %v10245_v20  ;;  %6236 = vmatprep.subr.bf16.mxu1 %v10247_v26  ;;  %v11310_v20 = vld [vmem:[#allocation29_spill] sm:$0xff]  ;;  %v11311_v26 = vld [vmem:[#allocation30_spill] sm:$0xff] }
 0x859   :  { %6196 = vmatpush1.bf16.msra.mxu0 %v10251_v10  ;;  %6237 = vmatpush1.bf16.msra.mxu1 %v10253_v38  ;;  %v11312_v10 = vld [vmem:[#allocation31_spill] sm:$0xff]  ;;  %v11313_v38 = vld [vmem:[#allocation32_spill] sm:$0xff] }
 0x85a   :  { %6197 = vmatprep.subr.bf16.mxu0 %v10257_v43  ;;  %6238 = vmatprep.subr.bf16.mxu1 %v10259_v30  ;;  %v11314_v43 = vld [vmem:[#allocation33_spill] sm:$0xff]  ;;  %v11315_v30 = vld [vmem:[#allocation47_spill] sm:$0xff] }
 0x85d   :  { %6198 = vmatpush1.bf16.msra.mxu0 %v10263_v16  ;;  %6239 = vmatpush1.bf16.msra.mxu1 %v10265_v15  ;;  %v11316_v16 = vld [vmem:[#allocation34_spill] sm:$0xff]  ;;  %v11317_v15 = vld [vmem:[#allocation48_spill] sm:$0xff] }
 0x85e   :  { %6679 = vmatprep.subr.bf16.mxu0 %v10273_v50  ;;  %6720 = vmatprep.subr.bf16.mxu1 %v10275_v18  ;;  %v11318_v50 = vld [vmem:[#allocation61_spill] sm:$0xff]  ;;  %v11319_v18 = vld [vmem:[#allocation62_spill] sm:$0xff] }
 0x860   :  { %6216 = vmatmul.mubr.bf16.vlgmr.msra.gmra.mrb[56].mxu0 %v5494_v49  ;;  %6257 = vmatmul.mubr.bf16.vlgmr.msra.gmra.mrb[88].mxu1 %v5494_v49 }
 0x861   :  { %6680 = vmatpush1.bf16.msra.mxu0 %v10277_v21  ;;  %6721 = vmatpush1.bf16.msra.mxu1 %v10279_v19  ;;  %v11320_v21 = vld [vmem:[#allocation63_spill] sm:$0xff]  ;;  %v11321_v19 = vld [vmem:[#allocation64_spill] sm:$0xff] }
 0x862   :  { %6681 = vmatprep.subr.bf16.mxu0 %v10285_v29  ;;  %6722 = vmatprep.subr.bf16.mxu1 %v10287_v34  ;;  %v11322_v29 = vld [vmem:[#allocation65_spill] sm:$0xff]  ;;  %v11323_v34 = vld [vmem:[#allocation66_spill] sm:$0xff] }
 0x865   :  { %6682 = vmatpush1.bf16.msra.mxu0 %v10289_v37  ;;  %6723 = vmatpush1.bf16.msra.mxu1 %v10291_v45  ;;  %v11324_v37 = vld [vmem:[#allocation67_spill] sm:$0xff]  ;;  %v11325_v45 = vld [vmem:[#allocation68_spill] sm:$0xff] }
 0x866   :  { %6683 = vmatprep.subr.bf16.mxu0 %v10297_v17  ;;  %6724 = vmatprep.subr.bf16.mxu1 %v10299_v14  ;;  %v11326_v17 = vld [vmem:[#allocation69_spill] sm:$0xff]  ;;  %v11327_v14 = vld [vmem:[#allocation70_spill] sm:$0xff] }
 0x869   :  { %6684 = vmatpush1.bf16.msra.mxu0 %v11286_v41  ;;  %6725 = vmatpush1.bf16.msra.mxu1 %v11287_v40  ;;  %v11341_v41 = vld [vmem:[#allocation11_spill] sm:$0xff] }
 0x86a   :  { %6685 = vmatprep.subr.bf16.mxu0 %v11288_v48  ;;  %6726 = vmatprep.subr.bf16.mxu1 %v11289_v33 }
 0x86d   :  { %6686 = vmatpush1.bf16.msra.mxu0 %v11290_v55  ;;  %6727 = vmatpush1.bf16.msra.mxu1 %v11291_v57 }
 0x86e   :  { %6687 = vmatprep.subr.bf16.mxu0 %v11292_v60  ;;  %6728 = vmatprep.subr.bf16.mxu1 %v11293_v58 }
 0x871   :  { %6688 = vmatpush1.bf16.msra.mxu0 %v11294_v59  ;;  %6729 = vmatpush1.bf16.msra.mxu1 %v11295_v61  ;;  %v11342_v59 = vld [vmem:[#allocation12_spill] sm:$0xff] }
 0x872   :  { %6689 = vmatprep.subr.bf16.mxu0 %v11296_v62  ;;  %6730 = vmatprep.subr.bf16.mxu1 %v11297_v63  ;;  %v11343_v63 = vld [vmem:[#allocation13_spill] sm:$0xff] }
 0x875   :  { %6690 = vmatpush1.bf16.msra.mxu0 %v11298_v1  ;;  %6731 = vmatpush1.bf16.msra.mxu1 %v11299_v2 }
 0x876   :  { %6691 = vmatprep.subr.bf16.mxu0 %v11300_v3  ;;  %6732 = vmatprep.subr.bf16.mxu1 %v11301_v4 }
 0x879   :  { %6692 = vmatpush1.bf16.msra.mxu0 %v11302_v5  ;;  %6733 = vmatpush1.bf16.msra.mxu1 %v11303_v6 }
 0x87a   :  { %6693 = vmatprep.subr.bf16.mxu0 %v11304_v8  ;;  %6734 = vmatprep.subr.bf16.mxu1 %v11305_v9 }
 0x87d   :  { %6694 = vmatpush1.bf16.msra.mxu0 %v11306_v11  ;;  %6735 = vmatpush1.bf16.msra.mxu1 %v11307_v12 }
 0x87e   :  { %6695 = vmatprep.subr.bf16.mxu0 %v11308_v28  ;;  %6736 = vmatprep.subr.bf16.mxu1 %v11309_v22 }
 0x881   :  { %6696 = vmatpush1.bf16.msra.mxu0 %v11310_v20  ;;  %6737 = vmatpush1.bf16.msra.mxu1 %v11311_v26 }
 0x882   :  { %6697 = vmatprep.subr.bf16.mxu0 %v11312_v10  ;;  %6738 = vmatprep.subr.bf16.mxu1 %v11313_v38  ;;  %v11344_v38 = vld [vmem:[#allocation45_spill] sm:$0xff] }
 0x885   :  { %6698 = vmatpush1.bf16.msra.mxu0 %v11314_v43  ;;  %6739 = vmatpush1.bf16.msra.mxu1 %v11315_v30  ;;  %v11345_v30 = vld [vmem:[#allocation59_spill] sm:$0xff] }
 0x886   :  { %6699 = vmatprep.subr.bf16.mxu0 %v11316_v16  ;;  %6740 = vmatprep.subr.bf16.mxu1 %v11317_v15 }
 0x889   :  { %6700 = vmatpush1.bf16.msra.mxu0 %v11318_v50  ;;  %6741 = vmatpush1.bf16.msra.mxu1 %v11319_v18  ;;  %v11346_v18 = vld [vmem:[#allocation46_spill] sm:$0xff] }
 0x88a   :  { %6701 = vmatprep.subr.bf16.mxu0 %v11320_v21  ;;  %6742 = vmatprep.subr.bf16.mxu1 %v11321_v19  ;;  %v11347_v19 = vld [vmem:[#allocation60_spill] sm:$0xff] }
 0x88d   :  { %6702 = vmatpush1.bf16.msra.mxu0 %v11322_v29  ;;  %6743 = vmatpush1.bf16.msra.mxu1 %v11323_v34 }
 0x88e   :  { %6703 = vmatprep.subr.bf16.mxu0 %v11324_v37  ;;  %6744 = vmatprep.subr.bf16.mxu1 %v11325_v45 }
 0x891   :  { %6704 = vmatpush1.bf16.msra.mxu0 %v11326_v17  ;;  %6745 = vmatpush1.bf16.msra.mxu1 %v11327_v14 }
 0x892   :  { %6705 = vmatprep.subr.bf16.mxu0 %v11328_v44  ;;  %6746 = vmatprep.subr.bf16.mxu1 %v11329_v13 }
 0x895   :  { %6706 = vmatpush1.bf16.msra.mxu0 %v11330_v32  ;;  %6747 = vmatpush1.bf16.msra.mxu1 %v11331_v35 }
 0x896   :  { %6707 = vmatprep.subr.bf16.mxu0 %v11332_v47  ;;  %6748 = vmatprep.subr.bf16.mxu1 %v11333_v56 }
 0x899   :  { %6708 = vmatpush1.bf16.msra.mxu0 %v11334_v31  ;;  %6749 = vmatpush1.bf16.msra.mxu1 %v11335_v54 }
 0x89a   :  { %6709 = vmatprep.subr.bf16.mxu0 %v11336_v23  ;;  %6750 = vmatprep.subr.bf16.mxu1 %v11337_v25 }
 0x89d   :  { %6710 = vmatpush1.bf16.msra.mxu0 %v11338_v46  ;;  %6751 = vmatpush1.bf16.msra.mxu1 %v11339_v27 }
 0x89e   :  { %7812 = vmatprep.subr.bf16.mxu0 %v10586_v53 }
 0x913   :  { %v5914_v51 = vpop.f32.mrb[52].mxu0  ;;  %v5955_v52 = vpop.f32.mrb[84].mxu1 }
 0x914   :  { %v5915_v36 = vadd.f32 %v5914_v51, %v11340_v24  ;;  %v5916_v39 = vpop.f32.mrb[53].mxu0  ;;  %v5957_v49 = vpop.f32.mrb[85].mxu1  ;;  %v5956_v1 = vadd.f32 %v5955_v52, %v11343_v63 }
 0x915   :  { %v5917_v40 = vadd.f32 %v5916_v39, %v11341_v41  ;;  %v5918_v48 = vpop.f32.mrb[54].mxu0  ;;  %v5959_v33 = vpop.f32.mrb[86].mxu1  ;;  %v5958_v61 = vadd.f32 %v5957_v49, %v11342_v59 }
 0x916   :  { %v7686_v55 = vmul.f32 -1.442695, %v5915_v36  ;;  %v5919_v57 = vpop.f32.mrb[55].mxu0  ;;  %v5960_v60 = vpop.f32.mrb[87].mxu1 }
 0x917   :  { %v7687_v58 = vmul.f32 -1.442695, %v5917_v40  ;;  %v7688_v62 = vmul.f32 -1.442695, %v5958_v61  ;;  %v8439_v57 = vld [vmem:[%s10681_s6 + $0x8] sm:$0xff]   ;;  %v11348_v60 = vld [vmem:[#allocation14_spill] sm:$0xff] }
 0x918   :  { %8654 = vpow2.f32 %v7686_v55 }
 0x919   :  { %8656 = vpow2.f32 %v7687_v58  ;;  %v11349_v58 = vld [vmem:[#allocation35_spill] sm:$0xff] }
 0x91a   :  { %8658 = vpow2.f32 %v7688_v62  ;;  %v6794_v61 = vpack.c.bf16 %v11349_v58, %v11348_v60  ;;  %v8441_v62 = vld [vmem:[%s10681_s6 + $0x18] sm:$0xff]  }
 0x91b   :  { %8660 = vtanh.f32 %v5956_v1  ;;  %v8442_v1 = vld [vmem:[%s10681_s6 + $0x20] sm:$0xff]  }
 0x922   :  { %v8655_v2 = vpop.eup %8654 }
 0x923   :  { %v8657_v3 = vpop.eup %8656  ;;  %v5968_v4 = vadd.f32 1.0, %v8655_v2  ;;  %v8444_v2 = vld [vmem:[%s10681_s6 + $0x30] sm:$0xff]  }
 0x924   :  { %v5969_v5 = vadd.f32 1.0, %v8657_v3  ;;  %v8659_v6 = vpop.eup %8658  ;;  %v8445_v3 = vld [vmem:[%s10681_s6 + $0x38] sm:$0xff]  }
 0x925   :  { %8662 = vrcp.f32 %v5968_v4  ;;  %v8661_v8 = vpop.eup %8660  ;;  %v5978_v28 = vadd.f32 1.0, %v8659_v6  ;;  %v11350_v4 = vld [vmem:[#allocation49_spill] sm:$0xff] }
 0x926   :  { %8664 = vrcp.f32 %v5969_v5  ;;  %v11351_v5 = vld [vmem:[#allocation91_spill] sm:$0xff] }
 0x927   :  { %8666 = vrcp.f32 %v5978_v28  ;;  %v6795_v6 = vpack.c.bf16 %v11351_v5, %v11350_v4 }
 0x92f   :  { %v8663_v9 = vpop.eup %8662 }
 0x930   :  { %v8665_v11 = vpop.eup %8664  ;;  %v5982_v12 = vmul.f32 %v8663_v9, %v8661_v8  ;;  %v11352_v8 = vld [vmem:[#allocation92_spill] sm:$0xff] }
 0x931   :  { %v5981_v22 = vmul.f32 %v8665_v11, %v10472_v42  ;;  %v8667_v44 = vpop.eup %8666  ;;  %v6796_v9 = vpack.c.bf16 %v10479_v0, %v11352_v8 }
 0x933   :  { %v10594_v20 = vadd.f32 %v5982_v12, %v5981_v22  ;;  %v6217_v26 = vpop.f32.mrb[56].mxu0  ;;  %v6258_v10 = vpop.f32.mrb[88].mxu1 }
 0x934   :  { %v6265_v43 = vadd.f32 %v6217_v26, %v11344_v38  ;;  %v6267_v16 = vadd.f32 %v6258_v10, %v11345_v30  ;;  %v6219_v15 = vpop.f32.mrb[57].mxu0  ;;  %v6260_v50 = vpop.f32.mrb[89].mxu1 }
 0x935   :  { %v6266_v21 = vadd.f32 %v6219_v15, %v11346_v18  ;;  %v6268_v29 = vadd.f32 %v6260_v50, %v11347_v19  ;;  %v6221_v34 = vpop.f32.mrb[58].mxu0  ;;  %v6262_v37 = vpop.f32.mrb[90].mxu1  ;;  %8668 = vtanh.f32 %v10594_v20 }
 0x936   :  { %v7721_v42 = vmul.f32 -1.442695, %v6265_v43  ;;  %v6222_v45 = vpop.f32.mrb[59].mxu0  ;;  %v6263_v17 = vpop.f32.mrb[91].mxu1 }
 0x937   :  { %v7722_v14 = vmul.f32 -1.442695, %v6266_v21  ;;  %v7723_v32 = vmul.f32 -1.442695, %v6268_v29 }
 0x938   :  { %8670 = vpow2.f32 %v7721_v42 }
 0x939   :  { %8672 = vpow2.f32 %v7722_v14 }
 0x93a   :  { %8674 = vpow2.f32 %v7723_v32 }
 0x93b   :  { %8676 = vtanh.f32 %v6267_v16 }
 0x93f   :  { %v8669_v13 = vpop.eup %8668 }
 0x940   :  { %v10601_v35 = vmul.f32 %v8669_v13, %v8667_v44 }
 0x942   :  { %v8671_v47 = vpop.eup %8670  ;;  %v6294_v56 = vpack.c.bf16 %v10601_v35, %v10601_v35 }
 0x943   :  { %v8673_v31 = vpop.eup %8672  ;;  %v6275_v54 = vadd.f32 1.0, %v8671_v47 }
 0x944   :  { %v6276_v23 = vadd.f32 1.0, %v8673_v31  ;;  %6711 = vmatprep.mubr.bf16.mxu0 %v6294_v56  ;;  %6752 = vmatprep.mubr.bf16.mxu1 %v6294_v56  ;;  %v8675_v25 = vpop.eup %8674 }
 0x945   :  { %8678 = vrcp.f32 %v6275_v54  ;;  %v8677_v46 = vpop.eup %8676  ;;  %v6285_v36 = vadd.f32 1.0, %v8675_v25 }
 0x946   :  { %8680 = vrcp.f32 %v6276_v23 }
 0x947   :  { %8682 = vrcp.f32 %v6285_v36 }
 0x94f   :  { %v8679_v27 = vpop.eup %8678 }
 0x950   :  { %v8681_v51 = vpop.eup %8680  ;;  %v6289_v52 = vmul.f32 %v8679_v27, %v8677_v46 }
 0x951   :  { %v6288_v39 = vmul.f32 %v8681_v51, %v10484_v7  ;;  %v8683_v40 = vpop.eup %8682  ;;  %v8440_v7 = vld [vmem:[%s10681_s6 + $0x10] sm:$0xff]  }
 0x953   :  { %v6290_v49 = vadd.f32 %v6289_v52, %v6288_v39 }
 0x955   :  { %8684 = vtanh.f32 %v6290_v49 }
 0x95f   :  { %v8685_v48 = vpop.eup %8684 }
 0x960   :  { %v6292_v33 = vmul.f32 %v8685_v48, %v8683_v40 }
 0x962   :  { %v6293_v55 = vpack.c.bf16 %v6292_v33, %v6292_v33 }
 0x964   :  { %6712 = vmatmul.mubr.bf16.vlgmr.msra.gmra.mrb[60].mxu0 %v6293_v55  ;;  %6753 = vmatmul.mubr.bf16.vlgmr.msra.gmra.mrb[92].mxu1 %v6293_v55 }
 0x965   :  { %7813 = vmatpush3.bf16.msra.mxu0 %v10586_v53  ;;  %7828 = vmatprep.mubr.bf16.mxu0 %v6794_v61  ;;  %v8443_v53 = vld [vmem:[%s10681_s6 + $0x28] sm:$0xff]  }
 0x966   :  { %7814 = vmatprep.subr.bf16.mxu0 %v8439_v57 }
 0x969   :  { %7815 = vmatpush3.bf16.msra.mxu0 %v8439_v57 }
 0x96a   :  { %7816 = vmatprep.subr.bf16.mxu0 %v8440_v7 }
 0x96d   :  { %7817 = vmatpush3.bf16.msra.mxu0 %v8440_v7 }
 0x96e   :  { %7818 = vmatprep.subr.bf16.mxu0 %v8441_v62 }
 0x971   :  { %7819 = vmatpush3.bf16.msra.mxu0 %v8441_v62 }
 0x972   :  { %7820 = vmatprep.subr.bf16.mxu0 %v8442_v1 }
 0x975   :  { %7821 = vmatpush3.bf16.msra.mxu0 %v8442_v1 }
 0x976   :  { %7822 = vmatprep.subr.bf16.mxu0 %v8443_v53 }
 0x979   :  { %7823 = vmatpush3.bf16.msra.mxu0 %v8443_v53 }
 0x97a   :  { %7824 = vmatprep.subr.bf16.mxu0 %v8444_v2 }
 0x97d   :  { %7825 = vmatpush3.bf16.msra.mxu0 %v8444_v2 }
 0x97e   :  { %7826 = vmatprep.subr.bf16.mxu0 %v8445_v3 }
 0x981   :  { %7827 = vmatpush3.bf16.msra.mxu0 %v8445_v3 }
 0x984   :  { %7829 = vmatmul.mubr.bf16.vlgmr.msra.gmra.mrb[64].mxu0 %v6795_v6 }
 0x985   :  { %7832 = vmatprep.mubr.bf16.mxu0 %v6796_v9 }
 0xa37   :  { %v6713_v11 = vpop.f32.mrb[60].mxu0  ;;  %v6754_v12 = vpop.f32.mrb[92].mxu1 }
 0xa38   :  { %v6714_v28 = vadd.f32 %v6713_v11, %v11340_v24  ;;  %v6715_v22 = vpop.f32.mrb[61].mxu0  ;;  %v6756_v26 = vpop.f32.mrb[93].mxu1  ;;  %v6755_v21 = vadd.f32 %v6754_v12, %v11343_v63 }
 0xa39   :  { %v6716_v10 = vadd.f32 %v6715_v22, %v11341_v41  ;;  %v6717_v38 = vpop.f32.mrb[62].mxu0  ;;  %v6758_v43 = vpop.f32.mrb[94].mxu1  ;;  %v6757_v0 = vadd.f32 %v6756_v26, %v11342_v59  ;;  %v7791_v59 = vld [vmem:[%s10682_s7] ss:$0 sm:$0xff] }
 0xa3a   :  { %v7788_v30 = vmul.f32 -1.442695, %v6714_v28  ;;  %v6718_v16 = vpop.f32.mrb[63].mxu0  ;;  %v6759_v15 = vpop.f32.mrb[95].mxu1 }
 0xa3b   :  { %v7789_v50 = vmul.f32 -1.442695, %v6716_v10  ;;  %v7790_v18 = vmul.f32 -1.442695, %v6757_v0 }
 0xa3c   :  { %8686 = vpow2.f32 %v7788_v30 }
 0xa3d   :  { %8688 = vpow2.f32 %v7789_v50 }
 0xa3e   :  { %8690 = vpow2.f32 %v7790_v18 }
 0xa3f   :  { %8692 = vtanh.f32 %v6755_v21 }
 0xa46   :  { %v8687_v19 = vpop.eup %8686 }
 0xa47   :  { %v8689_v29 = vpop.eup %8688  ;;  %v6767_v24 = vadd.f32 1.0, %v8687_v19 }
 0xa48   :  { %v6768_v34 = vadd.f32 1.0, %v8689_v29  ;;  %v8691_v41 = vpop.eup %8690 }
 0xa49   :  { %8694 = vrcp.f32 %v6767_v24  ;;  %v8693_v37 = vpop.eup %8692  ;;  %v6777_v14 = vadd.f32 1.0, %v8691_v41 }
 0xa4a   :  { %8696 = vrcp.f32 %v6768_v34 }
 0xa4b   :  { %8698 = vrcp.f32 %v6777_v14 }
 0xa53   :  { %v8695_v42 = vpop.eup %8694 }
 0xa54   :  { %v8697_v45 = vpop.eup %8696  ;;  %v6781_v17 = vmul.f32 %v8695_v42, %v8693_v37 }
 0xa55   :  { %v6780_v44 = vmul.f32 %v8697_v45, %v10594_v20  ;;  %v8699_v25 = vpop.eup %8698 }
 0xa57   :  { %v7830_v63 = vpop.f32.mrb[64].mxu0  ;;  %v6782_v13 = vadd.f32 %v6781_v17, %v6780_v44 }
 0xa58   :  { %v6912_v32 = vadd.f32 %v7830_v63, %v7791_v59  ;;  %v6903_v47 = vpop.f32.mrb[65].mxu0 }
 0xa59   :  { %v6904_v56 = vadd.f32 %v7791_v59, %v6903_v47  ;;  %v7831_v31 = vpop.f32.mrb[66].mxu0  ;;  %8700 = vtanh.f32 %v6782_v13 }
 0xa5a   :  { %6937 = vst.msk [vmem:[%s10683_s8 + $0x10] sm:$0xff] %vm6934_vm2, %v6912_v32  ;;  %v6915_v54 = vadd.f32 %v7831_v31, %v7791_v59  ;;  %v6906_v20 = vpop.f32.mrb[67].mxu0 }
 0xa5b   :  { %6935 = vst.msk [vmem:[%s10683_s8] sm:$0xff] %vm6934_vm2, %v6904_v56  ;;  %v6907_v23 = vadd.f32 %v7791_v59, %v6906_v20 }
 0xa5c   :  { %6938 = vst.msk [vmem:[%s10683_s8 + $0x18] sm:$0xff] %vm6934_vm2, %v6915_v54 }
 0xa5d   :  { %6936 = vst.msk [vmem:[%s10683_s8 + $0x8] sm:$0xff] %vm6934_vm2, %v6907_v23 }
 0xa63   :  { %v8701_v46 = vpop.eup %8700 }
 0xa64   :  { %v6784_v27 = vmul.f32 %v8701_v46, %v8699_v25 }
 0xa66   :  { %v6797_v51 = vpack.c.bf16 %v6784_v27, %v10601_v35 }
 0xa68   :  { %7833 = vmatmul.mubr.bf16.gmra.mrb[68].mxu0 %v6797_v51 }
 0xb3b   :  { %v7834_v52 = vpop.f32.mrb[68].mxu0 }
 0xb3c   :  { %v6928_v36 = vadd.f32 %v7834_v52, %v7791_v59  ;;  %v6919_v39 = vpop.f32.mrb[69].mxu0 }
 0xb3d   :  { %v6920_v49 = vadd.f32 %v7791_v59, %v6919_v39  ;;  %v7835_v40 = vpop.f32.mrb[70].mxu0 }
 0xb3e   :  { %6941 = vst.msk [vmem:[%s10683_s8 + $0x30] sm:$0xff] %vm6934_vm2, %v6928_v36  ;;  %v6931_v48 = vadd.f32 %v7835_v40, %v7791_v59  ;;  %v6922_v33 = vpop.f32.mrb[71].mxu0 }
 0xb3f   :  { %6939 = vst.msk [vmem:[%s10683_s8 + $0x20] sm:$0xff] %vm6934_vm2, %v6920_v49  ;;  %v6923_v55 = vadd.f32 %v7791_v59, %v6922_v33 }
 0xb40   :  { %6942 = vst.msk [vmem:[%s10683_s8 + $0x38] sm:$0xff] %vm6934_vm2, %v6931_v48 }
 0xb41   :  { %6940 = vst.msk [vmem:[%s10683_s8 + $0x28] sm:$0xff] %vm6934_vm2, %v6923_v55 }
 0xb42   :  { %6947 = vsyncpa [#allocation5], 1 }
 0xb43   :  { %6948 = vsyncpa [#allocation7], 1 }

</bundles_post_ra>
